<compile_context>
chip_gen: v7x
topology: tpu7x:2x2x1
jax: 0.10.0
libtpu: 0.0.40
codegen_flags: <defaults>
</compile_context>

<pallas_src>
import functools

import jax
import jax.numpy as jnp
import numpy as np
from jax.experimental import pallas as pl
from jax.experimental.pallas import tpu as pltpu

LEAKY_SLOPE = 0.01   # nn.LeakyReLU() default negative_slope
LN_EPS = 1e-5        # LayerNorm eps
_MiB = 1024 * 1024


# ---------------------------------------------------------------------------
# Kernel helpers
# ---------------------------------------------------------------------------
def _ln_lrelu(x, g, b, eps):
    """Channel LayerNorm (torch.var unbiased=False) + LeakyReLU on (M, C) f32.

    One-pass variance (mean(x^2) - mean(x)^2) so the two cross-lane reductions
    are independent; rsqrt goes to the EUP instead of a VPU divide."""
    mean = jnp.mean(x, axis=-1, keepdims=True)
    var = jnp.maximum(jnp.mean(x * x, axis=-1, keepdims=True) - mean * mean, 0.0)
    inv = jax.lax.rsqrt(var + eps)
    y = (x - mean) * inv * g + b
    return jnp.where(y >= 0, y, LEAKY_SLOPE * y)


def _conv_kxk(read_window, w_ref, bias, rows, W, K):
    """KxK 'same' conv as K*K accumulated MXU matmuls over shifted windows.

    read_window(dy, dx) -> (rows, W, Cin) bf16 view of a zero-padded source.
    w_ref: (K*K, Cin, Cout) bf16.  bias: (1, Cout) f32.
    Returns (rows*W, Cout) f32.  No im2col patch matrix is materialized:
    each shifted window is read once and fed straight to the MXU."""
    cin = w_ref.shape[1]
    cout = w_ref.shape[2]
    acc = jnp.broadcast_to(bias.astype(jnp.float32), (rows * W, cout))
    for dy in range(K):
        for dx in range(K):
            a = read_window(dy, dx).reshape(rows * W, cin)
            acc = acc + jnp.dot(a, w_ref[dy * K + dx],
                                preferred_element_type=jnp.float32)
    return acc


# ---------------------------------------------------------------------------
# Fused kernel body (one (image, row-tile) per grid step)
# ---------------------------------------------------------------------------
def _resblock_kernel(x_ref, w1_ref, bc1_ref, g1_ref, b1_ref,
                     w2_ref, bc2_ref, g2_ref, b2_ref,
                     wres_ref, bres_ref, o_ref, hpad_ref,
                     *, TH, W, K1, eps, n_row_tiles):
    t = pl.program_id(1)
    P1 = K1 // 2            # block1 conv padding
    P2 = 1                  # block2 conv is always 3x3, padding=1
    HALO = P1 + P2          # x row halo carried by the input tile
    RH1 = TH + 2 * P2       # h rows needed: output tile + conv2 halo
    Cmid = hpad_ref.shape[-1]
    Cout = o_ref.shape[-1]
    Wp2 = W + 2 * P2

    # ---- block1: conv + LayerNorm + LeakyReLU on TH + 2 rows --------------
    # x_ref is already zero-padded (H by HALO, W by P1) in the wrapper.
    h = _ln_lrelu(
        _conv_kxk(lambda dy, dx: x_ref[0, dy:dy + RH1, dx:dx + W, :],
                  w1_ref, bc1_ref[...], RH1, W, K1),
        g1_ref[...], b1_ref[...], eps)

    # Stage h in a zero-padded VMEM scratch (never round-trips through HBM).
    hpad_ref[:, P2:P2 + W, :] = h.reshape(RH1, W, Cmid).astype(hpad_ref.dtype)
    zcol = jnp.zeros((RH1, P2, Cmid), hpad_ref.dtype)
    hpad_ref[:, 0:P2, :] = zcol
    hpad_ref[:, P2 + W:Wp2, :] = zcol

    # h rows outside the image are conv2 zero-padding, not conv1 outputs.
    zrow = jnp.zeros((P2, Wp2, Cmid), hpad_ref.dtype)

    @pl.when(t == 0)
    def _():
        hpad_ref[0:P2, :, :] = zrow

    @pl.when(t == n_row_tiles - 1)
    def _():
        hpad_ref[P2 + TH:RH1, :, :] = zrow

    # ---- block2: conv3x3 + LayerNorm + LeakyReLU on the TH output rows ----
    y = _ln_lrelu(
        _conv_kxk(lambda dy, dx: hpad_ref[dy:dy + TH, dx:dx + W, :],
                  w2_ref, bc2_ref[...], TH, W, 3),
        g2_ref[...], b2_ref[...], eps)

    # ---- residual 1x1 conv on the tile interior of x + add ----------------
    xin = x_ref[0, HALO:HALO + TH, P1:P1 + W, :]
    res = jnp.dot(xin.reshape(TH * W, xin.shape[-1]), wres_ref[...],
                  preferred_element_type=jnp.float32) + bres_ref[...]

    # NOTE: at real hyperencoder sizes Cout >= 128, so the output block's last
    # dim is lane-dense (no masked partial stores).
    o_ref[0] = (y + res).reshape(TH, W, Cout).astype(o_ref.dtype)


# ---------------------------------------------------------------------------
# Row-tile picker (rough per-step VMEM estimate)
# ---------------------------------------------------------------------------
def _pick_row_tile(H, W, cin, cmid, cout, k1, budget_bytes):
    p1, p2 = k1 // 2, 1
    halo = p1 + p2
    best = 1
    for th in range(1, H + 1):
        if H % th:
            continue
        est = (2 * (th + 2 * halo) * (W + 2 * p1) * cin * 2      # x tile, bf16, 2 bufs
               + 2 * th * W * cout * 4                            # out tile, f32, 2 bufs
               + (th + 2 * p2) * (W + 2 * p2) * cmid * 2          # h scratch, bf16
               + (th + 2 * p2) * W * cmid * 4                     # conv1 f32 accumulator
               + th * W * cout * 4                                # conv2 f32 accumulator
               + (k1 * k1 * cin * cmid + 9 * cmid * cout + cin * cout) * 2)  # weights
        if est <= budget_bytes:
            best = th
    return best


# ---------------------------------------------------------------------------
# Wrapper
# ---------------------------------------------------------------------------
def my_resnet_block_pallas(x_nchw, params, *, row_tile=None, out_dtype=jnp.float32):
    """Forward pass of myResnetBlock. Input/output are NCHW (PyTorch layout)."""
    # TODO(synk): keep the surrounding model NHWC to drop these boundary
    # transposes (each is a fused HBM pass over the activation).
    x = jnp.transpose(x_nchw, (0, 2, 3, 1)).astype(jnp.bfloat16)   # NHWC, bf16
    N, H, W, Cin = x.shape

    w1 = params["w1"]
    K1 = w1.shape[0]
    Cmid = w1.shape[-1]
    w2 = params["w2"]
    Cout = w2.shape[-1]
    P1, P2 = K1 // 2, 1
    HALO = P1 + P2

    # Generation-aware VMEM budget (v5e/v6e: 128 MiB physical, v7x: 64 MiB).
    try:
        cap = getattr(pltpu.get_tpu_info(), "vmem_capacity_bytes", 128 * _MiB)
    except Exception:
        cap = 64 * _MiB
    vmem_limit = int(min(cap - 12 * _MiB, 100 * _MiB))

    if row_tile is None:
        row_tile = _pick_row_tile(H, W, Cin, Cmid, Cout, K1,
                                  budget_bytes=vmem_limit // 2)
    TH = row_tile
    if H % TH:
        raise ValueError(f"row_tile={TH} must divide H={H}")
    T = H // TH
    RHX = TH + 2 * HALO
    WP = W + 2 * P1

    # Zero-pad spatially and materialize overlapping row windows so every grid
    # step is a plain Blocked tile; this fuses with the transpose/cast above.
    # TODO(synk): replace with pl.Element row windows or a manual HBM DMA to
    # avoid duplicating the 2*HALO halo rows in HBM.
    xp = jnp.pad(x, ((0, 0), (HALO, HALO), (P1, P1), (0, 0)))
    x_tiles = jnp.stack([xp[:, i * TH:i * TH + RHX] for i in range(T)], axis=1)
    x_tiles = x_tiles.reshape(N * T, RHX, WP, Cin)

    # Conv weights as (K*K, Cin, Cout) bf16 (f32 accumulation on the MXU).
    w1m = w1.reshape(K1 * K1, Cin, Cmid).astype(jnp.bfloat16)
    w2m = w2.reshape(9, Cmid, Cout).astype(jnp.bfloat16)
    wres = params["wres"].astype(jnp.bfloat16)

    kernel = functools.partial(_resblock_kernel, TH=TH, W=W, K1=K1,
                               eps=LN_EPS, n_row_tiles=T)

    # Constant-index operands are fetched once; single-buffer them.
    const = dict(pipeline_mode=pl.Buffered(1))

    out = pl.pallas_call(
        kernel,
        out_shape=jax.ShapeDtypeStruct((N, H, W, Cout), out_dtype),
        grid_spec=pltpu.PrefetchScalarGridSpec(
            num_scalar_prefetch=0,
            grid=(N, T),
            in_specs=[
                pl.BlockSpec((1, RHX, WP, Cin), lambda n, t: (n * T + t, 0, 0, 0)),
                pl.BlockSpec((K1 * K1, Cin, Cmid), lambda n, t: (0, 0, 0), **const),
                pl.BlockSpec((1, Cmid), lambda n, t: (0, 0), **const),   # conv1 bias
                pl.BlockSpec((1, Cmid), lambda n, t: (0, 0), **const),   # ln1 gamma
                pl.BlockSpec((1, Cmid), lambda n, t: (0, 0), **const),   # ln1 beta
                pl.BlockSpec((9, Cmid, Cout), lambda n, t: (0, 0, 0), **const),
                pl.BlockSpec((1, Cout), lambda n, t: (0, 0), **const),   # conv2 bias
                pl.BlockSpec((1, Cout), lambda n, t: (0, 0), **const),   # ln2 gamma
                pl.BlockSpec((1, Cout), lambda n, t: (0, 0), **const),   # ln2 beta
                pl.BlockSpec((Cin, Cout), lambda n, t: (0, 0), **const), # res 1x1 w
                pl.BlockSpec((1, Cout), lambda n, t: (0, 0), **const),   # res bias
            ],
            out_specs=pl.BlockSpec((1, TH, W, Cout), lambda n, t: (n, t, 0, 0)),
            scratch_shapes=[
                pltpu.VMEM((TH + 2 * P2, W + 2 * P2, Cmid), jnp.bfloat16),  # padded h
            ],
        ),
        compiler_params=pltpu.CompilerParams(
            dimension_semantics=("parallel", "parallel"),
            vmem_limit_bytes=vmem_limit,
        ),
    )(x_tiles, w1m, params["bc1"], params["g1"], params["b1"],
      w2m, params["bc2"], params["g2"], params["b2"],
      wres, params["bres"])

    return jnp.transpose(out, (0, 3, 1, 2))                         # -> NCHW


# ---------------------------------------------------------------------------
# Pure-JAX reference (for correctness check)
# ---------------------------------------------------------------------------
def _ref_forward(x_nhwc, p):
    def conv(x, w, b, pad):
        y = jax.lax.conv_general_dilated(
            x, w, window_strides=(1, 1), padding=[(pad, pad), (pad, pad)],
            dimension_numbers=("NHWC", "HWIO", "NHWC"))
        return y + b.reshape(1, 1, 1, -1)

    def ln(x, g, b):
        mean = x.mean(-1, keepdims=True)
        var = ((x - mean) ** 2).mean(-1, keepdims=True)
        return (x - mean) / jnp.sqrt(var + LN_EPS) * g.reshape(1, 1, 1, -1) + b.reshape(1, 1, 1, -1)

    def lrelu(x):
        return jnp.where(x >= 0, x, LEAKY_SLOPE * x)

    h = lrelu(ln(conv(x_nhwc, p["w1"], p["bc1"], p["w1"].shape[0] // 2), p["g1"], p["b1"]))
    h = lrelu(ln(conv(h, p["w2"], p["bc2"], 1), p["g2"], p["b2"]))
    res = jnp.einsum("nhwc,cd->nhwd", x_nhwc, p["wres"]) + p["bres"].reshape(1, 1, 1, -1)
    return h + res


# ---------------------------------------------------------------------------
# Main
# ---------------------------------------------------------------------------
if __name__ == "__main__":
    N, dim, dim_out, H, W = 2, 4, 8, 16, 16   # dim != dim_out -> res_conv is a 1x1 conv
    K = 3                                      # large_filter=False

    key = jax.random.PRNGKey(0)
    keys = jax.random.split(key, 8)

    params = {
        # block1: Conv2d(dim, dim_out, 3, padding=1) + LayerNorm(dim_out)
        "w1": jax.random.normal(keys[0], (K, K, dim, dim_out), jnp.float32) * 0.1,
        "bc1": jax.random.normal(keys[1], (1, dim_out), jnp.float32) * 0.1,
        "g1": jnp.ones((1, dim_out), jnp.float32),
        "b1": jnp.zeros((1, dim_out), jnp.float32),
        # block2: Conv2d(dim_out, dim_out, 3, padding=1) + LayerNorm(dim_out)
        "w2": jax.random.normal(keys[2], (K, K, dim_out, dim_out), jnp.float32) * 0.1,
        "bc2": jax.random.normal(keys[3], (1, dim_out), jnp.float32) * 0.1,
        "g2": jnp.ones((1, dim_out), jnp.float32),
        "b2": jnp.zeros((1, dim_out), jnp.float32),
        # res_conv: Conv2d(dim, dim_out, 1)
        "wres": jax.random.normal(keys[4], (dim, dim_out), jnp.float32) * 0.1,
        "bres": jax.random.normal(keys[5], (1, dim_out), jnp.float32) * 0.1,
    }

    x_nchw = jax.random.normal(keys[6], (N, dim, H, W), jnp.float32)

    # row_tile=8 -> 2 row tiles per image: exercises the halo / boundary logic.
    out = my_resnet_block_pallas(x_nchw, params, row_tile=8)
    out = jax.block_until_ready(out)
    assert out.shape == (N, dim_out, H, W), out.shape

    # correctness vs. pure-JAX f32 reference (bf16 MXU operands -> looser tol)
    x_nhwc = jnp.transpose(x_nchw, (0, 2, 3, 1))
    ref = jnp.transpose(_ref_forward(x_nhwc, params), (0, 3, 1, 2))
    np.testing.assert_allclose(np.asarray(out), np.asarray(ref), atol=5e-2, rtol=5e-2)

    print("KERNEL_OK")
</pallas_src>

<mosaic_0001>
module attributes {stable_mosaic.version = 11 : i64} {
  func.func @_resblock_kernel(%arg0: i32, %arg1: i32, %arg2: memref<1x12x18x4xbf16, #tpu.memory_space<vmem>>, %arg3: memref<9x4x8xbf16, #tpu.memory_space<vmem>>, %arg4: memref<1x8xf32, #tpu.memory_space<vmem>>, %arg5: memref<1x8xf32, #tpu.memory_space<vmem>>, %arg6: memref<1x8xf32, #tpu.memory_space<vmem>>, %arg7: memref<9x8x8xbf16, #tpu.memory_space<vmem>>, %arg8: memref<1x8xf32, #tpu.memory_space<vmem>>, %arg9: memref<1x8xf32, #tpu.memory_space<vmem>>, %arg10: memref<1x8xf32, #tpu.memory_space<vmem>>, %arg11: memref<4x8xbf16, #tpu.memory_space<vmem>>, %arg12: memref<1x8xf32, #tpu.memory_space<vmem>>, %arg13: memref<1x8x16x8xf32, #tpu.memory_space<vmem>>, %arg14: memref<10x18x8xbf16, #tpu.memory_space<vmem>>) attributes {dimension_semantics = [#tpu.dimension_semantics<parallel>, #tpu.dimension_semantics<parallel>], iteration_bounds = array<i64: 2, 2>, scalar_prefetch = 0 : i64, scratch_operands = 1 : i64, tpu.core_type = #tpu.core_type<tc>, window_params = [{transform_indices = @transform_0, window_bounds = array<i64: 1, 12, 18, 4>}, {pipeline_mode = #tpu.pipeline_mode<synchronous>, transform_indices = @transform_1, window_bounds = array<i64: 9, 4, 8>}, {pipeline_mode = #tpu.pipeline_mode<synchronous>, transform_indices = @transform_2, window_bounds = array<i64: 1, 8>}, {pipeline_mode = #tpu.pipeline_mode<synchronous>, transform_indices = @transform_3, window_bounds = array<i64: 1, 8>}, {pipeline_mode = #tpu.pipeline_mode<synchronous>, transform_indices = @transform_4, window_bounds = array<i64: 1, 8>}, {pipeline_mode = #tpu.pipeline_mode<synchronous>, transform_indices = @transform_5, window_bounds = array<i64: 9, 8, 8>}, {pipeline_mode = #tpu.pipeline_mode<synchronous>, transform_indices = @transform_6, window_bounds = array<i64: 1, 8>}, {pipeline_mode = #tpu.pipeline_mode<synchronous>, transform_indices = @transform_7, window_bounds = array<i64: 1, 8>}, {pipeline_mode = #tpu.pipeline_mode<synchronous>, transform_indices = @transform_8, window_bounds = array<i64: 1, 8>}, {pipeline_mode = #tpu.pipeline_mode<synchronous>, transform_indices = @transform_9, window_bounds = array<i64: 4, 8>}, {pipeline_mode = #tpu.pipeline_mode<synchronous>, transform_indices = @transform_10, window_bounds = array<i64: 1, 8>}, {transform_indices = @transform_11, window_bounds = array<i64: 1, 8, 16, 8>}]} {
    %c0 = arith.constant 0 : index
    %c0_0 = arith.constant 0 : index
    %0 = vector.load %arg4[%c0, %c0_0] : memref<1x8xf32, #tpu.memory_space<vmem>>, vector<1x8xf32>
    %1 = vector.shape_cast %0 : vector<1x8xf32> to vector<1x8xf32>
    %2 = vector.broadcast %1 : vector<1x8xf32> to vector<160x8xf32>
    %c0_1 = arith.constant 0 : index
    %c0_2 = arith.constant 0 : index
    %c0_3 = arith.constant 0 : index
    %c0_4 = arith.constant 0 : index
    %3 = vector.load %arg2[%c0_1, %c0_2, %c0_3, %c0_4] : memref<1x12x18x4xbf16, #tpu.memory_space<vmem>>, vector<1x10x16x4xbf16>
    %4 = vector.shape_cast %3 : vector<1x10x16x4xbf16> to vector<10x16x4xbf16>
    %5 = vector.shape_cast %4 : vector<10x16x4xbf16> to vector<160x4xbf16>
    %c0_5 = arith.constant 0 : index
    %c0_6 = arith.constant 0 : index
    %c0_7 = arith.constant 0 : index
    %6 = vector.load %arg3[%c0_5, %c0_6, %c0_7] : memref<9x4x8xbf16, #tpu.memory_space<vmem>>, vector<1x4x8xbf16>
    %7 = vector.shape_cast %6 : vector<1x4x8xbf16> to vector<4x8xbf16>
    %cst = arith.constant dense<0.000000e+00> : vector<160x8xf32>
    %8 = tpu.matmul %5, %7, %cst {dimension_numbers = #tpu.dot_dimension_numbers<[1], [0], [0], [1], [0, 0, 1, 1], [], []>} : vector<160x4xbf16>, vector<4x8xbf16>, vector<160x8xf32> -> vector<160x8xf32>
    %9 = arith.addf %2, %8 : vector<160x8xf32>
    %c0_8 = arith.constant 0 : index
    %c0_9 = arith.constant 0 : index
    %c1 = arith.constant 1 : index
    %c0_10 = arith.constant 0 : index
    %10 = vector.load %arg2[%c0_8, %c0_9, %c1, %c0_10] : memref<1x12x18x4xbf16, #tpu.memory_space<vmem>>, vector<1x10x16x4xbf16>
    %11 = vector.shape_cast %10 : vector<1x10x16x4xbf16> to vector<10x16x4xbf16>
    %12 = vector.shape_cast %11 : vector<10x16x4xbf16> to vector<160x4xbf16>
    %c1_11 = arith.constant 1 : index
    %c0_12 = arith.constant 0 : index
    %c0_13 = arith.constant 0 : index
    %13 = vector.load %arg3[%c1_11, %c0_12, %c0_13] : memref<9x4x8xbf16, #tpu.memory_space<vmem>>, vector<1x4x8xbf16>
    %14 = vector.shape_cast %13 : vector<1x4x8xbf16> to vector<4x8xbf16>
    %cst_14 = arith.constant dense<0.000000e+00> : vector<160x8xf32>
    %15 = tpu.matmul %12, %14, %cst_14 {dimension_numbers = #tpu.dot_dimension_numbers<[1], [0], [0], [1], [0, 0, 1, 1], [], []>} : vector<160x4xbf16>, vector<4x8xbf16>, vector<160x8xf32> -> vector<160x8xf32>
    %16 = arith.addf %9, %15 : vector<160x8xf32>
    %c0_15 = arith.constant 0 : index
    %c0_16 = arith.constant 0 : index
    %c2 = arith.constant 2 : index
    %c0_17 = arith.constant 0 : index
    %17 = vector.load %arg2[%c0_15, %c0_16, %c2, %c0_17] : memref<1x12x18x4xbf16, #tpu.memory_space<vmem>>, vector<1x10x16x4xbf16>
    %18 = vector.shape_cast %17 : vector<1x10x16x4xbf16> to vector<10x16x4xbf16>
    %19 = vector.shape_cast %18 : vector<10x16x4xbf16> to vector<160x4xbf16>
    %c2_18 = arith.constant 2 : index
    %c0_19 = arith.constant 0 : index
    %c0_20 = arith.constant 0 : index
    %20 = vector.load %arg3[%c2_18, %c0_19, %c0_20] : memref<9x4x8xbf16, #tpu.memory_space<vmem>>, vector<1x4x8xbf16>
    %21 = vector.shape_cast %20 : vector<1x4x8xbf16> to vector<4x8xbf16>
    %cst_21 = arith.constant dense<0.000000e+00> : vector<160x8xf32>
    %22 = tpu.matmul %19, %21, %cst_21 {dimension_numbers = #tpu.dot_dimension_numbers<[1], [0], [0], [1], [0, 0, 1, 1], [], []>} : vector<160x4xbf16>, vector<4x8xbf16>, vector<160x8xf32> -> vector<160x8xf32>
    %23 = arith.addf %16, %22 : vector<160x8xf32>
    %c0_22 = arith.constant 0 : index
    %c1_23 = arith.constant 1 : index
    %c0_24 = arith.constant 0 : index
    %c0_25 = arith.constant 0 : index
    %24 = vector.load %arg2[%c0_22, %c1_23, %c0_24, %c0_25] : memref<1x12x18x4xbf16, #tpu.memory_space<vmem>>, vector<1x10x16x4xbf16>
    %25 = vector.shape_cast %24 : vector<1x10x16x4xbf16> to vector<10x16x4xbf16>
    %26 = vector.shape_cast %25 : vector<10x16x4xbf16> to vector<160x4xbf16>
    %c3 = arith.constant 3 : index
    %c0_26 = arith.constant 0 : index
    %c0_27 = arith.constant 0 : index
    %27 = vector.load %arg3[%c3, %c0_26, %c0_27] : memref<9x4x8xbf16, #tpu.memory_space<vmem>>, vector<1x4x8xbf16>
    %28 = vector.shape_cast %27 : vector<1x4x8xbf16> to vector<4x8xbf16>
    %cst_28 = arith.constant dense<0.000000e+00> : vector<160x8xf32>
    %29 = tpu.matmul %26, %28, %cst_28 {dimension_numbers = #tpu.dot_dimension_numbers<[1], [0], [0], [1], [0, 0, 1, 1], [], []>} : vector<160x4xbf16>, vector<4x8xbf16>, vector<160x8xf32> -> vector<160x8xf32>
    %30 = arith.addf %23, %29 : vector<160x8xf32>
    %c0_29 = arith.constant 0 : index
    %c1_30 = arith.constant 1 : index
    %c1_31 = arith.constant 1 : index
    %c0_32 = arith.constant 0 : index
    %31 = vector.load %arg2[%c0_29, %c1_30, %c1_31, %c0_32] : memref<1x12x18x4xbf16, #tpu.memory_space<vmem>>, vector<1x10x16x4xbf16>
    %32 = vector.shape_cast %31 : vector<1x10x16x4xbf16> to vector<10x16x4xbf16>
    %33 = vector.shape_cast %32 : vector<10x16x4xbf16> to vector<160x4xbf16>
    %c4 = arith.constant 4 : index
    %c0_33 = arith.constant 0 : index
    %c0_34 = arith.constant 0 : index
    %34 = vector.load %arg3[%c4, %c0_33, %c0_34] : memref<9x4x8xbf16, #tpu.memory_space<vmem>>, vector<1x4x8xbf16>
    %35 = vector.shape_cast %34 : vector<1x4x8xbf16> to vector<4x8xbf16>
    %cst_35 = arith.constant dense<0.000000e+00> : vector<160x8xf32>
    %36 = tpu.matmul %33, %35, %cst_35 {dimension_numbers = #tpu.dot_dimension_numbers<[1], [0], [0], [1], [0, 0, 1, 1], [], []>} : vector<160x4xbf16>, vector<4x8xbf16>, vector<160x8xf32> -> vector<160x8xf32>
    %37 = arith.addf %30, %36 : vector<160x8xf32>
    %c0_36 = arith.constant 0 : index
    %c1_37 = arith.constant 1 : index
    %c2_38 = arith.constant 2 : index
    %c0_39 = arith.constant 0 : index
    %38 = vector.load %arg2[%c0_36, %c1_37, %c2_38, %c0_39] : memref<1x12x18x4xbf16, #tpu.memory_space<vmem>>, vector<1x10x16x4xbf16>
    %39 = vector.shape_cast %38 : vector<1x10x16x4xbf16> to vector<10x16x4xbf16>
    %40 = vector.shape_cast %39 : vector<10x16x4xbf16> to vector<160x4xbf16>
    %c5 = arith.constant 5 : index
    %c0_40 = arith.constant 0 : index
    %c0_41 = arith.constant 0 : index
    %41 = vector.load %arg3[%c5, %c0_40, %c0_41] : memref<9x4x8xbf16, #tpu.memory_space<vmem>>, vector<1x4x8xbf16>
    %42 = vector.shape_cast %41 : vector<1x4x8xbf16> to vector<4x8xbf16>
    %cst_42 = arith.constant dense<0.000000e+00> : vector<160x8xf32>
    %43 = tpu.matmul %40, %42, %cst_42 {dimension_numbers = #tpu.dot_dimension_numbers<[1], [0], [0], [1], [0, 0, 1, 1], [], []>} : vector<160x4xbf16>, vector<4x8xbf16>, vector<160x8xf32> -> vector<160x8xf32>
    %44 = arith.addf %37, %43 : vector<160x8xf32>
    %c0_43 = arith.constant 0 : index
    %c2_44 = arith.constant 2 : index
    %c0_45 = arith.constant 0 : index
    %c0_46 = arith.constant 0 : index
    %45 = vector.load %arg2[%c0_43, %c2_44, %c0_45, %c0_46] : memref<1x12x18x4xbf16, #tpu.memory_space<vmem>>, vector<1x10x16x4xbf16>
    %46 = vector.shape_cast %45 : vector<1x10x16x4xbf16> to vector<10x16x4xbf16>
    %47 = vector.shape_cast %46 : vector<10x16x4xbf16> to vector<160x4xbf16>
    %c6 = arith.constant 6 : index
    %c0_47 = arith.constant 0 : index
    %c0_48 = arith.constant 0 : index
    %48 = vector.load %arg3[%c6, %c0_47, %c0_48] : memref<9x4x8xbf16, #tpu.memory_space<vmem>>, vector<1x4x8xbf16>
    %49 = vector.shape_cast %48 : vector<1x4x8xbf16> to vector<4x8xbf16>
    %cst_49 = arith.constant dense<0.000000e+00> : vector<160x8xf32>
    %50 = tpu.matmul %47, %49, %cst_49 {dimension_numbers = #tpu.dot_dimension_numbers<[1], [0], [0], [1], [0, 0, 1, 1], [], []>} : vector<160x4xbf16>, vector<4x8xbf16>, vector<160x8xf32> -> vector<160x8xf32>
    %51 = arith.addf %44, %50 : vector<160x8xf32>
    %c0_50 = arith.constant 0 : index
    %c2_51 = arith.constant 2 : index
    %c1_52 = arith.constant 1 : index
    %c0_53 = arith.constant 0 : index
    %52 = vector.load %arg2[%c0_50, %c2_51, %c1_52, %c0_53] : memref<1x12x18x4xbf16, #tpu.memory_space<vmem>>, vector<1x10x16x4xbf16>
    %53 = vector.shape_cast %52 : vector<1x10x16x4xbf16> to vector<10x16x4xbf16>
    %54 = vector.shape_cast %53 : vector<10x16x4xbf16> to vector<160x4xbf16>
    %c7 = arith.constant 7 : index
    %c0_54 = arith.constant 0 : index
    %c0_55 = arith.constant 0 : index
    %55 = vector.load %arg3[%c7, %c0_54, %c0_55] : memref<9x4x8xbf16, #tpu.memory_space<vmem>>, vector<1x4x8xbf16>
    %56 = vector.shape_cast %55 : vector<1x4x8xbf16> to vector<4x8xbf16>
    %cst_56 = arith.constant dense<0.000000e+00> : vector<160x8xf32>
    %57 = tpu.matmul %54, %56, %cst_56 {dimension_numbers = #tpu.dot_dimension_numbers<[1], [0], [0], [1], [0, 0, 1, 1], [], []>} : vector<160x4xbf16>, vector<4x8xbf16>, vector<160x8xf32> -> vector<160x8xf32>
    %58 = arith.addf %51, %57 : vector<160x8xf32>
    %c0_57 = arith.constant 0 : index
    %c2_58 = arith.constant 2 : index
    %c2_59 = arith.constant 2 : index
    %c0_60 = arith.constant 0 : index
    %59 = vector.load %arg2[%c0_57, %c2_58, %c2_59, %c0_60] : memref<1x12x18x4xbf16, #tpu.memory_space<vmem>>, vector<1x10x16x4xbf16>
    %60 = vector.shape_cast %59 : vector<1x10x16x4xbf16> to vector<10x16x4xbf16>
    %61 = vector.shape_cast %60 : vector<10x16x4xbf16> to vector<160x4xbf16>
    %c8 = arith.constant 8 : index
    %c0_61 = arith.constant 0 : index
    %c0_62 = arith.constant 0 : index
    %62 = vector.load %arg3[%c8, %c0_61, %c0_62] : memref<9x4x8xbf16, #tpu.memory_space<vmem>>, vector<1x4x8xbf16>
    %63 = vector.shape_cast %62 : vector<1x4x8xbf16> to vector<4x8xbf16>
    %cst_63 = arith.constant dense<0.000000e+00> : vector<160x8xf32>
    %64 = tpu.matmul %61, %63, %cst_63 {dimension_numbers = #tpu.dot_dimension_numbers<[1], [0], [0], [1], [0, 0, 1, 1], [], []>} : vector<160x4xbf16>, vector<4x8xbf16>, vector<160x8xf32> -> vector<160x8xf32>
    %65 = arith.addf %58, %64 : vector<160x8xf32>
    %c0_64 = arith.constant 0 : index
    %c0_65 = arith.constant 0 : index
    %66 = vector.load %arg5[%c0_64, %c0_65] : memref<1x8xf32, #tpu.memory_space<vmem>>, vector<1x8xf32>
    %c0_66 = arith.constant 0 : index
    %c0_67 = arith.constant 0 : index
    %67 = vector.load %arg6[%c0_66, %c0_67] : memref<1x8xf32, #tpu.memory_space<vmem>>, vector<1x8xf32>
    %cst_68 = arith.constant dense<0.000000e+00> : vector<160xf32>
    %68 = vector.multi_reduction <add>, %65, %cst_68 [1] : vector<160x8xf32> to vector<160xf32>
    %69 = vector.shape_cast %68 : vector<160xf32> to vector<160x1xf32>
    %cst_69 = arith.constant 8.000000e+00 : f32
    %70 = vector.broadcast %cst_69 : f32 to vector<160x1xf32>
    %71 = arith.divf %69, %70 : vector<160x1xf32>
    %72 = arith.mulf %65, %65 : vector<160x8xf32>
    %cst_70 = arith.constant dense<0.000000e+00> : vector<160xf32>
    %73 = vector.multi_reduction <add>, %72, %cst_70 [1] : vector<160x8xf32> to vector<160xf32>
    %74 = vector.shape_cast %73 : vector<160xf32> to vector<160x1xf32>
    %cst_71 = arith.constant 8.000000e+00 : f32
    %75 = vector.broadcast %cst_71 : f32 to vector<160x1xf32>
    %76 = arith.divf %74, %75 : vector<160x1xf32>
    %77 = arith.mulf %71, %71 : vector<160x1xf32>
    %78 = arith.subf %76, %77 : vector<160x1xf32>
    %cst_72 = arith.constant 0.000000e+00 : f32
    %79 = vector.broadcast %cst_72 : f32 to vector<160x1xf32>
    %80 = arith.maximumf %78, %79 : vector<160x1xf32>
    %cst_73 = arith.constant 9.99999974E-6 : f32
    %81 = vector.broadcast %cst_73 : f32 to vector<160x1xf32>
    %82 = arith.addf %80, %81 : vector<160x1xf32>
    %83 = math.rsqrt %82 : vector<160x1xf32>
    %84 = vector.broadcast %71 : vector<160x1xf32> to vector<160x8xf32>
    %85 = arith.subf %65, %84 : vector<160x8xf32>
    %86 = vector.broadcast %83 : vector<160x1xf32> to vector<160x8xf32>
    %87 = arith.mulf %85, %86 : vector<160x8xf32>
    %88 = vector.broadcast %66 : vector<1x8xf32> to vector<160x8xf32>
    %89 = arith.mulf %87, %88 : vector<160x8xf32>
    %90 = vector.broadcast %67 : vector<1x8xf32> to vector<160x8xf32>
    %91 = arith.addf %89, %90 : vector<160x8xf32>
    %cst_74 = arith.constant 0.000000e+00 : f32
    %92 = vector.broadcast %cst_74 : f32 to vector<160x8xf32>
    %93 = arith.cmpf oge, %91, %92 : vector<160x8xf32>
    %cst_75 = arith.constant 0.00999999977 : f32
    %94 = vector.broadcast %cst_75 : f32 to vector<160x8xf32>
    %95 = arith.mulf %94, %91 : vector<160x8xf32>
    %96 = arith.select %93, %91, %95 : vector<160x8xi1>, vector<160x8xf32>
    %97 = vector.shape_cast %96 : vector<160x8xf32> to vector<10x16x8xf32>
    %98 = arith.truncf %97 : vector<10x16x8xf32> to vector<10x16x8xbf16>
    %c0_76 = arith.constant 0 : index
    %c1_77 = arith.constant 1 : index
    %c0_78 = arith.constant 0 : index
    %99 = vector.load %arg14[%c0_76, %c1_77, %c0_78] : memref<10x18x8xbf16, #tpu.memory_space<vmem>>, vector<10x16x8xbf16>
    tpu.vector_store %arg14[%c0_76, %c1_77, %c0_78], %98 {strides = array<i32>} : memref<10x18x8xbf16, #tpu.memory_space<vmem>>, vector<10x16x8xbf16>,
    %cst_79 = arith.constant 0.000000e+00 : bf16
    %100 = vector.broadcast %cst_79 : bf16 to vector<10x1x8xbf16>
    %c0_80 = arith.constant 0 : index
    %c0_81 = arith.constant 0 : index
    %c0_82 = arith.constant 0 : index
    %101 = vector.load %arg14[%c0_80, %c0_81, %c0_82] : memref<10x18x8xbf16, #tpu.memory_space<vmem>>, vector<10x1x8xbf16>
    tpu.vector_store %arg14[%c0_80, %c0_81, %c0_82], %100 {strides = array<i32>} : memref<10x18x8xbf16, #tpu.memory_space<vmem>>, vector<10x1x8xbf16>,
    %c0_83 = arith.constant 0 : index
    %c17 = arith.constant 17 : index
    %c0_84 = arith.constant 0 : index
    %102 = vector.load %arg14[%c0_83, %c17, %c0_84] : memref<10x18x8xbf16, #tpu.memory_space<vmem>>, vector<10x1x8xbf16>
    tpu.vector_store %arg14[%c0_83, %c17, %c0_84], %100 {strides = array<i32>} : memref<10x18x8xbf16, #tpu.memory_space<vmem>>, vector<10x1x8xbf16>,
    %cst_85 = arith.constant 0.000000e+00 : bf16
    %103 = vector.broadcast %cst_85 : bf16 to vector<1x18x8xbf16>
    %c0_i32 = arith.constant 0 : i32
    %104 = arith.cmpi eq, %arg1, %c0_i32 : i32
    %105 = arith.extui %104 : i1 to i32
    %c0_i32_86 = arith.constant 0 : i32
    %106 = arith.cmpi ne, %105, %c0_i32_86 : i32
    scf.if %106 {
      %c0_178 = arith.constant 0 : index
      %c0_179 = arith.constant 0 : index
      %c0_180 = arith.constant 0 : index
      %211 = vector.load %arg14[%c0_178, %c0_179, %c0_180] : memref<10x18x8xbf16, #tpu.memory_space<vmem>>, vector<1x18x8xbf16>
      tpu.vector_store %arg14[%c0_178, %c0_179, %c0_180], %103 {strides = array<i32>} : memref<10x18x8xbf16, #tpu.memory_space<vmem>>, vector<1x18x8xbf16>,
    } else {
    }
    %c1_i32 = arith.constant 1 : i32
    %107 = arith.cmpi eq, %arg1, %c1_i32 : i32
    %108 = arith.extui %107 : i1 to i32
    %c0_i32_87 = arith.constant 0 : i32
    %109 = arith.cmpi ne, %108, %c0_i32_87 : i32
    scf.if %109 {
      %c9 = arith.constant 9 : index
      %c0_178 = arith.constant 0 : index
      %c0_179 = arith.constant 0 : index
      %211 = vector.load %arg14[%c9, %c0_178, %c0_179] : memref<10x18x8xbf16, #tpu.memory_space<vmem>>, vector<1x18x8xbf16>
      tpu.vector_store %arg14[%c9, %c0_178, %c0_179], %103 {strides = array<i32>} : memref<10x18x8xbf16, #tpu.memory_space<vmem>>, vector<1x18x8xbf16>,
    } else {
    }
    %c0_88 = arith.constant 0 : index
    %c0_89 = arith.constant 0 : index
    %110 = vector.load %arg8[%c0_88, %c0_89] : memref<1x8xf32, #tpu.memory_space<vmem>>, vector<1x8xf32>
    %111 = vector.shape_cast %110 : vector<1x8xf32> to vector<1x8xf32>
    %112 = vector.broadcast %111 : vector<1x8xf32> to vector<128x8xf32>
    %c0_90 = arith.constant 0 : index
    %c0_91 = arith.constant 0 : index
    %c0_92 = arith.constant 0 : index
    %113 = vector.load %arg14[%c0_90, %c0_91, %c0_92] : memref<10x18x8xbf16, #tpu.memory_space<vmem>>, vector<8x16x8xbf16>
    %114 = vector.shape_cast %113 : vector<8x16x8xbf16> to vector<128x8xbf16>
    %c0_93 = arith.constant 0 : index
    %c0_94 = arith.constant 0 : index
    %c0_95 = arith.constant 0 : index
    %115 = vector.load %arg7[%c0_93, %c0_94, %c0_95] : memref<9x8x8xbf16, #tpu.memory_space<vmem>>, vector<1x8x8xbf16>
    %116 = vector.shape_cast %115 : vector<1x8x8xbf16> to vector<8x8xbf16>
    %cst_96 = arith.constant dense<0.000000e+00> : vector<128x8xf32>
    %117 = tpu.matmul %114, %116, %cst_96 {dimension_numbers = #tpu.dot_dimension_numbers<[1], [0], [0], [1], [0, 0, 1, 1], [], []>} : vector<128x8xbf16>, vector<8x8xbf16>, vector<128x8xf32> -> vector<128x8xf32>
    %118 = arith.addf %112, %117 : vector<128x8xf32>
    %c0_97 = arith.constant 0 : index
    %c1_98 = arith.constant 1 : index
    %c0_99 = arith.constant 0 : index
    %119 = vector.load %arg14[%c0_97, %c1_98, %c0_99] : memref<10x18x8xbf16, #tpu.memory_space<vmem>>, vector<8x16x8xbf16>
    %120 = vector.shape_cast %119 : vector<8x16x8xbf16> to vector<128x8xbf16>
    %c1_100 = arith.constant 1 : index
    %c0_101 = arith.constant 0 : index
    %c0_102 = arith.constant 0 : index
    %121 = vector.load %arg7[%c1_100, %c0_101, %c0_102] : memref<9x8x8xbf16, #tpu.memory_space<vmem>>, vector<1x8x8xbf16>
    %122 = vector.shape_cast %121 : vector<1x8x8xbf16> to vector<8x8xbf16>
    %cst_103 = arith.constant dense<0.000000e+00> : vector<128x8xf32>
    %123 = tpu.matmul %120, %122, %cst_103 {dimension_numbers = #tpu.dot_dimension_numbers<[1], [0], [0], [1], [0, 0, 1, 1], [], []>} : vector<128x8xbf16>, vector<8x8xbf16>, vector<128x8xf32> -> vector<128x8xf32>
    %124 = arith.addf %118, %123 : vector<128x8xf32>
    %c0_104 = arith.constant 0 : index
    %c2_105 = arith.constant 2 : index
    %c0_106 = arith.constant 0 : index
    %125 = vector.load %arg14[%c0_104, %c2_105, %c0_106] : memref<10x18x8xbf16, #tpu.memory_space<vmem>>, vector<8x16x8xbf16>
    %126 = vector.shape_cast %125 : vector<8x16x8xbf16> to vector<128x8xbf16>
    %c2_107 = arith.constant 2 : index
    %c0_108 = arith.constant 0 : index
    %c0_109 = arith.constant 0 : index
    %127 = vector.load %arg7[%c2_107, %c0_108, %c0_109] : memref<9x8x8xbf16, #tpu.memory_space<vmem>>, vector<1x8x8xbf16>
    %128 = vector.shape_cast %127 : vector<1x8x8xbf16> to vector<8x8xbf16>
    %cst_110 = arith.constant dense<0.000000e+00> : vector<128x8xf32>
    %129 = tpu.matmul %126, %128, %cst_110 {dimension_numbers = #tpu.dot_dimension_numbers<[1], [0], [0], [1], [0, 0, 1, 1], [], []>} : vector<128x8xbf16>, vector<8x8xbf16>, vector<128x8xf32> -> vector<128x8xf32>
    %130 = arith.addf %124, %129 : vector<128x8xf32>
    %c1_111 = arith.constant 1 : index
    %c0_112 = arith.constant 0 : index
    %c0_113 = arith.constant 0 : index
    %131 = vector.load %arg14[%c1_111, %c0_112, %c0_113] : memref<10x18x8xbf16, #tpu.memory_space<vmem>>, vector<8x16x8xbf16>
    %132 = vector.shape_cast %131 : vector<8x16x8xbf16> to vector<128x8xbf16>
    %c3_114 = arith.constant 3 : index
    %c0_115 = arith.constant 0 : index
    %c0_116 = arith.constant 0 : index
    %133 = vector.load %arg7[%c3_114, %c0_115, %c0_116] : memref<9x8x8xbf16, #tpu.memory_space<vmem>>, vector<1x8x8xbf16>
    %134 = vector.shape_cast %133 : vector<1x8x8xbf16> to vector<8x8xbf16>
    %cst_117 = arith.constant dense<0.000000e+00> : vector<128x8xf32>
    %135 = tpu.matmul %132, %134, %cst_117 {dimension_numbers = #tpu.dot_dimension_numbers<[1], [0], [0], [1], [0, 0, 1, 1], [], []>} : vector<128x8xbf16>, vector<8x8xbf16>, vector<128x8xf32> -> vector<128x8xf32>
    %136 = arith.addf %130, %135 : vector<128x8xf32>
    %c1_118 = arith.constant 1 : index
    %c1_119 = arith.constant 1 : index
    %c0_120 = arith.constant 0 : index
    %137 = vector.load %arg14[%c1_118, %c1_119, %c0_120] : memref<10x18x8xbf16, #tpu.memory_space<vmem>>, vector<8x16x8xbf16>
    %138 = vector.shape_cast %137 : vector<8x16x8xbf16> to vector<128x8xbf16>
    %c4_121 = arith.constant 4 : index
    %c0_122 = arith.constant 0 : index
    %c0_123 = arith.constant 0 : index
    %139 = vector.load %arg7[%c4_121, %c0_122, %c0_123] : memref<9x8x8xbf16, #tpu.memory_space<vmem>>, vector<1x8x8xbf16>
    %140 = vector.shape_cast %139 : vector<1x8x8xbf16> to vector<8x8xbf16>
    %cst_124 = arith.constant dense<0.000000e+00> : vector<128x8xf32>
    %141 = tpu.matmul %138, %140, %cst_124 {dimension_numbers = #tpu.dot_dimension_numbers<[1], [0], [0], [1], [0, 0, 1, 1], [], []>} : vector<128x8xbf16>, vector<8x8xbf16>, vector<128x8xf32> -> vector<128x8xf32>
    %142 = arith.addf %136, %141 : vector<128x8xf32>
    %c1_125 = arith.constant 1 : index
    %c2_126 = arith.constant 2 : index
    %c0_127 = arith.constant 0 : index
    %143 = vector.load %arg14[%c1_125, %c2_126, %c0_127] : memref<10x18x8xbf16, #tpu.memory_space<vmem>>, vector<8x16x8xbf16>
    %144 = vector.shape_cast %143 : vector<8x16x8xbf16> to vector<128x8xbf16>
    %c5_128 = arith.constant 5 : index
    %c0_129 = arith.constant 0 : index
    %c0_130 = arith.constant 0 : index
    %145 = vector.load %arg7[%c5_128, %c0_129, %c0_130] : memref<9x8x8xbf16, #tpu.memory_space<vmem>>, vector<1x8x8xbf16>
    %146 = vector.shape_cast %145 : vector<1x8x8xbf16> to vector<8x8xbf16>
    %cst_131 = arith.constant dense<0.000000e+00> : vector<128x8xf32>
    %147 = tpu.matmul %144, %146, %cst_131 {dimension_numbers = #tpu.dot_dimension_numbers<[1], [0], [0], [1], [0, 0, 1, 1], [], []>} : vector<128x8xbf16>, vector<8x8xbf16>, vector<128x8xf32> -> vector<128x8xf32>
    %148 = arith.addf %142, %147 : vector<128x8xf32>
    %c2_132 = arith.constant 2 : index
    %c0_133 = arith.constant 0 : index
    %c0_134 = arith.constant 0 : index
    %149 = vector.load %arg14[%c2_132, %c0_133, %c0_134] : memref<10x18x8xbf16, #tpu.memory_space<vmem>>, vector<8x16x8xbf16>
    %150 = vector.shape_cast %149 : vector<8x16x8xbf16> to vector<128x8xbf16>
    %c6_135 = arith.constant 6 : index
    %c0_136 = arith.constant 0 : index
    %c0_137 = arith.constant 0 : index
    %151 = vector.load %arg7[%c6_135, %c0_136, %c0_137] : memref<9x8x8xbf16, #tpu.memory_space<vmem>>, vector<1x8x8xbf16>
    %152 = vector.shape_cast %151 : vector<1x8x8xbf16> to vector<8x8xbf16>
    %cst_138 = arith.constant dense<0.000000e+00> : vector<128x8xf32>
    %153 = tpu.matmul %150, %152, %cst_138 {dimension_numbers = #tpu.dot_dimension_numbers<[1], [0], [0], [1], [0, 0, 1, 1], [], []>} : vector<128x8xbf16>, vector<8x8xbf16>, vector<128x8xf32> -> vector<128x8xf32>
    %154 = arith.addf %148, %153 : vector<128x8xf32>
    %c2_139 = arith.constant 2 : index
    %c1_140 = arith.constant 1 : index
    %c0_141 = arith.constant 0 : index
    %155 = vector.load %arg14[%c2_139, %c1_140, %c0_141] : memref<10x18x8xbf16, #tpu.memory_space<vmem>>, vector<8x16x8xbf16>
    %156 = vector.shape_cast %155 : vector<8x16x8xbf16> to vector<128x8xbf16>
    %c7_142 = arith.constant 7 : index
    %c0_143 = arith.constant 0 : index
    %c0_144 = arith.constant 0 : index
    %157 = vector.load %arg7[%c7_142, %c0_143, %c0_144] : memref<9x8x8xbf16, #tpu.memory_space<vmem>>, vector<1x8x8xbf16>
    %158 = vector.shape_cast %157 : vector<1x8x8xbf16> to vector<8x8xbf16>
    %cst_145 = arith.constant dense<0.000000e+00> : vector<128x8xf32>
    %159 = tpu.matmul %156, %158, %cst_145 {dimension_numbers = #tpu.dot_dimension_numbers<[1], [0], [0], [1], [0, 0, 1, 1], [], []>} : vector<128x8xbf16>, vector<8x8xbf16>, vector<128x8xf32> -> vector<128x8xf32>
    %160 = arith.addf %154, %159 : vector<128x8xf32>
    %c2_146 = arith.constant 2 : index
    %c2_147 = arith.constant 2 : index
    %c0_148 = arith.constant 0 : index
    %161 = vector.load %arg14[%c2_146, %c2_147, %c0_148] : memref<10x18x8xbf16, #tpu.memory_space<vmem>>, vector<8x16x8xbf16>
    %162 = vector.shape_cast %161 : vector<8x16x8xbf16> to vector<128x8xbf16>
    %c8_149 = arith.constant 8 : index
    %c0_150 = arith.constant 0 : index
    %c0_151 = arith.constant 0 : index
    %163 = vector.load %arg7[%c8_149, %c0_150, %c0_151] : memref<9x8x8xbf16, #tpu.memory_space<vmem>>, vector<1x8x8xbf16>
    %164 = vector.shape_cast %163 : vector<1x8x8xbf16> to vector<8x8xbf16>
    %cst_152 = arith.constant dense<0.000000e+00> : vector<128x8xf32>
    %165 = tpu.matmul %162, %164, %cst_152 {dimension_numbers = #tpu.dot_dimension_numbers<[1], [0], [0], [1], [0, 0, 1, 1], [], []>} : vector<128x8xbf16>, vector<8x8xbf16>, vector<128x8xf32> -> vector<128x8xf32>
    %166 = arith.addf %160, %165 : vector<128x8xf32>
    %c0_153 = arith.constant 0 : index
    %c0_154 = arith.constant 0 : index
    %167 = vector.load %arg9[%c0_153, %c0_154] : memref<1x8xf32, #tpu.memory_space<vmem>>, vector<1x8xf32>
    %c0_155 = arith.constant 0 : index
    %c0_156 = arith.constant 0 : index
    %168 = vector.load %arg10[%c0_155, %c0_156] : memref<1x8xf32, #tpu.memory_space<vmem>>, vector<1x8xf32>
    %cst_157 = arith.constant dense<0.000000e+00> : vector<128xf32>
    %169 = vector.multi_reduction <add>, %166, %cst_157 [1] : vector<128x8xf32> to vector<128xf32>
    %170 = vector.shape_cast %169 : vector<128xf32> to vector<128x1xf32>
    %cst_158 = arith.constant 8.000000e+00 : f32
    %171 = vector.broadcast %cst_158 : f32 to vector<128x1xf32>
    %172 = arith.divf %170, %171 : vector<128x1xf32>
    %173 = arith.mulf %166, %166 : vector<128x8xf32>
    %cst_159 = arith.constant dense<0.000000e+00> : vector<128xf32>
    %174 = vector.multi_reduction <add>, %173, %cst_159 [1] : vector<128x8xf32> to vector<128xf32>
    %175 = vector.shape_cast %174 : vector<128xf32> to vector<128x1xf32>
    %cst_160 = arith.constant 8.000000e+00 : f32
    %176 = vector.broadcast %cst_160 : f32 to vector<128x1xf32>
    %177 = arith.divf %175, %176 : vector<128x1xf32>
    %178 = arith.mulf %172, %172 : vector<128x1xf32>
    %179 = arith.subf %177, %178 : vector<128x1xf32>
    %cst_161 = arith.constant 0.000000e+00 : f32
    %180 = vector.broadcast %cst_161 : f32 to vector<128x1xf32>
    %181 = arith.maximumf %179, %180 : vector<128x1xf32>
    %cst_162 = arith.constant 9.99999974E-6 : f32
    %182 = vector.broadcast %cst_162 : f32 to vector<128x1xf32>
    %183 = arith.addf %181, %182 : vector<128x1xf32>
    %184 = math.rsqrt %183 : vector<128x1xf32>
    %185 = vector.broadcast %172 : vector<128x1xf32> to vector<128x8xf32>
    %186 = arith.subf %166, %185 : vector<128x8xf32>
    %187 = vector.broadcast %184 : vector<128x1xf32> to vector<128x8xf32>
    %188 = arith.mulf %186, %187 : vector<128x8xf32>
    %189 = vector.broadcast %167 : vector<1x8xf32> to vector<128x8xf32>
    %190 = arith.mulf %188, %189 : vector<128x8xf32>
    %191 = vector.broadcast %168 : vector<1x8xf32> to vector<128x8xf32>
    %192 = arith.addf %190, %191 : vector<128x8xf32>
    %cst_163 = arith.constant 0.000000e+00 : f32
    %193 = vector.broadcast %cst_163 : f32 to vector<128x8xf32>
    %194 = arith.cmpf oge, %192, %193 : vector<128x8xf32>
    %cst_164 = arith.constant 0.00999999977 : f32
    %195 = vector.broadcast %cst_164 : f32 to vector<128x8xf32>
    %196 = arith.mulf %195, %192 : vector<128x8xf32>
    %197 = arith.select %194, %192, %196 : vector<128x8xi1>, vector<128x8xf32>
    %c0_165 = arith.constant 0 : index
    %c2_166 = arith.constant 2 : index
    %c1_167 = arith.constant 1 : index
    %c0_168 = arith.constant 0 : index
    %198 = vector.load %arg2[%c0_165, %c2_166, %c1_167, %c0_168] : memref<1x12x18x4xbf16, #tpu.memory_space<vmem>>, vector<1x8x16x4xbf16>
    %199 = vector.shape_cast %198 : vector<1x8x16x4xbf16> to vector<8x16x4xbf16>
    %200 = vector.shape_cast %199 : vector<8x16x4xbf16> to vector<128x4xbf16>
    %c0_169 = arith.constant 0 : index
    %c0_170 = arith.constant 0 : index
    %201 = vector.load %arg11[%c0_169, %c0_170] : memref<4x8xbf16, #tpu.memory_space<vmem>>, vector<4x8xbf16>
    %cst_171 = arith.constant dense<0.000000e+00> : vector<128x8xf32>
    %202 = tpu.matmul %200, %201, %cst_171 {dimension_numbers = #tpu.dot_dimension_numbers<[1], [0], [0], [1], [0, 0, 1, 1], [], []>} : vector<128x4xbf16>, vector<4x8xbf16>, vector<128x8xf32> -> vector<128x8xf32>
    %c0_172 = arith.constant 0 : index
    %c0_173 = arith.constant 0 : index
    %203 = vector.load %arg12[%c0_172, %c0_173] : memref<1x8xf32, #tpu.memory_space<vmem>>, vector<1x8xf32>
    %204 = vector.broadcast %203 : vector<1x8xf32> to vector<128x8xf32>
    %205 = arith.addf %202, %204 : vector<128x8xf32>
    %206 = arith.addf %197, %205 : vector<128x8xf32>
    %207 = vector.shape_cast %206 : vector<128x8xf32> to vector<8x16x8xf32>
    %c0_174 = arith.constant 0 : index
    %c0_175 = arith.constant 0 : index
    %c0_176 = arith.constant 0 : index
    %c0_177 = arith.constant 0 : index
    %208 = vector.load %arg13[%c0_174, %c0_175, %c0_176, %c0_177] : memref<1x8x16x8xf32, #tpu.memory_space<vmem>>, vector<1x8x16x8xf32>
    %209 = vector.shape_cast %208 : vector<1x8x16x8xf32> to vector<8x16x8xf32>
    %210 = vector.shape_cast %207 : vector<8x16x8xf32> to vector<1x8x16x8xf32>
    tpu.vector_store %arg13[%c0_174, %c0_175, %c0_176, %c0_177], %210 {strides = array<i32>} : memref<1x8x16x8xf32, #tpu.memory_space<vmem>>, vector<1x8x16x8xf32>,
    return
  }
  func.func @transform_0(%arg0: i32, %arg1: i32) -> (i32, i32, i32, i32) {
    %c2_i32 = arith.constant 2 : i32
    %0 = arith.muli %arg0, %c2_i32 : i32
    %1 = arith.addi %0, %arg1 : i32
    %c0_i32 = arith.constant 0 : i32
    %c0_i32_0 = arith.constant 0 : i32
    %c0_i32_1 = arith.constant 0 : i32
    %c0_i32_2 = arith.constant 0 : i32
    return %1, %c0_i32, %c0_i32_0, %c0_i32_1 : i32, i32, i32, i32
  }
  func.func @transform_1(%arg0: i32, %arg1: i32) -> (i32, i32, i32) {
    %c0_i32 = arith.constant 0 : i32
    %c0_i32_0 = arith.constant 0 : i32
    %c0_i32_1 = arith.constant 0 : i32
    %c0_i32_2 = arith.constant 0 : i32
    return %c0_i32, %c0_i32_0, %c0_i32_1 : i32, i32, i32
  }
  func.func @transform_2(%arg0: i32, %arg1: i32) -> (i32, i32) {
    %c0_i32 = arith.constant 0 : i32
    %c0_i32_0 = arith.constant 0 : i32
    %c0_i32_1 = arith.constant 0 : i32
    return %c0_i32, %c0_i32_0 : i32, i32
  }
  func.func @transform_3(%arg0: i32, %arg1: i32) -> (i32, i32) {
    %c0_i32 = arith.constant 0 : i32
    %c0_i32_0 = arith.constant 0 : i32
    %c0_i32_1 = arith.constant 0 : i32
    return %c0_i32, %c0_i32_0 : i32, i32
  }
  func.func @transform_4(%arg0: i32, %arg1: i32) -> (i32, i32) {
    %c0_i32 = arith.constant 0 : i32
    %c0_i32_0 = arith.constant 0 : i32
    %c0_i32_1 = arith.constant 0 : i32
    return %c0_i32, %c0_i32_0 : i32, i32
  }
  func.func @transform_5(%arg0: i32, %arg1: i32) -> (i32, i32, i32) {
    %c0_i32 = arith.constant 0 : i32
    %c0_i32_0 = arith.constant 0 : i32
    %c0_i32_1 = arith.constant 0 : i32
    %c0_i32_2 = arith.constant 0 : i32
    return %c0_i32, %c0_i32_0, %c0_i32_1 : i32, i32, i32
  }
  func.func @transform_6(%arg0: i32, %arg1: i32) -> (i32, i32) {
    %c0_i32 = arith.constant 0 : i32
    %c0_i32_0 = arith.constant 0 : i32
    %c0_i32_1 = arith.constant 0 : i32
    return %c0_i32, %c0_i32_0 : i32, i32
  }
  func.func @transform_7(%arg0: i32, %arg1: i32) -> (i32, i32) {
    %c0_i32 = arith.constant 0 : i32
    %c0_i32_0 = arith.constant 0 : i32
    %c0_i32_1 = arith.constant 0 : i32
    return %c0_i32, %c0_i32_0 : i32, i32
  }
  func.func @transform_8(%arg0: i32, %arg1: i32) -> (i32, i32) {
    %c0_i32 = arith.constant 0 : i32
    %c0_i32_0 = arith.constant 0 : i32
    %c0_i32_1 = arith.constant 0 : i32
    return %c0_i32, %c0_i32_0 : i32, i32
  }
  func.func @transform_9(%arg0: i32, %arg1: i32) -> (i32, i32) {
    %c0_i32 = arith.constant 0 : i32
    %c0_i32_0 = arith.constant 0 : i32
    %c0_i32_1 = arith.constant 0 : i32
    return %c0_i32, %c0_i32_0 : i32, i32
  }
  func.func @transform_10(%arg0: i32, %arg1: i32) -> (i32, i32) {
    %c0_i32 = arith.constant 0 : i32
    %c0_i32_0 = arith.constant 0 : i32
    %c0_i32_1 = arith.constant 0 : i32
    return %c0_i32, %c0_i32_0 : i32, i32
  }
  func.func @transform_11(%arg0: i32, %arg1: i32) -> (i32, i32, i32, i32) {
    %c0_i32 = arith.constant 0 : i32
    %c0_i32_0 = arith.constant 0 : i32
    %c0_i32_1 = arith.constant 0 : i32
    return %arg0, %arg1, %c0_i32, %c0_i32_0 : i32, i32, i32, i32
  }
}

</mosaic_0001>

<bundles_post_ra>
// kernel: tpu_custom_call.1
= control target key start
LH: loop header
LB: loop body
LE: loop exit
PB: predicated region body
PF: predicated region fallthrough
CT: control target
= control target key end

     0   :  { %s9497_s17 = smov 0   ;;  %s9499_s18 = smov 0   ;;  %s12048_s0 = inlined_call_operand.vmem [shape: bf16[4,12,18,4], index: 0, kind: input, shape index: {}]   ;;  %s12049_s1 = inlined_call_operand.vmem [shape: bf16[9,4,8], index: 1, kind: input, shape index: {}]   ;;  %s12050_s2 = inlined_call_operand.vmem [shape: f32[1,8], index: 2, kind: input, shape index: {}]   ;;  %s12051_s3 = inlined_call_operand.vmem [shape: f32[1,8], index: 3, kind: input, shape index: {}]   ;;  %s12052_s4 = inlined_call_operand.vmem [shape: f32[1,8], index: 4, kind: input, shape index: {}]   ;;  %s12053_s5 = inlined_call_operand.vmem [shape: bf16[9,8,8], index: 5, kind: input, shape index: {}]   ;;  %s12054_s6 = inlined_call_operand.vmem [shape: f32[1,8], index: 6, kind: input, shape index: {}]   ;;  %s12055_s7 = inlined_call_operand.vmem [shape: f32[1,8], index: 7, kind: input, shape index: {}]   ;;  %s12056_s8 = inlined_call_operand.vmem [shape: f32[1,8], index: 8, kind: input, shape index: {}]   ;;  %s12057_s9 = inlined_call_operand.vmem [shape: bf16[4,8], index: 9, kind: input, shape index: {}]   ;;  %s12058_s10 = inlined_call_operand.vmem [shape: f32[1,8], index: 10, kind: input, shape index: {}]   ;;  %s12059_s11 = inlined_call_operand.vmem [shape: f32[2,16,16,8], index: 11, kind: output, shape index: {}]  }
   0x1   :  { %s9501_s19 = smov 0   ;;  %s9503_s20 = smov 0  }
   0x2   :  { %s9505_s21 = smov 0  }
   0x3 LB: > { %s30_s22 = sadd.s32 1, %s9425_s19  ;;  %s33_s23 = sadd.s32 1, %s9429_s20  ;;  %s9433_s21 = sphi %s9505_s21, %s21_s21   ;;  %s9429_s20 = sphi %s9503_s20, %s12079_s20   ;;  %s9425_s19 = sphi %s9501_s19, %s12078_s19   ;;  %s9421_s18 = sphi %s9499_s18, %s12077_s18   ;;  %s9417_s17 = sphi %s9497_s17, %s12076_s17  }
   0x4   : > { %p31_p0 = scmp.ge.s32.totalorder %s30_s22, 2  ;;  %p7699_p1 = scmp.ge.s32.totalorder %s9433_s21, 1 }
   0x5   : > { %p359_p2 = scmp.lt.s32.totalorder %s9433_s21, 5 }
   0x6   : > { %s12081_s22 = smov (%p31_p0, %s30_s22), 0  ;;  %s12083_s23 = smov (!%p31_p0, %s33_s23), %s9429_s20 }
   0x7   : > { %12060 = sst [smem:[#allocation3_spill]] %s12081_s22  ;;  %p360_p3 = pnand %p7699_p1, %p359_p2 }
   0x8   : > { %p35_p4 = scmp.ge.s32.totalorder %s12083_s23, 2  ;;  %s7702_s24 = sshll.u32 (!%p360_p3), %s9417_s17, 3  ;;  %v454_v0 = vld [vmem:[%s12049_s1] sm:$0x3] (!%p360_p3)  ;;  %vm536_vm0 = vcmask (!%p360_p3), 1041408   ;;  %vm505_vm1 = vcmask (!%p360_p3), 31744  }
   0x9   : > { %363 = sbr.rel (%p360_p3) target bundleno = 1558 (0x616), region = 64  ;;  %p416_p5 = scmp.lt.s32.totalorder (!%p360_p3), %s9421_s18, 1  ;;  %9204 = vmatprep.subr.msk.bf16.mxu0 (!%p360_p3), %vm536_vm0, %v454_v0  ;;  %v538_v1 = vsel (!%p360_p3), %vm536_vm0, %v454_v0, 0  ;;  %v7727_v2 = vld [vmem:[%s12049_s1 + $0x2] sm:$0x3] (!%p360_p3)  ;;  %9205 = vmatprep.subr.msk.bf16.mxu1 (!%p360_p3), %vm536_vm0, %v454_v0  ;;  %vm1184_vm5 = vcmask (!%p360_p3), 1042432  }
   0xa   : > { %s12085_s23 = smov (%p35_p4, %s12083_s23), 0  ;;  %p418_p6 = scmp.lt.s32.totalorder (!%p360_p3), %s7702_s24, 15  ;;  %8501 = vmatpush3.bf16.msra.mxu0 (!%p360_p3), %v538_v1  ;;  %8879 = vmatpush3.bf16.msra.mxu1 (!%p360_p3), %v538_v1  ;;  %v7758_v4 = vld [vmem:[%s12049_s1 + $0x4] sm:$0x3] (!%p360_p3)  ;;  %v1009_v6 = vsel (!%p360_p3), %vm536_vm0, %v7727_v2, 0  ;;  %vm1185_vm6 = vcmask (!%p360_p3), 1046532  }
   0xb   : > { %12061 = sst [smem:[#allocation4_spill]] %s12085_s23  ;;  %s7700_s27 = sshll.u32 (!%p360_p3), %s9421_s18, 1  ;;  %9206 = vmatprep.subr.msk.bf16.mxu0 (!%p360_p3), %vm536_vm0, %v7727_v2  ;;  %vm703_vm2 = vsmask.f32 (!%p360_p3), 3328  ;;  %vm704_vm3 = vsmask.f32 (!%p360_p3), 7440  ;;  %vm9738_vm7 = vmor (!%p360_p3), %vm1184_vm5, %vm1185_vm6 }
   0xc   : > { %s407_s12 = sadd.s32 (!%p360_p3), %s9417_s17, %s7700_s27  ;;  %v9569_v9 = vsel (!%p360_p3), %vm536_vm0, %v7758_v4, 0  ;;  %vm9600_vm4 = vmor (!%p360_p3), %vm703_vm2, %vm704_vm3  ;;  %vm3487_vm8 = vcmask (!%p360_p3), 64512   ;;  %vm4184_vm9 = vcmask (!%p360_p3), 60416   ;;  %vm4185_vm10 = vsmask.f32 (!%p360_p3), 7938  ;;  %p8067_p8 = scmp.ne.s32.totalorder (!%p360_p3), %s9417_s17, 0 }
   0xd   : > { %p408_p7 = scmp.lt.s32.totalorder (!%p360_p3), %s407_s12, 3  ;;  %vm3981_vm11 = vsmask.f32 (!%p360_p3), 256  ;;  %vm4192_vm12 = vcmask (!%p360_p3), 57344   ;;  %vm3982_vm14 = vsmask.f32 (!%p360_p3), 4368  ;;  %vm10667_vm3 = vmand (!%p360_p3), %vm4184_vm9, %vm4185_vm10 }
   0xe   : > { %vm10677_vm6 = vmand (!%p360_p3), %vm4192_vm12, %vm3981_vm11 }
  0x10   : > { %s12087_s18 = smov (!%p416_p5, %s9421_s18), 1  ;;  %s12089_s24 = smov (!%p418_p6, %s7702_s24), 15 }
  0x11   : > { %s7704_s30 = sshll.u32 %s12087_s18, 5  ;;  %s7703_s13 = sshll.u32 %s12089_s24, 1 }
  0x12   : > { %s422_s14 = sadd.s32 %s7704_s30, %s7703_s13  ;;  %s12091_s12 = smov (!%p408_p7, %s407_s12), 3 }
  0x13   : > { %s7705_s15 = sshll.u32 %s422_s14, 3  ;;  %s9224_s28 = smul.u32 144, %s12091_s12 }
  0x14   : > { %s9549_s26 = scalar_lea.vmem %s12059_s11, %s7705_s15 }
  0x15   : > { %s9554_s22 = scalar_lea.vmem %s12048_s0, %s9224_s28 }
  0x16   : > { %v9267_v3 = vld [vmem:[%s9554_s22] sm:$0xff]   ;;  %v9268_v5 = vld [vmem:[%s9554_s22 + $0xc] sm:$0xff]   ;;  %v9269_v7 = vld [vmem:[%s9554_s22 + $0x18] sm:$0xff]  }
  0x17   : > { %8502 = vmatprep.mubr.msk.bf16.mxu0 %vm505_vm1, %v9267_v3  ;;  %v9270_v8 = vld [vmem:[%s9554_s22 + $0x24] sm:$0xff]   ;;  %v9271_v10 = vld [vmem:[%s9554_s22 + $0x30] sm:$0xff]   ;;  %v673_v11 = vld [vmem:[%s9554_s22] sm:$0xf] }
  0x18   : > { %8503 = vmatmul.mubr.msk.bf16.vlgmr.msra.gmra.mrb[0].mxu0 %vm505_vm1, %v9268_v5  ;;  %v9574_v12 = vld [vmem:[%s9554_s22 + $0x4] sm:$0xf]  ;;  %v9577_v13 = vld [vmem:[%s9554_s22 + $0x8] sm:$0x1]  ;;  %v707_v14 = vshrl.u32 %v673_v11, 16  ;;  %v710_v15 = vshll.u32 %v673_v11, 16 }
  0x19   : > { %8523 = vmatpush3.bf16.msra.mxu0 %v1009_v6  ;;  %8506 = vmatprep.mubr.msk.bf16.mxu0 %vm505_vm1, %v9269_v7  ;;  %v716_v16 = vshll.u32 %v9574_v12, 16  ;;  %v720_v17 = vshrl.u32 %v9574_v12, 16  ;;  %v676_v18 = vld [vmem:[%s9554_s22 + $0xc] sm:$0xf]  ;;  %v726_v19 = vshll.u32 %v9577_v13, 16  ;;  %v9272_v52 = vld [vmem:[%s9554_s22 + $0x3c] sm:$0xff]  }
  0x1a   : > { %9207 = vmatprep.subr.msk.bf16.mxu0 %vm536_vm0, %v7758_v4  ;;  %v9584_v20 = vld [vmem:[%s9554_s22 + $0x10] sm:$0xf]  ;;  %v9587_v21 = vld [vmem:[%s9554_s22 + $0x14] sm:$0x1]  ;;  %v731_v22 = vshrl.u32 %v676_v18, 16  ;;  %v709_v23 = vrot.slane %v707_v14, 4 }
  0x1b   : > { %v712_v24 = vrot.slane %v710_v15, 5  ;;  %v718_v25 = vrot.slane %v716_v16, 5  ;;  %v722_v26 = vrot.slane %v720_v17, 4  ;;  %v679_v27 = vld [vmem:[%s9554_s22 + $0x18] sm:$0xf]  ;;  %v728_v28 = vrot.slane %v726_v19, 5 }
  0x1c   : > { %v733_v29 = vrot.slane %v731_v22, 4  ;;  %v734_v30 = vshll.u32 %v676_v18, 16  ;;  %v740_v31 = vshll.u32 %v9584_v20, 16  ;;  %v744_v34 = vshrl.u32 %v9584_v20, 16  ;;  %v9595_v36 = vld [vmem:[%s9554_s22 + $0x1c] sm:$0xf] }
  0x1d   : > { %v713_v32 = vor.u32 %v712_v24, %v709_v23  ;;  %v723_v33 = vor.u32 %v722_v26, %v718_v25  ;;  %v750_v35 = vshll.u32 %v9587_v21, 16  ;;  %v755_v40 = vshrl.u32 %v679_v27, 16  ;;  %v9605_v46 = vld [vmem:[%s9554_s22 + $0x20] sm:$0x1]  ;;  %v682_v51 = vld [vmem:[%s9554_s22 + $0x24] sm:$0xf] }
  0x1e   : > { %v736_v38 = vrot.slane %v734_v30, 5  ;;  %v742_v39 = vrot.slane %v740_v31, 5  ;;  %v758_v41 = vshll.u32 %v679_v27, 16  ;;  %v746_v44 = vrot.slane %v744_v34, 4  ;;  %v9616_v57 = vld [vmem:[%s9554_s22 + $0x28] sm:$0xf] }
  0x1f   : > { %v714_v42 = vrot.slane %v713_v32, 4  ;;  %v724_v43 = vrot.slane %v723_v33, 4  ;;  %v752_v45 = vrot.slane %v750_v35, 5  ;;  %v757_v48 = vrot.slane %v755_v40, 4  ;;  %v9620_v1 = vld [vmem:[%s9554_s22 + $0x2c] sm:$0x1] }
  0x20   : > { %8507 = vmatmul.mubr.msk.bf16.gmra.mrb[4].mxu0 %vm505_vm1, %v9270_v8  ;;  %v737_v47 = vor.u32 %v736_v38, %v733_v29  ;;  %v760_v49 = vrot.slane %v758_v41, 5  ;;  %v764_v50 = vshll.u32 %v9595_v36, 16  ;;  %v747_v55 = vor.u32 %v746_v44, %v742_v39  ;;  %v685_v7 = vld [vmem:[%s9554_s22 + $0x30] sm:$0xf]  ;;  %v9630_v15 = vld [vmem:[%s9554_s22 + $0x34] sm:$0xf] }
  0x21   : > { %8510 = vmatprep.mubr.msk.bf16.mxu0 %vm505_vm1, %v9271_v10  ;;  %v719_v53 = vsel %vm9600_vm4, %v714_v42, %v718_v25  ;;  %v729_v54 = vsel %vm9600_vm4, %v724_v43, %v728_v28  ;;  %v768_v56 = vshrl.u32 %v9595_v36, 16  ;;  %v774_v0 = vshll.u32 %v9605_v46, 16  ;;  %v9638_v25 = vld [vmem:[%s9554_s22 + $0x38] sm:$0x1]  ;;  %v688_v31 = vld [vmem:[%s9554_s22 + $0x3c] sm:$0xf] }
  0x22   : > { %v7728_v58 = vcombine.low %v719_v53, %v729_v54  ;;  %v738_v59 = vrot.slane %v737_v47, 4  ;;  %v761_v60 = vor.u32 %v760_v49, %v757_v48  ;;  %v766_v61 = vrot.slane %v764_v50, 5  ;;  %v9646_v38 = vld [vmem:[%s9554_s22 + $0x40] sm:$0xf]  ;;  %v9652_v48 = vld [vmem:[%s12049_s1 + $0x6] sm:$0x3] }
  0x23   : > { %v748_v62 = vrot.slane %v747_v55, 4  ;;  %v770_v63 = vrot.slane %v768_v56, 4  ;;  %v779_v2 = vshrl.u32 %v682_v51, 16  ;;  %v782_v5 = vshll.u32 %v682_v51, 16  ;;  %v9657_v51 = vld [vmem:[%s9554_s22 + $0x44] sm:$0x1] }
  0x24   : > { %v743_v3 = vsel %vm9600_vm4, %v738_v59, %v742_v39  ;;  %v762_v4 = vrot.slane %v761_v60, 4  ;;  %v788_v6 = vshll.u32 %v9616_v57, 16  ;;  %v776_v11 = vrot.slane %v774_v0, 5  ;;  %v691_v54 = vld [vmem:[%s9554_s22 + $0x48] sm:$0xf] }
  0x25   : > { %v753_v8 = vsel %vm9600_vm4, %v748_v62, %v752_v45  ;;  %v771_v10 = vor.u32 %v770_v63, %v766_v61  ;;  %v781_v14 = vrot.slane %v779_v2, 4  ;;  %v784_v18 = vrot.slane %v782_v5, 5 }
  0x26   : > { %v7729_v16 = vcombine.low %v743_v3, %v753_v8  ;;  %v767_v17 = vsel %vm9600_vm4, %v762_v4, %v766_v61  ;;  %v790_v19 = vrot.slane %v788_v6, 5  ;;  %v792_v23 = vshrl.u32 %v9616_v57, 16  ;;  %v9669_v4 = vld [vmem:[%s9554_s22 + $0x4c] sm:$0xf] }
  0x27   : > { %v772_v22 = vrot.slane %v771_v10, 4  ;;  %v798_v24 = vshll.u32 %v9620_v1, 16  ;;  %v803_v26 = vshrl.u32 %v685_v7, 16  ;;  %v785_v27 = vor.u32 %v784_v18, %v781_v14  ;;  %v9676_v10 = vld [vmem:[%s9554_s22 + $0x50] sm:$0x1] }
  0x28   : > { %8511 = vmatmul.mubr.msk.bf16.gmra.mrb[8].mxu0 %vm505_vm1, %v9272_v52  ;;  %v806_v28 = vshll.u32 %v685_v7, 16  ;;  %v812_v29 = vshll.u32 %v9630_v15, 16  ;;  %v816_v30 = vshrl.u32 %v9630_v15, 16  ;;  %v794_v33 = vrot.slane %v792_v23, 4 }
  0x29   : > { %8524 = vmatprep.mubr.msk.bf16.mxu0 %vm505_vm1, %v7728_v58  ;;  %v777_v32 = vsel %vm9600_vm4, %v772_v22, %v776_v11  ;;  %v800_v34 = vrot.slane %v798_v24, 5  ;;  %v805_v35 = vrot.slane %v803_v26, 4  ;;  %v786_v40 = vrot.slane %v785_v27, 4  ;;  %v694_v11 = vld [vmem:[%s9554_s22 + $0x54] sm:$0xf] }
  0x2a   : > { %v7730_v39 = vcombine.low %v767_v17, %v777_v32  ;;  %v808_v41 = vrot.slane %v806_v28, 5  ;;  %v814_v42 = vrot.slane %v812_v29, 5  ;;  %v795_v43 = vor.u32 %v794_v33, %v790_v19  ;;  %v9683_v26 = vld [vmem:[%s9554_s22 + $0x58] sm:$0xf] }
  0x2b   : > { %v818_v44 = vrot.slane %v816_v30, 4  ;;  %v822_v45 = vshll.u32 %v9638_v25, 16  ;;  %v827_v47 = vshrl.u32 %v688_v31, 16  ;;  %v791_v49 = vsel %vm9600_vm4, %v786_v40, %v790_v19  ;;  %v9688_v30 = vld [vmem:[%s9554_s22 + $0x5c] sm:$0x1] }
  0x2c   : > { %v809_v50 = vor.u32 %v808_v41, %v805_v35  ;;  %v830_v52 = vshll.u32 %v688_v31, 16  ;;  %v836_v53 = vshll.u32 %v9646_v38, 16  ;;  %v796_v55 = vrot.slane %v795_v43, 4 }
  0x2d   : > { %v819_v56 = vor.u32 %v818_v44, %v814_v42  ;;  %v824_v58 = vrot.slane %v822_v45, 5  ;;  %v829_v59 = vrot.slane %v827_v47, 4  ;;  %v840_v63 = vshrl.u32 %v9646_v38, 16  ;;  %v9695_v44 = vld [vmem:[%s9554_s22 + $0x64] sm:$0xf] }
  0x2e   : > { %v810_v60 = vrot.slane %v809_v50, 4  ;;  %v832_v61 = vrot.slane %v830_v52, 5  ;;  %v838_v62 = vrot.slane %v836_v53, 5  ;;  %v801_v0 = vsel %vm9600_vm4, %v796_v55, %v800_v34  ;;  %v9703_v52 = vld [vmem:[%s9554_s22 + $0x68] sm:$0x1] }
  0x2f   : > { %v820_v2 = vrot.slane %v819_v56, 4  ;;  %v846_v3 = vshll.u32 %v9657_v51, 16  ;;  %v851_v5 = vshrl.u32 %v691_v54, 16  ;;  %v842_v8 = vrot.slane %v840_v63, 4 }
  0x30   : > { %8525 = vmatmul.mubr.msk.bf16.vlgmr.msra.gmra.mrb[0].mxu0 %vm505_vm1, %v7729_v16  ;;  %v815_v6 = vsel %vm9600_vm4, %v810_v60, %v814_v42  ;;  %v833_v7 = vor.u32 %v832_v61, %v829_v59  ;;  %v854_v18 = vshll.u32 %v691_v54, 16  ;;  %v860_v24 = vshll.u32 %v9669_v4, 16 }
  0x31   : > { %8545 = vmatpush3.bf16.msra.mxu0 %v9569_v9  ;;  %8528 = vmatprep.mubr.msk.bf16.mxu0 %vm505_vm1, %v7730_v39  ;;  %v7731_v9 = vcombine.low %v791_v49, %v801_v0  ;;  %v825_v14 = vsel %vm9600_vm4, %v820_v2, %v824_v58  ;;  %v848_v16 = vrot.slane %v846_v3, 5  ;;  %v853_v17 = vrot.slane %v851_v5, 4  ;;  %v697_v39 = vld [vmem:[%s9554_s22 + $0x60] sm:$0xf]  ;;  %v9710_v5 = vld [vmem:[%s9554_s22 + $0x70] sm:$0xf] }
  0x32   : > { %9208 = vmatprep.subr.msk.bf16.mxu0 %vm536_vm0, %v9652_v48  ;;  %v7732_v19 = vcombine.low %v815_v6, %v825_v14  ;;  %v834_v22 = vrot.slane %v833_v7, 4  ;;  %v843_v23 = vor.u32 %v842_v8, %v838_v62  ;;  %v856_v27 = vrot.slane %v854_v18, 5  ;;  %v9718_v18 = vld [vmem:[%s9554_s22 + $0x74] sm:$0x1] }
  0x33   : > { %v864_v28 = vshrl.u32 %v9669_v4, 16  ;;  %v870_v29 = vshll.u32 %v9676_v10, 16  ;;  %v875_v31 = vshrl.u32 %v694_v11, 16  ;;  %v862_v34 = vrot.slane %v860_v24, 5 }
  0x34   : > { %v839_v32 = vsel %vm9600_vm4, %v834_v22, %v838_v62  ;;  %v844_v33 = vrot.slane %v843_v23, 4  ;;  %v878_v35 = vshll.u32 %v694_v11, 16  ;;  %v857_v40 = vor.u32 %v856_v27, %v853_v17  ;;  %v700_v62 = vld [vmem:[%s9554_s22 + $0x6c] sm:$0xf] }
  0x35   : > { %v866_v41 = vrot.slane %v864_v28, 4  ;;  %v872_v42 = vrot.slane %v870_v29, 5  ;;  %v877_v43 = vrot.slane %v875_v31, 4  ;;  %v884_v49 = vshll.u32 %v9683_v26, 16 }
  0x36   : > { %v849_v45 = vsel %vm9600_vm4, %v844_v33, %v848_v16  ;;  %v880_v47 = vrot.slane %v878_v35, 5  ;;  %v888_v50 = vshrl.u32 %v9683_v26, 16  ;;  %v858_v54 = vrot.slane %v857_v40, 4 }
  0x37   : > { %v7733_v53 = vcombine.low %v839_v32, %v849_v45  ;;  %v867_v55 = vor.u32 %v866_v41, %v862_v34  ;;  %v894_v56 = vshll.u32 %v9688_v30, 16  ;;  %v886_v59 = vrot.slane %v884_v49, 5  ;;  %v1144_v32 = vld [vmem:[%s9554_s22] sm:$0xe] }
  0x38   : > { %8529 = vmatmul.mubr.msk.bf16.gmra.mrb[4].mxu0 %vm505_vm1, %v7731_v9  ;;  %v881_v58 = vor.u32 %v880_v47, %v877_v43  ;;  %v890_v60 = vrot.slane %v888_v50, 4  ;;  %v899_v61 = vshrl.u32 %v697_v39, 16  ;;  %v863_v63 = vsel %vm9600_vm4, %v858_v54, %v862_v34 }
  0x39   : > { %8532 = vmatprep.mubr.msk.bf16.mxu0 %vm505_vm1, %v7732_v19  ;;  %v868_v0 = vrot.slane %v867_v55, 4  ;;  %v896_v2 = vrot.slane %v894_v56, 5  ;;  %v902_v3 = vshll.u32 %v697_v39, 16  ;;  %v908_v8 = vshll.u32 %v9695_v44, 16 }
  0x3a   : > { %v882_v9 = vrot.slane %v881_v58, 4  ;;  %v891_v6 = vor.u32 %v890_v60, %v886_v59  ;;  %v901_v7 = vrot.slane %v899_v61, 4  ;;  %v912_v16 = vshrl.u32 %v9695_v44, 16 }
  0x3b   : > { %v873_v11 = vsel %vm9600_vm4, %v868_v0, %v872_v42  ;;  %v904_v14 = vrot.slane %v902_v3, 5  ;;  %v918_v17 = vshll.u32 %v9703_v52, 16  ;;  %v910_v24 = vrot.slane %v908_v8, 5 }
  0x3c   : > { %v7734_v19 = vcombine.low %v863_v63, %v873_v11  ;;  %v887_v22 = vsel %vm9600_vm4, %v882_v9, %v886_v59  ;;  %v892_v23 = vrot.slane %v891_v6, 4  ;;  %v914_v28 = vrot.slane %v912_v16, 4  ;;  %v1145_v11 = vld [vmem:[%s9554_s22 + $0xc] sm:$0xe]  ;;  %v1146_v16 = vld [vmem:[%s9554_s22 + $0x18] sm:$0xe] }
  0x3d   : > { %v905_v27 = vor.u32 %v904_v14, %v901_v7  ;;  %v920_v29 = vrot.slane %v918_v17, 5  ;;  %v923_v31 = vshrl.u32 %v700_v62, 16  ;;  %v926_v34 = vshll.u32 %v700_v62, 16 }
  0x3e   : > { %v897_v33 = vsel %vm9600_vm4, %v892_v23, %v896_v2  ;;  %v932_v35 = vshll.u32 %v9710_v5, 16  ;;  %v936_v39 = vshrl.u32 %v9710_v5, 16  ;;  %v915_v41 = vor.u32 %v914_v28, %v910_v24 }
  0x3f   : > { %v906_v40 = vrot.slane %v905_v27, 4  ;;  %v925_v42 = vrot.slane %v923_v31, 4  ;;  %v928_v43 = vrot.slane %v926_v34, 5  ;;  %v942_v49 = vshll.u32 %v9718_v18, 16  ;;  %v1148_v34 = vld [vmem:[%s9554_s22 + $0x30] sm:$0xe] }
  0x40   : > { %8533 = vmatmul.mubr.msk.bf16.gmra.mrb[8].mxu0 %vm505_vm1, %v7733_v53  ;;  %v934_v45 = vrot.slane %v932_v35, 5  ;;  %v938_v47 = vrot.slane %v936_v39, 4  ;;  %v7735_v50 = vcombine.low %v887_v22, %v897_v33  ;;  %v916_v54 = vrot.slane %v915_v41, 4  ;;  %v1147_v33 = vld [vmem:[%s9554_s22 + $0x24] sm:$0xe] }
  0x41   : > { %8536 = vmatprep.mubr.msk.bf16.mxu0 %vm505_vm1, %v7734_v19  ;;  %v911_v53 = vsel %vm9600_vm4, %v906_v40, %v910_v24  ;;  %v1189_v55 = vrot.slane %v9574_v12, 5  ;;  %v929_v56 = vor.u32 %v928_v43, %v925_v42  ;;  %v944_v59 = vrot.slane %v942_v49, 5 }
  0x42   : > { %v939_v58 = vor.u32 %v938_v47, %v934_v45  ;;  %v7748_v60 = vrot.slane %v1144_v32, 9  ;;  %v921_v61 = vsel %vm9600_vm4, %v916_v54, %v920_v29  ;;  %v1192_v63 = vrot.slane %v9577_v13, 5 }
  0x43   : > { %v1191_v62 = vrot.slane %v1189_v55, 4  ;;  %v7736_v0 = vcombine.low %v911_v53, %v921_v61  ;;  %v930_v2 = vrot.slane %v929_v56, 4  ;;  %v1196_v13 = vrot.slane %v9584_v20, 5  ;;  %v1149_v53 = vld [vmem:[%s9554_s22 + $0x3c] sm:$0xe] }
  0x44   : > { %v940_v3 = vrot.slane %v939_v58, 4  ;;  %v1190_v7 = vsel %vm9738_vm7, %v7748_v60, %v1189_v55  ;;  %v1203_v14 = vrot.slane %v9595_v36, 5  ;;  %v7749_v22 = vrot.slane %v1145_v11, 9  ;;  %v1150_v55 = vld [vmem:[%s9554_s22 + $0x48] sm:$0xe] }
  0x45   : > { %v935_v12 = vsel %vm9600_vm4, %v930_v2, %v934_v45  ;;  %v1193_v8 = vsel %vm9738_vm7, %v1191_v62, %v1192_v63  ;;  %v1198_v23 = vrot.slane %v1196_v13, 4  ;;  %v1199_v24 = vrot.slane %v9587_v21, 5  ;;  %v1151_v2 = vld [vmem:[%s9554_s22 + $0x54] sm:$0xe] }
  0x46   : > { %v945_v6 = vsel %vm9600_vm4, %v940_v3, %v944_v59  ;;  %v7759_v19 = vcombine.low %v1190_v7, %v1193_v8  ;;  %v7750_v27 = vrot.slane %v1146_v16, 9  ;;  %v1205_v20 = vrot.slane %v1203_v14, 4 }
  0x47   : > { %v7737_v17 = vcombine.low %v935_v12, %v945_v6  ;;  %v1206_v28 = vrot.slane %v9605_v46, 5  ;;  %v1197_v36 = vsel %vm9738_vm7, %v7749_v22, %v1196_v13  ;;  %v1200_v29 = vsel %vm9738_vm7, %v1198_v23, %v1199_v24  ;;  %v1152_v6 = vld [vmem:[%s9554_s22 + $0x60] sm:$0xe]  ;;  %v1153_v23 = vld [vmem:[%s9554_s22 + $0x6c] sm:$0xe] }
  0x48   : > { %8537 = vmatmul.mubr.msk.bf16.gmra.mrb[12].mxu0 %vm505_vm1, %v7735_v50  ;;  %v1210_v31 = vrot.slane %v9616_v57, 5  ;;  %v1204_v32 = vsel %vm9738_vm7, %v7750_v27, %v1203_v14  ;;  %v1217_v46 = vrot.slane %v9630_v15, 5  ;;  %v7760_v35 = vcombine.low %v1197_v36, %v1200_v29  ;;  %v7850_v15 = vld [vmem:[%s12049_s1 + $0x8] sm:$0x3] }
  0x49   : > { %8540 = vmatprep.mubr.msk.bf16.mxu0 %vm505_vm1, %v7736_v0  ;;  %v1207_v21 = vsel %vm9738_vm7, %v1205_v20, %v1206_v28  ;;  %v7751_v40 = vrot.slane %v1147_v33, 9  ;;  %v1213_v42 = vrot.slane %v9620_v1, 5  ;;  %v1559_v57 = vsel %vm536_vm0, %v9652_v48, 0 }
  0x4a   : > { %v7761_v39 = vcombine.low %v1204_v32, %v1207_v21  ;;  %v1212_v41 = vrot.slane %v1210_v31, 4  ;;  %v7752_v43 = vrot.slane %v1148_v34, 9  ;;  %v1219_v45 = vrot.slane %v1217_v46, 4  ;;  %v9273_v32 = vld [vmem:[%s9554_s22 + $0xc] sm:$0xff]   ;;  %v9275_v21 = vld [vmem:[%s9554_s22 + $0x24] sm:$0xff]  }
  0x4b   : > { %v1220_v47 = vrot.slane %v9638_v25, 5  ;;  %v1211_v1 = vsel %vm9738_vm7, %v7751_v40, %v1210_v31  ;;  %v1224_v49 = vrot.slane %v9646_v38, 5  ;;  %v1231_v54 = vrot.slane %v9669_v4, 5  ;;  %v7820_v34 = vld [vmem:[%s9554_s22 + $0xc] sm:$0xf]  ;;  %v9277_v40 = vld [vmem:[%s9554_s22 + $0x3c] sm:$0xff]  }
  0x4c   : > { %v1214_v48 = vsel %vm9738_vm7, %v1212_v41, %v1213_v42  ;;  %v1218_v25 = vsel %vm9738_vm7, %v7752_v43, %v1217_v46  ;;  %v7753_v59 = vrot.slane %v1149_v53, 9  ;;  %v1227_v38 = vrot.slane %v9657_v51, 5  ;;  %v9840_v46 = vld [vmem:[%s12049_s1 + $0xa] sm:$0x3] }
  0x4d   : > { %v1221_v50 = vsel %vm9738_vm7, %v1219_v45, %v1220_v47  ;;  %v7762_v56 = vcombine.low %v1211_v1, %v1214_v48  ;;  %v1226_v60 = vrot.slane %v1224_v49, 4  ;;  %v7754_v61 = vrot.slane %v1150_v55, 9  ;;  %v7823_v45 = vld [vmem:[%s9554_s22 + $0x18] sm:$0xf]  ;;  %v9858_v1 = vld [vmem:[%s9554_s22 + $0x1c] sm:$0xf] }
  0x4e   : > { %v7763_v58 = vcombine.low %v1218_v25, %v1221_v50  ;;  %v1233_v62 = vrot.slane %v1231_v54, 4  ;;  %v1234_v63 = vrot.slane %v9676_v10, 5  ;;  %v1225_v4 = vsel %vm9738_vm7, %v7753_v59, %v1224_v49  ;;  %v7826_v48 = vld [vmem:[%s9554_s22 + $0x24] sm:$0xf]  ;;  %v9865_v55 = vld [vmem:[%s9554_s22 + $0x14] sm:$0x1] }
  0x4f   : > { %v1228_v0 = vsel %vm9738_vm7, %v1226_v60, %v1227_v38  ;;  %v1238_v3 = vrot.slane %v9683_v26, 5  ;;  %v1232_v51 = vsel %vm9738_vm7, %v7754_v61, %v1231_v54  ;;  %v1245_v10 = vrot.slane %v9695_v44, 5  ;;  %v9278_v54 = vld [vmem:[%s9554_s22 + $0x48] sm:$0xff]   ;;  %v9279_v59 = vld [vmem:[%s9554_s22 + $0x54] sm:$0xff]  }
  0x50   : > { %8541 = vmatmul.mubr.msk.bf16.gmra.mrb[16].mxu0 %vm505_vm1, %v7737_v17  ;;  %v1235_v12 = vsel %vm9738_vm7, %v1233_v62, %v1234_v63  ;;  %v7764_v13 = vcombine.low %v1225_v4, %v1228_v0  ;;  %v7755_v7 = vrot.slane %v1151_v2, 9  ;;  %v1241_v14 = vrot.slane %v9688_v30, 5  ;;  %v9871_v38 = vld [vmem:[%s9554_s22 + $0x28] sm:$0xf]  ;;  %v7829_v63 = vld [vmem:[%s9554_s22 + $0x30] sm:$0xf] }
  0x51   : > { %8546 = vmatprep.mubr.msk.bf16.mxu0 %vm505_vm1, %v7759_v19  ;;  %v7765_v8 = vcombine.low %v1232_v51, %v1235_v12  ;;  %v1240_v11 = vrot.slane %v1238_v3, 4  ;;  %v7756_v16 = vrot.slane %v1152_v6, 9  ;;  %v1247_v17 = vrot.slane %v1245_v10, 4  ;;  %v9877_v51 = vld [vmem:[%s9554_s22 + $0x34] sm:$0xf] }
  0x52   : > { %v1248_v26 = vrot.slane %v9703_v52, 5  ;;  %v1239_v19 = vsel %vm9738_vm7, %v7755_v7, %v1238_v3  ;;  %v1252_v22 = vrot.slane %v9710_v5, 5  ;;  %v7757_v20 = vrot.slane %v1153_v23, 9  ;;  %v9881_v12 = vld [vmem:[%s9554_s22 + $0x20] sm:$0x1] }
  0x53   : > { %v1242_v44 = vsel %vm9738_vm7, %v1240_v11, %v1241_v14  ;;  %v1246_v30 = vsel %vm9738_vm7, %v7756_v16, %v1245_v10  ;;  %v1255_v36 = vrot.slane %v9718_v18, 5  ;;  %v9274_v18 = vld [vmem:[%s9554_s22 + $0x18] sm:$0xff]   ;;  %v2027_v33 = vsel %vm536_vm0, %v7850_v15, 0  ;;  %v9280_v23 = vld [vmem:[%s9554_s22 + $0x60] sm:$0xff]  }
  0x54   : > { %v1249_v52 = vsel %vm9738_vm7, %v1247_v17, %v1248_v26  ;;  %v7766_v24 = vcombine.low %v1239_v19, %v1242_v44  ;;  %v1254_v28 = vrot.slane %v1252_v22, 4  ;;  %v1253_v5 = vsel %vm9738_vm7, %v7757_v20, %v1252_v22 }
  0x55   : > { %v7767_v27 = vcombine.low %v1246_v30, %v1249_v52  ;;  %v1725_v41 = vshrl.u32 %v7820_v34, 16  ;;  %v1728_v42 = vshll.u32 %v7820_v34, 16  ;;  %v1749_v50 = vshrl.u32 %v7823_v45, 16  ;;  %v9906_v34 = vld [vmem:[%s9554_s22 + $0x40] sm:$0xf] }
  0x56   : > { %v1256_v29 = vsel %vm9738_vm7, %v1254_v28, %v1255_v36  ;;  %v1752_v53 = vshll.u32 %v7823_v45, 16  ;;  %v1773_v61 = vshrl.u32 %v7826_v48, 16  ;;  %v1776_v62 = vshll.u32 %v7826_v48, 16  ;;  %v9281_v36 = vld [vmem:[%s9554_s22 + $0x6c] sm:$0xff]  }
  0x57   : > { %v7768_v31 = vcombine.low %v1253_v5, %v1256_v29  ;;  %v1727_v47 = vrot.slane %v1725_v41, 4  ;;  %v1744_v0 = vshll.u32 %v9865_v55, 16  ;;  %v1751_v2 = vrot.slane %v1749_v50, 4 }
  0x58   : > { %8547 = vmatmul.mubr.msk.bf16.vlgmr.msra.gmra.mrb[0].mxu0 %vm505_vm1, %v7760_v35  ;;  %v9276_v35 = vld [vmem:[%s9554_s22 + $0x30] sm:$0xff]   ;;  %v1754_v3 = vrot.slane %v1752_v53, 5  ;;  %v1786_v7 = vshrl.u32 %v9871_v38, 16  ;;  %v1775_v11 = vrot.slane %v1773_v61, 4  ;;  %v1778_v14 = vrot.slane %v1776_v62, 5  ;;  %v9282_v62 = vld [vmem:[%s9554_s22 + $0x78] sm:$0xff]  }
  0x59   : > { %8567 = vmatpush3.bf16.msra.mxu0 %v1559_v57  ;;  %8550 = vmatprep.mubr.msk.bf16.mxu0 %vm505_vm1, %v7761_v39  ;;  %v9849_v39 = vld [vmem:[%s9554_s22 + $0x10] sm:$0xf]  ;;  %v1797_v16 = vshrl.u32 %v7829_v63, 16  ;;  %v1800_v17 = vshll.u32 %v7829_v63, 16  ;;  %v1806_v26 = vshll.u32 %v9877_v51, 16  ;;  %v1810_v19 = vshrl.u32 %v9877_v51, 16 }
  0x5a   : > { %9209 = vmatprep.subr.msk.bf16.mxu0 %vm536_vm0, %v7850_v15  ;;  %v1734_v57 = vshll.u32 %v9849_v39, 16  ;;  %v1738_v43 = vshrl.u32 %v9849_v39, 16  ;;  %v1730_v15 = vrot.slane %v1728_v42, 5  ;;  %v1746_v22 = vrot.slane %v1744_v0, 5  ;;  %v9926_v61 = vld [vmem:[%s9554_s22 + $0x4c] sm:$0xf] }
  0x5b   : > { %v1755_v30 = vor.u32 %v1754_v3, %v1751_v2  ;;  %v1768_v52 = vshll.u32 %v9881_v12, 16  ;;  %v1788_v28 = vrot.slane %v1786_v7, 4  ;;  %v1779_v29 = vor.u32 %v1778_v14, %v1775_v11  ;;  %v7838_v3 = vld [vmem:[%s9554_s22 + $0x54] sm:$0xf]  ;;  %v9935_v11 = vld [vmem:[%s9554_s22 + $0x58] sm:$0xf] }
  0x5c   : > { %v9861_v49 = vrot.slane %v1734_v57, 5  ;;  %v1740_v25 = vrot.slane %v1738_v43, 4  ;;  %v1731_v60 = vor.u32 %v1730_v15, %v1727_v47  ;;  %v9912_v57 = vld [vmem:[%s9554_s22 + $0x38] sm:$0x1]  ;;  %v1830_v48 = vshll.u32 %v9906_v34, 16 }
  0x5d   : > { %v1770_v41 = vrot.slane %v1768_v52, 5 }
  0x5e   : > { %v1741_v4 = vor.u32 %v1740_v25, %v9861_v49  ;;  %v1780_v25 = vrot.slane %v1779_v29, 4 }
  0x60   : > { %8551 = vmatmul.mubr.msk.bf16.gmra.mrb[4].mxu0 %vm505_vm1, %v7762_v56  ;;  %v1758_v56 = vshll.u32 %v9858_v1, 16  ;;  %v1742_v44 = vrot.slane %v1741_v4, 4 }
  0x61   : > { %8554 = vmatprep.mubr.msk.bf16.mxu0 %vm505_vm1, %v7763_v58  ;;  %v1762_v58 = vshrl.u32 %v9858_v1, 16 }
  0x62   : > { %v9883_v10 = vrot.slane %v1758_v56, 5  ;;  %v7835_v56 = vld [vmem:[%s9554_s22 + $0x48] sm:$0xf] }
  0x63   : > { %v1764_v6 = vrot.slane %v1762_v58, 4  ;;  %v1845_v7 = vshrl.u32 %v7835_v56, 16 }
  0x68   : > { %8555 = vmatmul.mubr.msk.bf16.gmra.mrb[8].mxu0 %vm505_vm1, %v7764_v13  ;;  %v1782_v13 = vshll.u32 %v9871_v38, 16 }
  0x69   : > { %8558 = vmatprep.mubr.msk.bf16.mxu0 %vm505_vm1, %v7765_v8  ;;  %v1732_v8 = vrot.slane %v1731_v60, 4 }
  0x6a   : > { %v9896_v20 = vrot.slane %v1782_v13, 5 }
  0x6b   : > { %v1737_v5 = vsel %vm9600_vm4, %v1732_v8, %v9861_v49  ;;  %v1834_v49 = vshrl.u32 %v9906_v34, 16  ;;  %v1848_v8 = vshll.u32 %v7835_v56, 16  ;;  %v2335_v56 = vsel %vm536_vm0, %v9840_v46, 0 }
  0x6c   : > { %v1789_v45 = vor.u32 %v1788_v28, %v9896_v20 }
  0x6d   : > { %v1836_v13 = vrot.slane %v1834_v49, 4  ;;  %v1850_v29 = vrot.slane %v1848_v8, 5 }
  0x6e   : > { %v1790_v4 = vrot.slane %v1789_v45, 4 }
  0x70   : > { %8559 = vmatmul.mubr.msk.bf16.gmra.mrb[12].mxu0 %vm505_vm1, %v7766_v24  ;;  %v1765_v24 = vor.u32 %v1764_v6, %v9883_v10  ;;  %v9932_v6 = vrot.slane %v1830_v48, 5  ;;  %v7841_v48 = vld [vmem:[%s9554_s22 + $0x60] sm:$0xf] }
  0x71   : > { %8562 = vmatprep.mubr.msk.bf16.mxu0 %vm505_vm1, %v7767_v27  ;;  %v9894_v27 = vld [vmem:[%s9554_s22 + $0x2c] sm:$0x1] }
  0x72   : > { %v1792_v42 = vshll.u32 %v9894_v27, 16  ;;  %v1766_v43 = vrot.slane %v1765_v24, 4  ;;  %v1878_v24 = vshll.u32 %v9935_v11, 16  ;;  %v1837_v28 = vor.u32 %v1836_v13, %v9932_v6 }
  0x74   : > { %v1794_v60 = vrot.slane %v1792_v42, 5  ;;  %v1771_v63 = vsel %vm9600_vm4, %v1766_v43, %v1770_v41  ;;  %v9964_v41 = vld [vmem:[%s9554_s22 + $0x5c] sm:$0x1]  ;;  %v1838_v49 = vrot.slane %v1837_v28, 4 }
  0x76   : > { %v1795_v52 = vsel %vm9600_vm4, %v1790_v4, %v1794_v60  ;;  %v1893_v4 = vshrl.u32 %v7841_v48, 16 }
  0x78   : > { %8563 = vmatmul.mubr.msk.bf16.gmra.mrb[16].mxu0 %vm505_vm1, %v7768_v31  ;;  %v7832_v31 = vld [vmem:[%s9554_s22 + $0x3c] sm:$0xf] }
  0x79   : > { %8568 = vmatprep.mubr.msk.bf16.mxu0 %vm505_vm1, %v9273_v32  ;;  %v1799_v32 = vrot.slane %v1797_v16, 4  ;;  %v1821_v47 = vshrl.u32 %v7832_v31, 16  ;;  %v1824_v15 = vshll.u32 %v7832_v31, 16 }
  0x7b   : > { %v1823_v0 = vrot.slane %v1821_v47, 4  ;;  %v1826_v2 = vrot.slane %v1824_v15, 5  ;;  %v9966_v15 = vrot.slane %v1878_v24, 5 }
  0x80   : > { %8569 = vmatmul.mubr.msk.bf16.vlgmr.msra.gmra.mrb[0].mxu0 %vm505_vm1, %v9274_v18  ;;  %v1802_v18 = vrot.slane %v1800_v17, 5 }
  0x81   : > { %8589 = vmatpush3.bf16.msra.mxu0 %v2027_v33  ;;  %8572 = vmatprep.mubr.msk.bf16.mxu0 %vm505_vm1, %v9275_v21  ;;  %v9903_v21 = vrot.slane %v1806_v26, 5  ;;  %v1812_v33 = vrot.slane %v1810_v19, 4  ;;  %v9941_v26 = vld [vmem:[%s9554_s22 + $0x44] sm:$0x1]  ;;  %v1854_v19 = vshll.u32 %v9926_v61, 16 }
  0x82   : > { %9210 = vmatprep.subr.msk.bf16.mxu0 %vm536_vm0, %v9840_v46  ;;  %v1803_v50 = vor.u32 %v1802_v18, %v1799_v32  ;;  %v1896_v46 = vshll.u32 %v7841_v48, 16  ;;  %v10016_v48 = vld [vmem:[%s9554_s22 + $0x74] sm:$0x1] }
  0x83   : > { %v1813_v53 = vor.u32 %v1812_v33, %v9903_v21  ;;  %v9959_v33 = vld [vmem:[%s9554_s22 + $0x50] sm:$0x1] }
  0x84   : > { %v1804_v14 = vrot.slane %v1803_v50, 4 }
  0x85   : > { %v1814_v16 = vrot.slane %v1813_v53, 4  ;;  %v1864_v53 = vshll.u32 %v9959_v33, 16 }
  0x86   : > { %v1809_v32 = vsel %vm9600_vm4, %v1804_v14, %v9903_v21 }
  0x88   : > { %8573 = vmatmul.mubr.msk.bf16.gmra.mrb[4].mxu0 %vm505_vm1, %v9276_v35  ;;  %v1747_v35 = vsel %vm9600_vm4, %v1742_v44, %v1746_v22  ;;  %v1858_v44 = vshrl.u32 %v9926_v61, 16  ;;  %v1869_v22 = vshrl.u32 %v7838_v3, 16 }
  0x89   : > { %8576 = vmatprep.mubr.msk.bf16.mxu0 %vm505_vm1, %v9277_v40  ;;  %v1756_v40 = vrot.slane %v1755_v30, 4  ;;  %v7851_v58 = vcombine.low %v1737_v5, %v1747_v35  ;;  %v1872_v30 = vshll.u32 %v7838_v3, 16  ;;  %v1847_v5 = vrot.slane %v1845_v7, 4 }
  0x8a   : > { %v9961_v35 = vrot.slane %v1854_v19, 5  ;;  %v1871_v42 = vrot.slane %v1869_v22, 4 }
  0x8b   : > { %v1874_v43 = vrot.slane %v1872_v30, 5  ;;  %v1851_v50 = vor.u32 %v1850_v29, %v1847_v5  ;;  %v10001_v29 = vld [vmem:[%s9554_s22 + $0x68] sm:$0x1] }
  0x8d   : > { %v1852_v14 = vrot.slane %v1851_v50, 4 }
  0x90   : > { %8577 = vmatmul.mubr.msk.bf16.gmra.mrb[8].mxu0 %vm505_vm1, %v9278_v54  ;;  %v1816_v54 = vshll.u32 %v9912_v57, 16 }
  0x91   : > { %8580 = vmatprep.mubr.msk.bf16.mxu0 %vm505_vm1, %v9279_v59  ;;  %v1761_v59 = vsel %vm9600_vm4, %v1756_v40, %v9883_v10  ;;  %v1785_v10 = vsel %vm9600_vm4, %v1780_v25, %v9896_v20  ;;  %v1882_v20 = vshrl.u32 %v9935_v11, 16  ;;  %v1860_v40 = vrot.slane %v1858_v44, 4 }
  0x92   : > { %v1818_v17 = vrot.slane %v1816_v54, 5  ;;  %v7852_v31 = vcombine.low %v1761_v59, %v1771_v63  ;;  %v7853_v45 = vcombine.low %v1785_v10, %v1795_v52  ;;  %v9971_v54 = vld [vmem:[%s9554_s22 + $0x64] sm:$0xf]  ;;  %v7844_v59 = vld [vmem:[%s9554_s22 + $0x6c] sm:$0xf]  ;;  %v1888_v63 = vshll.u32 %v9964_v41, 16 }
  0x93   : > { %v1884_v21 = vrot.slane %v1882_v20, 4  ;;  %v1861_v60 = vor.u32 %v1860_v40, %v9961_v35  ;;  %v1902_v13 = vshll.u32 %v9971_v54, 16  ;;  %v1906_v7 = vshrl.u32 %v9971_v54, 16 }
  0x94   : > { %v1819_v18 = vsel %vm9600_vm4, %v1814_v16, %v1818_v17  ;;  %v1866_v16 = vrot.slane %v1864_v53, 5  ;;  %v1917_v17 = vshrl.u32 %v7844_v59, 16  ;;  %v1920_v19 = vshll.u32 %v7844_v59, 16 }
  0x95   : > { %v1885_v3 = vor.u32 %v1884_v21, %v9966_v15  ;;  %v1862_v30 = vrot.slane %v1861_v60, 4  ;;  %v1898_v20 = vrot.slane %v1896_v46, 5  ;;  %v1904_v28 = vrot.slane %v1902_v13, 5 }
  0x96   : > { %v1912_v53 = vshll.u32 %v10001_v29, 16 }
  0x97   : > { %v1886_v24 = vrot.slane %v1885_v3, 4 }
  0x98   : > { %8581 = vmatmul.mubr.msk.bf16.gmra.mrb[12].mxu0 %vm505_vm1, %v9280_v23  ;;  %v1827_v23 = vor.u32 %v1826_v2, %v1823_v0  ;;  %v9979_v0 = vld [vmem:[%s9554_s22 + $0x70] sm:$0xf]  ;;  %v9984_v2 = vld [vmem:[%s12049_s1 + $0xc] sm:$0x3]  ;;  %v1914_v13 = vrot.slane %v1912_v53, 5 }
  0x99   : > { %8584 = vmatprep.mubr.msk.bf16.mxu0 %vm505_vm1, %v9281_v36  ;;  %v1840_v36 = vshll.u32 %v9941_v26, 16  ;;  %v1926_v44 = vshll.u32 %v9979_v0, 16  ;;  %v1930_v22 = vshrl.u32 %v9979_v0, 16  ;;  %v7872_v53 = vld [vmem:[%s9554_s22 + $0x18] sm:$0xe] }
  0x9a   : > { %v1828_v47 = vrot.slane %v1827_v23, 4  ;;  %v1895_v23 = vrot.slane %v1893_v4, 4 }
  0x9b   : > { %v1842_v25 = vrot.slane %v1840_v36, 5  ;;  %v1908_v36 = vrot.slane %v1906_v7, 4  ;;  %v1928_v40 = vrot.slane %v1926_v44, 5  ;;  %v10027_v44 = vld [vmem:[%s9554_s22 + $0x80] sm:$0x1] }
  0x9c   : > { %v1833_v8 = vsel %vm9600_vm4, %v1828_v47, %v9932_v6  ;;  %v1890_v6 = vrot.slane %v1888_v63, 5  ;;  %v1867_v47 = vsel %vm9600_vm4, %v1862_v30, %v1866_v16 }
  0x9d   : > { %v1843_v10 = vsel %vm9600_vm4, %v1838_v49, %v1842_v25  ;;  %v1899_v25 = vor.u32 %v1898_v20, %v1895_v23  ;;  %v1909_v50 = vor.u32 %v1908_v36, %v1904_v28  ;;  %v1960_v23 = vshll.u32 %v10027_v44, 16 }
  0x9e   : > { %v7855_v5 = vcombine.low %v1833_v8, %v1843_v10  ;;  %v1891_v49 = vsel %vm9600_vm4, %v1886_v24, %v1890_v6  ;;  %v2204_v36 = vrot.slane %v9849_v39, 5 }
  0x9f   : > { %v1900_v3 = vrot.slane %v1899_v25, 4  ;;  %v1910_v46 = vrot.slane %v1909_v50, 4 }
  0xa0   : > { %8585 = vmatmul.mubr.msk.bf16.gmra.mrb[16].mxu0 %vm505_vm1, %v9282_v62  ;;  %v1875_v62 = vor.u32 %v1874_v43, %v1871_v42  ;;  %v1932_v42 = vrot.slane %v1930_v22, 4  ;;  %v10005_v43 = vld [vmem:[%s9554_s22 + $0x7c] sm:$0xf] }
  0xa1   : > { %8590 = vmatprep.mubr.msk.bf16.mxu0 %vm505_vm1, %v7851_v58  ;;  %v7854_v58 = vcombine.low %v1809_v32, %v1819_v18  ;;  %v1919_v32 = vrot.slane %v1917_v17, 4  ;;  %v1922_v18 = vrot.slane %v1920_v19, 5  ;;  %v1950_v59 = vshll.u32 %v10005_v43, 16 }
  0xa2   : > { %v1876_v52 = vrot.slane %v1875_v62, 4  ;;  %v1954_v60 = vshrl.u32 %v10005_v43, 16  ;;  %v1933_v62 = vor.u32 %v1932_v42, %v1928_v40  ;;  %v1905_v22 = vsel %vm9600_vm4, %v1900_v3, %v1904_v28 }
  0xa3   : > { %v1952_v10 = vrot.slane %v1950_v59, 5  ;;  %v1915_v30 = vsel %vm9600_vm4, %v1910_v46, %v1914_v13  ;;  %v1962_v42 = vrot.slane %v1960_v23, 5  ;;  %v2225_v3 = vrot.slane %v9877_v51, 5  ;;  %v7874_v13 = vld [vmem:[%s9554_s22 + $0x30] sm:$0xe] }
  0xa4   : > { %v1881_v21 = vsel %vm9600_vm4, %v1876_v52, %v9966_v15  ;;  %v1923_v15 = vor.u32 %v1922_v18, %v1919_v32  ;;  %v1934_v17 = vrot.slane %v1933_v62, 4  ;;  %v7858_v28 = vcombine.low %v1905_v22, %v1915_v30  ;;  %v7876_v23 = vld [vmem:[%s9554_s22 + $0x48] sm:$0xe] }
  0xa5   : > { %v7857_v4 = vcombine.low %v1881_v21, %v1891_v49  ;;  %v2207_v21 = vrot.slane %v9865_v55, 5  ;;  %v2211_v49 = vrot.slane %v9858_v1, 5  ;;  %v2218_v55 = vrot.slane %v9871_v38, 5 }
  0xa6   : > { %v1924_v16 = vrot.slane %v1923_v15, 4  ;;  %v2214_v62 = vrot.slane %v9881_v12, 5  ;;  %v2574_v51 = vsel %vm536_vm0, %v9984_v2, 0  ;;  %v2235_v30 = vrot.slane %v9941_v26, 5 }
  0xa7   : > { %v2213_v15 = vrot.slane %v2211_v49, 4  ;;  %v2220_v1 = vrot.slane %v2218_v55, 4 }
  0xa8   : > { %8591 = vmatmul.mubr.msk.bf16.vlgmr.msra.gmra.mrb[0].mxu0 %vm505_vm1, %v7852_v31  ;;  %v7847_v31 = vld [vmem:[%s9554_s22 + $0x78] sm:$0xf]  ;;  %v1929_v24 = vsel %vm9600_vm4, %v1924_v16, %v1928_v40  ;;  %v2227_v16 = vrot.slane %v2225_v3, 4 }
  0xa9   : > { %8611 = vmatpush3.bf16.msra.mxu0 %v2335_v56  ;;  %8594 = vmatprep.mubr.msk.bf16.mxu0 %vm505_vm1, %v7853_v45  ;;  %v1857_v45 = vsel %vm9600_vm4, %v1852_v14, %v9961_v35  ;;  %v1941_v35 = vshrl.u32 %v7847_v31, 16  ;;  %v1944_v56 = vshll.u32 %v7847_v31, 16  ;;  %v1956_v14 = vrot.slane %v1954_v60, 4 }
  0xaa   : > { %9211 = vmatprep.subr.msk.bf16.mxu0 %vm536_vm0, %v9984_v2  ;;  %v7856_v63 = vcombine.low %v1857_v45, %v1867_v47  ;;  %v2206_v47 = vrot.slane %v2204_v36, 4  ;;  %v7882_v60 = vrot.slane %v7872_v53, 9 }
  0xab   : > { %v1943_v7 = vrot.slane %v1941_v35, 4  ;;  %v1946_v8 = vrot.slane %v1944_v56, 5  ;;  %v1957_v6 = vor.u32 %v1956_v14, %v1952_v10  ;;  %v7873_v35 = vld [vmem:[%s9554_s22 + $0x24] sm:$0xe]  ;;  %v7884_v14 = vrot.slane %v7874_v13, 9 }
  0xac   : > { %v2208_v50 = vsel %vm9738_vm7, %v2206_v47, %v2207_v21  ;;  %v2212_v38 = vsel %vm9738_vm7, %v7882_v60, %v2211_v49  ;;  %v2260_v49 = vrot.slane %v9979_v0, 5  ;;  %v2263_v60 = vrot.slane %v10016_v48, 5  ;;  %v9296_v0 = vld [vmem:[%s9554_s22 + $0x6c] sm:$0xff]  }
  0xad   : > { %v1947_v52 = vor.u32 %v1946_v8, %v1943_v7  ;;  %v1958_v18 = vrot.slane %v1957_v6, 4  ;;  %v7875_v7 = vld [vmem:[%s9554_s22 + $0x3c] sm:$0xe] }
  0xaf   : > { %v1948_v32 = vrot.slane %v1947_v52, 4  ;;  %v1963_v39 = vsel %vm9600_vm4, %v1958_v18, %v1962_v42  ;;  %v2239_v52 = vrot.slane %v9926_v61, 5  ;;  %v2249_v42 = vrot.slane %v9964_v41, 5 }
  0xb0   : > { %8595 = vmatmul.mubr.msk.bf16.gmra.mrb[4].mxu0 %vm505_vm1, %v7854_v58  ;;  %v1936_v58 = vshll.u32 %v10016_v48, 16 }
  0xb1   : > { %8598 = vmatprep.mubr.msk.bf16.mxu0 %vm505_vm1, %v7855_v5  ;;  %v7871_v5 = vld [vmem:[%s9554_s22 + $0xc] sm:$0xe]  ;;  %v1953_v40 = vsel %vm9600_vm4, %v1948_v32, %v1952_v10  ;;  %v2241_v61 = vrot.slane %v2239_v52, 4 }
  0xb2   : > { %v1938_v19 = vrot.slane %v1936_v58, 5  ;;  %v7881_v45 = vrot.slane %v7871_v5, 9  ;;  %v7860_v56 = vcombine.low %v1953_v40, %v1963_v39  ;;  %v7883_v58 = vrot.slane %v7873_v35, 9  ;;  %v7878_v39 = vld [vmem:[%s9554_s22 + $0x60] sm:$0xe] }
  0xb3   : > { %v2253_v40 = vrot.slane %v9971_v54, 5  ;;  %v7888_v54 = vrot.slane %v7878_v39, 9  ;;  %v2256_v35 = vrot.slane %v10001_v29, 5 }
  0xb4   : > { %v1939_v20 = vsel %vm9600_vm4, %v1934_v17, %v1938_v19  ;;  %v2205_v25 = vsel %vm9738_vm7, %v7881_v45, %v2204_v36  ;;  %v2219_v46 = vsel %vm9738_vm7, %v7883_v58, %v2218_v55  ;;  %v2228_v17 = vrot.slane %v9912_v57, 5  ;;  %v9293_v45 = vld [vmem:[%s9554_s22 + $0x48] sm:$0xff]  }
  0xb5   : > { %v7859_v31 = vcombine.low %v1929_v24, %v1939_v20  ;;  %v7892_v59 = vcombine.low %v2205_v25, %v2208_v50  ;;  %v7885_v19 = vrot.slane %v7875_v7, 9  ;;  %v2226_v57 = vsel %vm9738_vm7, %v7884_v14, %v2225_v3  ;;  %v7877_v20 = vld [vmem:[%s9554_s22 + $0x54] sm:$0xe]  ;;  %8514 = vmatprep.mubr.msk.bf16.mxu1 %vm505_vm1, %v9293_v45  ;;  %v7879_v25 = vld [vmem:[%s9554_s22 + $0x6c] sm:$0xe]  ;;  %v9283_v7 = vld [vmem:[%s9554_s22 + $0x18] sm:$0xff]  }
  0xb6   : > { %v2229_v2 = vsel %vm9738_vm7, %v2227_v16, %v2228_v17  ;;  %v2246_v24 = vrot.slane %v9935_v11, 5  ;;  %v7887_v32 = vrot.slane %v7877_v20, 9  ;;  %v9294_v11 = vld [vmem:[%s9554_s22 + $0x54] sm:$0xff]   ;;  %v2255_v55 = vrot.slane %v2253_v40, 4  ;;  %v10153_v14 = vld [vmem:[%s12049_s1 + $0x10] sm:$0x3] }
  0xb7   : > { %v7895_v36 = vcombine.low %v2226_v57, %v2229_v2  ;;  %8515 = vmatmul.mubr.msk.bf16.vlgmr.msra.gmra.mrb[0].mxu1 %vm505_vm1, %v9294_v11  ;;  %v7953_v16 = vld [vmem:[%s9554_s22 + $0x18] sm:$0xf]  ;;  %v10159_v17 = vld [vmem:[%s9554_s22 + $0x1c] sm:$0xf]  ;;  %v7956_v2 = vld [vmem:[%s9554_s22 + $0x24] sm:$0xf] }
  0xb8   : > { %8599 = vmatmul.mubr.msk.bf16.gmra.mrb[8].mxu0 %vm505_vm1, %v7856_v63  ;;  %v2221_v63 = vrot.slane %v9894_v27, 5  ;;  %v2232_v27 = vrot.slane %v9906_v34, 5  ;;  %v10080_v34 = vld [vmem:[%s12049_s1 + $0xe] sm:$0x3]  ;;  %v2248_v18 = vrot.slane %v2246_v24, 4  ;;  %v2257_v58 = vsel %vm9738_vm7, %v2255_v55, %v2256_v35 }
  0xb9   : > { %8602 = vmatprep.mubr.msk.bf16.mxu0 %vm505_vm1, %v7857_v4  ;;  %v2215_v4 = vsel %vm9738_vm7, %v2213_v15, %v2214_v62  ;;  %v9295_v15 = vld [vmem:[%s9554_s22 + $0x60] sm:$0xff]   ;;  %v2254_v62 = vsel %vm9738_vm7, %v7888_v54, %v2253_v40  ;;  %v2753_v57 = vshrl.u32 %v10159_v17, 16 }
  0xba   : > { %v2222_v12 = vsel %vm9738_vm7, %v2220_v1, %v2221_v63  ;;  %v7893_v8 = vcombine.low %v2212_v38, %v2215_v4  ;;  %v2234_v22 = vrot.slane %v2232_v27, 4  ;;  %v2233_v26 = vsel %vm9738_vm7, %v7885_v19, %v2232_v27  ;;  %v7880_v63 = vld [vmem:[%s9554_s22 + $0x78] sm:$0xe]  ;;  %8518 = vmatprep.mubr.msk.bf16.mxu1 %vm505_vm1, %v9295_v15  ;;  %v9287_v19 = vld [vmem:[%s9554_s22 + $0x48] sm:$0xff]   ;;  %v10176_v20 = vld [vmem:[%s9554_s22 + $0x20] sm:$0x1] }
  0xbb   : > { %v7894_v10 = vcombine.low %v2219_v46, %v2222_v12  ;;  %v2250_v41 = vsel %vm9738_vm7, %v2248_v18, %v2249_v42  ;;  %v2267_v1 = vrot.slane %v10005_v43, 5  ;;  %v7899_v38 = vcombine.low %v2254_v62, %v2257_v58  ;;  %v10183_v18 = vld [vmem:[%s9554_s22 + $0x34] sm:$0xf]  ;;  %v9289_v42 = vld [vmem:[%s9554_s22 + $0x60] sm:$0xff]  }
  0xbc   : > { %v2236_v6 = vsel %vm9738_vm7, %v2234_v22, %v2235_v30  ;;  %v7890_v3 = vrot.slane %v7880_v63, 9  ;;  %v2270_v43 = vrot.slane %v10027_v44, 5  ;;  %v9284_v44 = vld [vmem:[%s9554_s22 + $0x24] sm:$0xff]   ;;  %v2740_v22 = vshrl.u32 %v7953_v16, 16 }
  0xbd   : > { %v7896_v5 = vcombine.low %v2233_v26, %v2236_v6  ;;  %v2269_v46 = vrot.slane %v2267_v1, 4  ;;  %v2743_v30 = vshll.u32 %v7953_v16, 16  ;;  %v2801_v39 = vshrl.u32 %v10183_v18, 16  ;;  %v10221_v16 = vld [vmem:[%s9554_s22 + $0x4c] sm:$0xf] }
  0xbe   : > { %v2268_v12 = vsel %vm9738_vm7, %v7890_v3, %v2267_v1 }
  0xbf   : > { %8519 = vmatmul.mubr.msk.bf16.gmra.mrb[4].mxu1 %vm505_vm1, %v9296_v0  ;;  %v2271_v13 = vsel %vm9738_vm7, %v2269_v46, %v2270_v43  ;;  %v2745_v26 = vrot.slane %v2743_v30, 5  ;;  %v2803_v63 = vrot.slane %v2801_v39, 4  ;;  %v10209_v46 = vld [vmem:[%s9554_s22 + $0x38] sm:$0x1] }
  0xc0   : > { %8603 = vmatmul.mubr.msk.bf16.gmra.mrb[12].mxu0 %vm505_vm1, %v7858_v28  ;;  %v7886_v28 = vrot.slane %v7876_v23, 9  ;;  %v7901_v27 = vcombine.low %v2268_v12, %v2271_v13  ;;  %v2755_v23 = vrot.slane %v2753_v57, 4  ;;  %v9291_v43 = vld [vmem:[%s9554_s22 + $0x78] sm:$0xff]   ;;  %v2807_v30 = vshll.u32 %v10209_v46, 16 }
  0xc1   : > { %8606 = vmatprep.mubr.msk.bf16.mxu0 %vm505_vm1, %v7859_v31  ;;  %v2242_v31 = vrot.slane %v9959_v33, 5  ;;  %v2247_v33 = vsel %vm9738_vm7, %v7887_v32, %v2246_v24  ;;  %v10173_v24 = vld [vmem:[%s9554_s22 + $0x28] sm:$0xf] }
  0xc2   : > { %v2240_v47 = vsel %vm9738_vm7, %v7886_v28, %v2239_v52  ;;  %v7898_v53 = vcombine.low %v2247_v33, %v2250_v41  ;;  %v2742_v52 = vrot.slane %v2740_v22, 4  ;;  %v2764_v28 = vshrl.u32 %v7956_v2, 16 }
  0xc3   : > { %v2243_v21 = vsel %vm9738_vm7, %v2241_v61, %v2242_v31  ;;  %v2767_v61 = vshll.u32 %v7956_v2, 16  ;;  %v2773_v31 = vshll.u32 %v10173_v24, 16  ;;  %v2777_v32 = vshrl.u32 %v10173_v24, 16 }
  0xc4   : > { %v7897_v50 = vcombine.low %v2240_v47, %v2243_v21  ;;  %v2746_v45 = vor.u32 %v2745_v26, %v2742_v52  ;;  %v2759_v47 = vshll.u32 %v10176_v20, 16  ;;  %v10189_v21 = vld [vmem:[%s9554_s22 + $0x2c] sm:$0x1]  ;;  %v2797_v41 = vshll.u32 %v10183_v18, 16 }
  0xc5   : > { %v10198_v54 = vrot.slane %v2773_v31, 5  ;;  %v2779_v55 = vrot.slane %v2777_v32, 4  ;;  %v9292_v31 = vld [vmem:[%s9554_s22 + $0x84] sm:$0xff]  }
  0xc6   : > { %v2747_v35 = vrot.slane %v2746_v45, 4 }
  0xc7   : > { %v2780_v3 = vor.u32 %v2779_v55, %v10198_v54 }
  0xc8   : > { %8607 = vmatmul.mubr.msk.bf16.gmra.mrb[16].mxu0 %vm505_vm1, %v7860_v56  ;;  %v7889_v56 = vrot.slane %v7879_v25, 9  ;;  %v10195_v25 = vld [vmem:[%s9554_s22 + $0x40] sm:$0xf] }
  0xc9   : > { %8612 = vmatprep.mubr.msk.bf16.mxu0 %vm505_vm1, %v7892_v59  ;;  %v2262_v59 = vrot.slane %v2260_v49, 4  ;;  %v2821_v62 = vshll.u32 %v10195_v25, 16  ;;  %v2825_v58 = vshrl.u32 %v10195_v25, 16  ;;  %v2781_v2 = vrot.slane %v2780_v3, 4 }
  0xca   : > { %v2261_v29 = vsel %vm9738_vm7, %v7889_v56, %v2260_v49  ;;  %v7962_v49 = vld [vmem:[%s9554_s22 + $0x3c] sm:$0xf] }
  0xcb   : > { %v2264_v48 = vsel %vm9738_vm7, %v2262_v59, %v2263_v60  ;;  %v2761_v59 = vrot.slane %v2759_v47, 5  ;;  %v2783_v60 = vshll.u32 %v10189_v21, 16  ;;  %v2812_v15 = vshrl.u32 %v7962_v49, 16  ;;  %v10239_v47 = vld [vmem:[%s9554_s22 + $0x50] sm:$0x1] }
  0xcc   : > { %v7900_v4 = vcombine.low %v2261_v29, %v2264_v48  ;;  %v2815_v0 = vshll.u32 %v7962_v49, 16  ;;  %v10204_v48 = vrot.slane %v2797_v41, 5  ;;  %v10248_v49 = vld [vmem:[%s9554_s22 + $0x58] sm:$0xf] }
  0xcd   : > { %v10215_v13 = vrot.slane %v2783_v60, 5 }
  0xce   : > { %v2804_v22 = vor.u32 %v2803_v63, %v10204_v48 }
  0xd0   : > { %8613 = vmatmul.mubr.msk.bf16.vlgmr.msra.gmra.mrb[0].mxu0 %vm505_vm1, %v7893_v8  ;;  %v9285_v8 = vld [vmem:[%s9554_s22 + $0x30] sm:$0xff]   ;;  %v2805_v45 = vrot.slane %v2804_v22, 4 }
  0xd1   : > { %8633 = vmatpush3.bf16.msra.mxu0 %v2574_v51  ;;  %8616 = vmatprep.mubr.msk.bf16.mxu0 %vm505_vm1, %v7894_v10  ;;  %v3042_v10 = vsel %vm536_vm0, %v10080_v34, 0  ;;  %v9286_v51 = vld [vmem:[%s9554_s22 + $0x3c] sm:$0xff]  }
  0xd2   : > { %9212 = vmatprep.subr.msk.bf16.mxu0 %vm536_vm0, %v10080_v34  ;;  %v2749_v34 = vshll.u32 %v10159_v17, 16 }
  0xd4   : > { %v10170_v6 = vrot.slane %v2749_v34, 5  ;;  %v10228_v34 = vld [vmem:[%s9554_s22 + $0x44] sm:$0x1] }
  0xd6   : > { %v2756_v11 = vor.u32 %v2755_v23, %v10170_v6  ;;  %v2752_v12 = vsel %vm9600_vm4, %v2747_v35, %v10170_v6  ;;  %v2845_v6 = vshll.u32 %v10221_v16, 16  ;;  %v2849_v23 = vshrl.u32 %v10221_v16, 16 }
  0xd8   : > { %8617 = vmatmul.mubr.msk.bf16.gmra.mrb[4].mxu0 %vm505_vm1, %v7895_v36  ;;  %v9288_v36 = vld [vmem:[%s9554_s22 + $0x54] sm:$0xff]   ;;  %v2757_v56 = vrot.slane %v2756_v11, 4  ;;  %v2809_v11 = vrot.slane %v2807_v30, 5  ;;  %v2851_v55 = vrot.slane %v2849_v23, 4 }
  0xd9   : > { %8620 = vmatprep.mubr.msk.bf16.mxu0 %vm505_vm1, %v7896_v5  ;;  %v7959_v5 = vld [vmem:[%s9554_s22 + $0x30] sm:$0xf] }
  0xda   : > { %v2788_v40 = vshrl.u32 %v7959_v5, 16  ;;  %v2791_v33 = vshll.u32 %v7959_v5, 16 }
  0xdc   : > { %v2790_v1 = vrot.slane %v2788_v40, 4  ;;  %v2793_v29 = vrot.slane %v2791_v33, 5  ;;  %v2786_v33 = vsel %vm9600_vm4, %v2781_v2, %v10215_v13 }
  0xe0   : > { %8621 = vmatmul.mubr.msk.bf16.gmra.mrb[8].mxu0 %vm505_vm1, %v7897_v50  ;;  %v2766_v50 = vrot.slane %v2764_v28, 4  ;;  %v2831_v28 = vshll.u32 %v10228_v34, 16 }
  0xe1   : > { %8624 = vmatprep.mubr.msk.bf16.mxu0 %vm505_vm1, %v7898_v53  ;;  %v2769_v53 = vrot.slane %v2767_v61, 5  ;;  %v7968_v61 = vld [vmem:[%s9554_s22 + $0x54] sm:$0xf] }
  0xe2   : > { %v2860_v35 = vshrl.u32 %v7968_v61, 16 }
  0xe4   : > { %v2862_v13 = vrot.slane %v2860_v35, 4 }
  0xe8   : > { %8625 = vmatmul.mubr.msk.bf16.gmra.mrb[12].mxu0 %vm505_vm1, %v7899_v38  ;;  %v9290_v38 = vld [vmem:[%s9554_s22 + $0x6c] sm:$0xff]  }
  0xe9   : > { %8628 = vmatprep.mubr.msk.bf16.mxu0 %vm505_vm1, %v7900_v4  ;;  %v2770_v4 = vor.u32 %v2769_v53, %v2766_v50  ;;  %v7971_v50 = vld [vmem:[%s9554_s22 + $0x60] sm:$0xf]  ;;  %v10251_v53 = vrot.slane %v2845_v6, 5  ;;  %v7974_v6 = vld [vmem:[%s9554_s22 + $0x6c] sm:$0xf] }
  0xeb   : > { %v2771_v57 = vrot.slane %v2770_v4, 4 }
  0xed   : > { %v2776_v40 = vsel %vm9600_vm4, %v2771_v57, %v10198_v54  ;;  %v2855_v54 = vshll.u32 %v10239_v47, 16 }
  0xee   : > { %v7985_v57 = vcombine.low %v2776_v40, %v2786_v33  ;;  %v2908_v40 = vshrl.u32 %v7974_v6, 16  ;;  %v7977_v33 = vld [vmem:[%s9554_s22 + $0x78] sm:$0xf] }
  0xf0   : > { %8629 = vmatmul.mubr.msk.bf16.gmra.mrb[16].mxu0 %vm505_vm1, %v7901_v27  ;;  %v7965_v27 = vld [vmem:[%s9554_s22 + $0x48] sm:$0xf] }
  0xf1   : > { %8634 = vmatprep.mubr.msk.bf16.mxu0 %vm505_vm1, %v9283_v7  ;;  %v2814_v7 = vrot.slane %v2812_v15, 4  ;;  %v2836_v52 = vshrl.u32 %v7965_v27, 16  ;;  %v2839_v26 = vshll.u32 %v7965_v27, 16 }
  0xf3   : > { %v2838_v41 = vrot.slane %v2836_v52, 4  ;;  %v2841_v39 = vrot.slane %v2839_v26, 5  ;;  %v10280_v52 = vld [vmem:[%s9554_s22 + $0x68] sm:$0x1] }
  0xf8   : > { %8635 = vmatmul.mubr.msk.bf16.vlgmr.msra.gmra.mrb[0].mxu0 %vm505_vm1, %v9284_v44  ;;  %v2817_v44 = vrot.slane %v2815_v0, 5  ;;  %v2833_v0 = vrot.slane %v2831_v28, 5 }
  0xf9   : > { %8655 = vmatpush3.bf16.msra.mxu0 %v3042_v10  ;;  %8638 = vmatprep.mubr.msk.bf16.mxu0 %vm505_vm1, %v9285_v8  ;;  %v10218_v8 = vrot.slane %v2821_v62, 5  ;;  %v2827_v10 = vrot.slane %v2825_v58, 4  ;;  %v2869_v62 = vshll.u32 %v10248_v49, 16  ;;  %v2873_v58 = vshrl.u32 %v10248_v49, 16 }
  0xfa   : > { %9213 = vmatprep.subr.msk.bf16.mxu0 %vm536_vm0, %v10153_v14 }
  0xfb   : > { %v2828_v5 = vor.u32 %v2827_v10, %v10218_v8  ;;  %v10275_v10 = vld [vmem:[%s9554_s22 + $0x5c] sm:$0x1] }
  0xfc   : > { %v2879_v28 = vshll.u32 %v10275_v10, 16 }
  0xfd   : > { %v2829_v15 = vrot.slane %v2828_v5, 4 }
 0x100   : > { %8639 = vmatmul.mubr.msk.bf16.gmra.mrb[4].mxu0 %vm505_vm1, %v9286_v51  ;;  %v2762_v51 = vsel %vm9600_vm4, %v2757_v56, %v2761_v59  ;;  %v2863_v56 = vshll.u32 %v7968_v61, 16  ;;  %v10254_v59 = vld [vmem:[%s9554_s22 + $0x64] sm:$0xf]  ;;  %v10287_v61 = vld [vmem:[%s9554_s22 + $0x70] sm:$0xf] }
 0x101   : > { %8642 = vmatprep.mubr.msk.bf16.mxu0 %vm505_vm1, %v9287_v19  ;;  %v2794_v19 = vor.u32 %v2793_v29, %v2790_v1  ;;  %v7984_v32 = vcombine.low %v2752_v12, %v2762_v51  ;;  %v2884_v1 = vshrl.u32 %v7971_v50, 16  ;;  %v2887_v29 = vshll.u32 %v7971_v50, 16 }
 0x102   : > { %v2893_v4 = vshll.u32 %v10254_v59, 16  ;;  %v2897_v3 = vshrl.u32 %v10254_v59, 16  ;;  %v2852_v12 = vor.u32 %v2851_v55, %v10251_v53  ;;  %v2865_v27 = vrot.slane %v2863_v56, 5 }
 0x103   : > { %v10277_v51 = vrot.slane %v2869_v62, 5  ;;  %v2886_v22 = vrot.slane %v2884_v1, 4  ;;  %v2889_v30 = vrot.slane %v2887_v29, 5  ;;  %v2911_v50 = vshll.u32 %v7974_v6, 16 }
 0x104   : > { %v10282_v26 = vrot.slane %v2893_v4, 5  ;;  %v2866_v5 = vor.u32 %v2865_v27, %v2862_v13  ;;  %v2917_v55 = vshll.u32 %v10287_v61, 16  ;;  %v2921_v35 = vshrl.u32 %v10287_v61, 16  ;;  %v10310_v13 = vld [vmem:[%s9554_s22 + $0x74] sm:$0x1] }
 0x105   : > { %v2913_v4 = vrot.slane %v2911_v50, 5  ;;  %v7980_v27 = vld [vmem:[%s9554_s22 + $0x84] sm:$0xf] }
 0x108   : > { %8643 = vmatmul.mubr.msk.bf16.gmra.mrb[8].mxu0 %vm505_vm1, %v9288_v36  ;;  %v2818_v36 = vor.u32 %v2817_v44, %v2814_v7  ;;  %v2834_v7 = vsel %vm9600_vm4, %v2829_v15, %v2833_v0  ;;  %v2857_v44 = vrot.slane %v2855_v54, 5  ;;  %v2881_v15 = vrot.slane %v2879_v28, 5 }
 0x109   : > { %8646 = vmatprep.mubr.msk.bf16.mxu0 %vm505_vm1, %v9289_v42  ;;  %v2795_v42 = vrot.slane %v2794_v19, 4  ;;  %v2875_v19 = vrot.slane %v2873_v58, 4  ;;  %v2932_v0 = vshrl.u32 %v7977_v33, 16  ;;  %v2935_v54 = vshll.u32 %v7977_v33, 16 }
 0x10a   : > { %v2819_v60 = vrot.slane %v2818_v36, 4  ;;  %v2853_v36 = vrot.slane %v2852_v12, 4  ;;  %v2959_v28 = vshll.u32 %v7980_v27, 16 }
 0x10b   : > { %v2800_v63 = vsel %vm9600_vm4, %v2795_v42, %v10204_v48  ;;  %v2876_v42 = vor.u32 %v2875_v19, %v10277_v51 }
 0x10c   : > { %v2824_v48 = vsel %vm9600_vm4, %v2819_v60, %v10218_v8  ;;  %v2899_v8 = vrot.slane %v2897_v3, 4  ;;  %v2858_v56 = vsel %vm9600_vm4, %v2853_v36, %v2857_v44  ;;  %v2867_v60 = vrot.slane %v2866_v5, 4 }
 0x10d   : > { %v2877_v1 = vrot.slane %v2876_v42, 4  ;;  %v2919_v3 = vrot.slane %v2917_v55, 5  ;;  %v2927_v5 = vshll.u32 %v10310_v13, 16 }
 0x10f   : > { %v2929_v50 = vrot.slane %v2927_v5, 5  ;;  %v8006_v5 = vld [vmem:[%s9554_s22 + $0x30] sm:$0xe] }
 0x110   : > { %8647 = vmatmul.mubr.msk.bf16.gmra.mrb[12].mxu0 %vm505_vm1, %v9290_v38  ;;  %v2810_v38 = vsel %vm9600_vm4, %v2805_v45, %v2809_v11  ;;  %v2890_v45 = vor.u32 %v2889_v30, %v2886_v22  ;;  %v2903_v11 = vshll.u32 %v10280_v52, 16  ;;  %v10314_v22 = vld [vmem:[%s9554_s22 + $0x88] sm:$0xf]  ;;  %v2872_v30 = vsel %vm9600_vm4, %v2867_v60, %v10277_v51 }
 0x111   : > { %8650 = vmatprep.mubr.msk.bf16.mxu0 %vm505_vm1, %v9291_v43  ;;  %v2842_v43 = vor.u32 %v2841_v39, %v2838_v41  ;;  %v7986_v2 = vcombine.low %v2800_v63, %v2810_v38  ;;  %v10295_v41 = vld [vmem:[%s9554_s22 + $0x7c] sm:$0xf]  ;;  %v2900_v39 = vor.u32 %v2899_v8, %v10282_v26  ;;  %v2910_v38 = vrot.slane %v2908_v40, 4  ;;  %v10325_v8 = vld [vmem:[%s9554_s22 + $0x80] sm:$0x1] }
 0x112   : > { %v2941_v62 = vshll.u32 %v10295_v41, 16  ;;  %v2945_v58 = vshrl.u32 %v10295_v41, 16  ;;  %v2891_v29 = vrot.slane %v2890_v45, 4  ;;  %v2905_v63 = vrot.slane %v2903_v11, 5 }
 0x113   : > { %v2843_v23 = vrot.slane %v2842_v43, 4  ;;  %v2923_v43 = vrot.slane %v2921_v35, 4  ;;  %v2956_v51 = vshrl.u32 %v7980_v27, 16  ;;  %v2969_v42 = vshrl.u32 %v10314_v22, 16 }
 0x114   : > { %v2943_v44 = vrot.slane %v2941_v62, 5  ;;  %v2947_v19 = vrot.slane %v2945_v58, 4  ;;  %v2961_v35 = vrot.slane %v2959_v28, 5 }
 0x115   : > { %v2924_v36 = vor.u32 %v2923_v43, %v2919_v3  ;;  %v2958_v55 = vrot.slane %v2956_v51, 4  ;;  %v8004_v43 = vld [vmem:[%s9554_s22 + $0x18] sm:$0xe] }
 0x116   : > { %v2948_v45 = vor.u32 %v2947_v19, %v2943_v44  ;;  %v8014_v19 = vrot.slane %v8004_v43, 9 }
 0x118   : > { %8651 = vmatmul.mubr.msk.bf16.gmra.mrb[16].mxu0 %vm505_vm1, %v9292_v31  ;;  %v3350_v31 = vsel %vm536_vm0, %v10153_v14, 0  ;;  %v2848_v14 = vsel %vm9600_vm4, %v2843_v23, %v10251_v53  ;;  %v2901_v53 = vrot.slane %v2900_v39, 4  ;;  %v2914_v23 = vor.u32 %v2913_v4, %v2910_v38 }
 0x119   : > { %8656 = vmatprep.mubr.msk.bf16.mxu0 %vm505_vm1, %v7984_v32  ;;  %v7987_v32 = vcombine.low %v2824_v48, %v2834_v7  ;;  %v7988_v12 = vcombine.low %v2848_v14, %v2858_v56  ;;  %v2934_v48 = vrot.slane %v2932_v0, 4  ;;  %v2937_v7 = vrot.slane %v2935_v54, 5  ;;  %v10336_v54 = vld [vmem:[%s9554_s22 + $0x8c] sm:$0x1] }
 0x11a   : > { %v2906_v6 = vsel %vm9600_vm4, %v2901_v53, %v2905_v63  ;;  %v2915_v33 = vrot.slane %v2914_v23, 4  ;;  %v2925_v39 = vrot.slane %v2924_v36, 4  ;;  %v2971_v56 = vrot.slane %v2969_v42, 4  ;;  %v8005_v36 = vld [vmem:[%s9554_s22 + $0x24] sm:$0xe] }
 0x11b   : > { %v2975_v63 = vshll.u32 %v10336_v54, 16  ;;  %v3219_v4 = vrot.slane %v10159_v17, 5 }
 0x11c   : > { %v2920_v62 = vsel %vm9600_vm4, %v2915_v33, %v2919_v3  ;;  %v2930_v58 = vsel %vm9600_vm4, %v2925_v39, %v2929_v50  ;;  %v8007_v39 = vld [vmem:[%s9554_s22 + $0x3c] sm:$0xe]  ;;  %v8008_v50 = vld [vmem:[%s9554_s22 + $0x48] sm:$0xe] }
 0x11d   : > { %v7991_v3 = vcombine.low %v2920_v62, %v2930_v58  ;;  %v3254_v58 = vrot.slane %v10248_v49, 5 }
 0x11f   : > { %v3256_v43 = vrot.slane %v3254_v58, 4 }
 0x120   : > { %8657 = vmatmul.mubr.msk.bf16.vlgmr.msra.gmra.mrb[0].mxu0 %vm505_vm1, %v7985_v57  ;;  %v2882_v57 = vsel %vm9600_vm4, %v2877_v1, %v2881_v15  ;;  %v2949_v15 = vrot.slane %v2948_v45, 4  ;;  %v2962_v1 = vor.u32 %v2961_v35, %v2958_v55  ;;  %v8016_v45 = vrot.slane %v8006_v5, 9 }
 0x121   : > { %8677 = vmatpush3.bf16.msra.mxu0 %v3350_v31  ;;  %8660 = vmatprep.mubr.msk.bf16.mxu0 %vm505_vm1, %v7986_v2  ;;  %v2896_v2 = vsel %vm9600_vm4, %v2891_v29, %v10282_v26  ;;  %v2965_v31 = vshll.u32 %v10314_v22, 16  ;;  %v2938_v26 = vor.u32 %v2937_v7, %v2934_v48  ;;  %v7989_v11 = vcombine.low %v2872_v30, %v2882_v57 }
 0x122   : > { %v7990_v40 = vcombine.low %v2896_v2, %v2906_v6  ;;  %v2963_v27 = vrot.slane %v2962_v1, 4  ;;  %v2977_v7 = vrot.slane %v2975_v63, 5  ;;  %v3221_v30 = vrot.slane %v3219_v4, 4  ;;  %v8010_v63 = vld [vmem:[%s9554_s22 + $0x60] sm:$0xe] }
 0x123   : > { %v2967_v14 = vrot.slane %v2965_v31, 5  ;;  %v2939_v60 = vrot.slane %v2938_v26, 4  ;;  %v3222_v57 = vrot.slane %v10176_v20, 5  ;;  %v3226_v2 = vrot.slane %v10173_v24, 5 }
 0x124   : > { %v3220_v6 = vsel %vm9738_vm7, %v8014_v19, %v3219_v4  ;;  %v3233_v20 = vrot.slane %v10183_v18, 5  ;;  %v8015_v31 = vrot.slane %v8005_v36, 9  ;;  %v3229_v26 = vrot.slane %v10189_v21, 5 }
 0x125   : > { %v2972_v29 = vor.u32 %v2971_v56, %v2967_v14  ;;  %v2944_v38 = vsel %vm9600_vm4, %v2939_v60, %v2943_v44  ;;  %v2968_v44 = vsel %vm9600_vm4, %v2963_v27, %v2967_v14  ;;  %v3223_v23 = vsel %vm9738_vm7, %v3221_v30, %v3222_v57  ;;  %v8011_v30 = vld [vmem:[%s9554_s22 + $0x6c] sm:$0xe]  ;;  %v8012_v57 = vld [vmem:[%s9554_s22 + $0x78] sm:$0xe] }
 0x126   : > { %v8025_v28 = vcombine.low %v3220_v6, %v3223_v23  ;;  %v3228_v42 = vrot.slane %v3226_v2, 4  ;;  %v3235_v24 = vrot.slane %v3233_v20, 4  ;;  %v3227_v18 = vsel %vm9738_vm7, %v8015_v31, %v3226_v2  ;;  %v8013_v31 = vld [vmem:[%s9554_s22 + $0x84] sm:$0xe] }
 0x127   : > { %v2973_v48 = vrot.slane %v2972_v29, 4  ;;  %v3234_v33 = vsel %vm9738_vm7, %v8016_v45, %v3233_v20  ;;  %v8017_v14 = vrot.slane %v8007_v39, 9  ;;  %v3243_v60 = vrot.slane %v10228_v34, 5  ;;  %v8009_v29 = vld [vmem:[%s9554_s22 + $0x54] sm:$0xe] }
 0x128   : > { %8661 = vmatmul.mubr.msk.bf16.gmra.mrb[4].mxu0 %vm505_vm1, %v7987_v32  ;;  %v2951_v32 = vshll.u32 %v10325_v8, 16  ;;  %v8019_v4 = vrot.slane %v8009_v29, 9  ;;  %v3264_v27 = vrot.slane %v10280_v52, 5  ;;  %v3275_v52 = vrot.slane %v10295_v41, 5 }
 0x129   : > { %8664 = vmatprep.mubr.msk.bf16.mxu0 %vm505_vm1, %v7988_v12  ;;  %v2978_v17 = vsel %vm9600_vm4, %v2973_v48, %v2977_v7  ;;  %v3268_v7 = vrot.slane %v10287_v61, 5  ;;  %v8021_v2 = vrot.slane %v8011_v30, 9  ;;  %v3271_v23 = vrot.slane %v10310_v13, 5 }
 0x12a   : > { %v2953_v0 = vrot.slane %v2951_v32, 5  ;;  %v7993_v51 = vcombine.low %v2968_v44, %v2978_v17  ;;  %v3236_v32 = vrot.slane %v10209_v46, 5  ;;  %v3247_v46 = vrot.slane %v10221_v16, 5 }
 0x12b   : > { %v3270_v6 = vrot.slane %v3268_v7, 4  ;;  %v8022_v36 = vrot.slane %v8012_v57, 9  ;;  %v3277_v20 = vrot.slane %v3275_v52, 4  ;;  %v3278_v61 = vrot.slane %v10325_v8, 5 }
 0x12c   : > { %v2954_v53 = vsel %vm9600_vm4, %v2949_v15, %v2953_v0  ;;  %v3237_v21 = vsel %vm9738_vm7, %v3235_v24, %v3236_v32  ;;  %v8018_v15 = vrot.slane %v8008_v50, 9  ;;  %v3250_v0 = vrot.slane %v10239_v47, 5 }
 0x12d   : > { %v7992_v12 = vcombine.low %v2944_v38, %v2954_v53  ;;  %v8027_v35 = vcombine.low %v3234_v33, %v3237_v21  ;;  %v3261_v47 = vrot.slane %v10254_v59, 5  ;;  %v3255_v59 = vsel %vm9738_vm7, %v8019_v4, %v3254_v58 }
 0x12e   : > { %v3248_v1 = vsel %vm9738_vm7, %v8018_v15, %v3247_v46  ;;  %v3269_v5 = vsel %vm9738_vm7, %v8021_v2, %v3268_v7  ;;  %v3272_v41 = vsel %vm9738_vm7, %v3270_v6, %v3271_v23  ;;  %v3279_v13 = vsel %vm9738_vm7, %v3277_v20, %v3278_v61 }
 0x12f   : > { %v3263_v49 = vrot.slane %v3261_v47, 4  ;;  %v8032_v8 = vcombine.low %v3269_v5, %v3272_v41  ;;  %v3285_v24 = vrot.slane %v10336_v54, 5 }
 0x130   : > { %8665 = vmatmul.mubr.msk.bf16.gmra.mrb[8].mxu0 %vm505_vm1, %v7989_v11  ;;  %v3230_v11 = vsel %vm9738_vm7, %v3228_v42, %v3229_v26  ;;  %v8023_v26 = vrot.slane %v8013_v31, 9 }
 0x131   : > { %8668 = vmatprep.mubr.msk.bf16.mxu0 %vm505_vm1, %v7990_v40  ;;  %v3240_v40 = vrot.slane %v10195_v25, 5  ;;  %v8026_v55 = vcombine.low %v3227_v18, %v3230_v11  ;;  %v3249_v25 = vrot.slane %v3247_v46, 4 }
 0x133   : > { %v3242_v56 = vrot.slane %v3240_v40, 4  ;;  %v3241_v16 = vsel %vm9738_vm7, %v8017_v14, %v3240_v40  ;;  %v3251_v34 = vsel %vm9738_vm7, %v3249_v25, %v3250_v0 }
 0x134   : > { %v8029_v53 = vcombine.low %v3248_v1, %v3251_v34 }
 0x135   : > { %v3244_v62 = vsel %vm9738_vm7, %v3242_v56, %v3243_v60 }
 0x136   : > { %v8028_v38 = vcombine.low %v3241_v16, %v3244_v62 }
 0x138   : > { %8669 = vmatmul.mubr.msk.bf16.gmra.mrb[12].mxu0 %vm505_vm1, %v7991_v3  ;;  %v3257_v3 = vrot.slane %v10275_v10, 5  ;;  %v3265_v10 = vsel %vm9738_vm7, %v3263_v49, %v3264_v27 }
 0x139   : > { %8672 = vmatprep.mubr.msk.bf16.mxu0 %vm505_vm1, %v7992_v12  ;;  %v8020_v12 = vrot.slane %v8010_v63, 9 }
 0x13a   : > { %v3258_v48 = vsel %vm9738_vm7, %v3256_v43, %v3257_v3 }
 0x13b   : > { %v3262_v19 = vsel %vm9738_vm7, %v8020_v12, %v3261_v47  ;;  %v8030_v44 = vcombine.low %v3255_v59, %v3258_v48 }
 0x13c   : > { %v8031_v17 = vcombine.low %v3262_v19, %v3265_v10 }
 0x140   : > { %8673 = vmatmul.mubr.msk.bf16.gmra.mrb[16].mxu0 %vm505_vm1, %v7993_v51  ;;  %v3282_v51 = vrot.slane %v10314_v22, 5 }
 0x141   : > { %8678 = vmatprep.mubr.msk.bf16.mxu0 %vm505_vm1, %v8025_v28  ;;  %v3276_v28 = vsel %vm9738_vm7, %v8022_v36, %v3275_v52 }
 0x142   : > { %v8033_v42 = vcombine.low %v3276_v28, %v3279_v13  ;;  %v3284_v45 = vrot.slane %v3282_v51, 4  ;;  %v3283_v22 = vsel %vm9738_vm7, %v8023_v26, %v3282_v51 }
 0x144   : > { %v3286_v32 = vsel %vm9738_vm7, %v3284_v45, %v3285_v24 }
 0x145   : > { %v8034_v18 = vcombine.low %v3283_v22, %v3286_v32 }
 0x148   : > { %8679 = vmatmul.mubr.msk.bf16.vlgmr.msra.gmra.mrb[0].mxu0 %vm505_vm1, %v8026_v55  ;;  %v10447_v55 = vld [vmem:[%s12050_s2] ss:$0 sm:$0xff] }
 0x149   : > { %8682 = vmatprep.mubr.msk.bf16.mxu0 %vm505_vm1, %v8027_v35 }
 0x150   : > { %8683 = vmatmul.mubr.msk.bf16.gmra.mrb[4].mxu0 %vm505_vm1, %v8028_v38 }
 0x151   : > { %8686 = vmatprep.mubr.msk.bf16.mxu0 %vm505_vm1, %v8029_v53 }
 0x158   : > { %8687 = vmatmul.mubr.msk.bf16.gmra.mrb[8].mxu0 %vm505_vm1, %v8030_v44 }
 0x159   : > { %8690 = vmatprep.mubr.msk.bf16.mxu0 %vm505_vm1, %v8031_v17 }
 0x160   : > { %8691 = vmatmul.mubr.msk.bf16.gmra.mrb[12].mxu0 %vm505_vm1, %v8032_v8 }
 0x161   : > { %8694 = vmatprep.mubr.msk.bf16.mxu0 %vm505_vm1, %v8033_v42 }
 0x168   : > { %8695 = vmatmul.mubr.msk.bf16.gmra.mrb[16].mxu0 %vm505_vm1, %v8034_v18 }
 0x18a   : > { %v8516_v11 = vpop.f32.mrb[0].mxu1 }
 0x18b   : > { %v622_v40 = vpop.f32.mrb[1].mxu1  ;;  %v667_v6 = vadd.f32 %v8516_v11, %v10447_v55 }
 0x18c   : > { %v8517_v33 = vpop.f32.mrb[2].mxu1  ;;  %v665_v23 = vadd.f32 %v10447_v55, %v622_v40 }
 0x18d   : > { %v625_v21 = vpop.f32.mrb[3].mxu1  ;;  %v668_v36 = vadd.f32 %v8517_v33, %v10447_v55 }
 0x18e   : > { %v666_v41 = vadd.f32 %v10447_v55, %v625_v21 }
 0x192   : > { %v10436_v39 = vpop.f32.mrb[4].mxu1 }
 0x193   : > { %v10438_v54 = vpop.f32.mrb[5].mxu1  ;;  %v671_v40 = vadd.f32 %v10436_v39, %v10447_v55 }
 0x194   : > { %v10440_v46 = vpop.f32.mrb[6].mxu1  ;;  %v669_v33 = vadd.f32 %v10447_v55, %v10438_v54 }
 0x195   : > { %v10442_v50 = vpop.f32.mrb[7].mxu1 }
 0x21b   : > { %v8680_v35 = vpop.f32.mrb[0].mxu0 }
 0x21c   : > { %v10450_v14 = vadd.f32 %v8680_v35, %v10447_v55  ;;  %v3386_v56 = vpop.f32.mrb[1].mxu0  ;;  %v672_v35 = vadd.f32 %v10440_v46, %v10447_v55 }
 0x21d   : > { %v10453_v60 = vadd.f32 %v10447_v55, %v3386_v56  ;;  %v8681_v15 = vpop.f32.mrb[2].mxu0 }
 0x21e   : > { %v10456_v25 = vadd.f32 %v8681_v15, %v10447_v55  ;;  %v3389_v0 = vpop.f32.mrb[3].mxu0  ;;  %v3494_v16 = vsel %vm3487_vm8, %v10450_v14, 0.0  ;;  %v3571_v58 = vmul.f32 %v10450_v14, %v10450_v14 }
 0x21f   : > { %3495 = vadd.xlane.f32.xlu1 %v3494_v16  ;;  %v3488_v62 = vsel %vm3487_vm8, %v10453_v60, 0.0  ;;  %v10465_v1 = vadd.f32 %v10447_v55, %v3389_v0  ;;  %v3569_v49 = vmul.f32 %v10453_v60, %v10453_v60  ;;  %v670_v16 = vadd.f32 %v10447_v55, %v10442_v50 }
 0x220   : > { %3489 = vadd.xlane.f32.xlu0 %v3488_v62  ;;  %v3497_v34 = vsel %vm3487_vm8, %v10456_v25, 0.0  ;;  %v3572_v29 = vmul.f32 %v10456_v25, %v10456_v25  ;;  %v3595_v63 = vsel %vm3487_vm8, %v3571_v58, 0.0 }
 0x221   : > { %v3570_v3 = vmul.f32 %v10465_v1, %v10465_v1  ;;  %v3491_v12 = vsel %vm3487_vm8, %v10465_v1, 0.0  ;;  %v3589_v19 = vsel %vm3487_vm8, %v3569_v49, 0.0 }
 0x222   : > { %v3598_v43 = vsel %vm3487_vm8, %v3572_v29, 0.0 }
 0x223   : > { %3498 = vadd.xlane.f32.xlu1 %v3497_v34  ;;  %v8684_v47 = vpop.f32.mrb[4].mxu0  ;;  %v3592_v59 = vsel %vm3487_vm8, %v3570_v3, 0.0 }
 0x224   : > { %3596 = vadd.xlane.f32.xlu0 %v3595_v63  ;;  %v3402_v38 = vpop.f32.mrb[5].mxu0  ;;  %v10484_v48 = vadd.f32 %v8684_v47, %v10447_v55 }
 0x225   : > { %v8685_v53 = vpop.f32.mrb[6].mxu0  ;;  %v10493_v17 = vadd.f32 %v10447_v55, %v3402_v38 }
 0x226   : > { %v3405_v4 = vpop.f32.mrb[7].mxu0  ;;  %v10480_v27 = vadd.f32 %v8685_v53, %v10447_v55  ;;  %v3506_v2 = vsel %vm3487_vm8, %v10484_v48, 0.0  ;;  %v3575_v28 = vmul.f32 %v10484_v48, %v10484_v48 }
 0x227   : > { %3599 = vadd.xlane.f32.xlu1 %v3598_v43  ;;  %v10488_v52 = vadd.f32 %v10447_v55, %v3405_v4  ;;  %v3500_v51 = vsel %vm3487_vm8, %v10493_v17, 0.0  ;;  %v3573_v11 = vmul.f32 %v10493_v17, %v10493_v17 }
 0x228   : > { %3492 = vadd.xlane.f32.xlu0 %v3491_v12  ;;  %v3509_v44 = vsel %vm3487_vm8, %v10480_v27, 0.0  ;;  %v3576_v61 = vmul.f32 %v10480_v27, %v10480_v27  ;;  %v3607_v18 = vsel %vm3487_vm8, %v3575_v28, 0.0 }
 0x229   : > { %v3503_v20 = vsel %vm3487_vm8, %v10488_v52, 0.0  ;;  %v3574_v22 = vmul.f32 %v10488_v52, %v10488_v52  ;;  %v3601_v39 = vsel %vm3487_vm8, %v3573_v11, 0.0 }
 0x22a   : > { %v3610_v24 = vsel %vm3487_vm8, %v3576_v61, 0.0 }
 0x22b   : > { %3593 = vadd.xlane.f32.xlu1 %v3592_v59  ;;  %v8688_v7 = vpop.f32.mrb[8].mxu0  ;;  %v3604_v56 = vsel %vm3487_vm8, %v3574_v22, 0.0 }
 0x22c   : > { %3590 = vadd.xlane.f32.xlu0 %v3589_v19  ;;  %v3418_v10 = vpop.f32.mrb[9].mxu0  ;;  %v10534_v15 = vadd.f32 %v8688_v7, %v10447_v55 }
 0x22d   : > { %v8689_v30 = vpop.f32.mrb[10].mxu0  ;;  %v10551_v50 = vadd.f32 %v10447_v55, %v3418_v10 }
 0x22e   : > { %v3421_v57 = vpop.f32.mrb[11].mxu0  ;;  %v10528_v21 = vadd.f32 %v8689_v30, %v10447_v55  ;;  %v3518_v53 = vsel %vm3487_vm8, %v10534_v15, 0.0 }
 0x22f   : > { %3510 = vadd.xlane.f32.xlu1 %v3509_v44  ;;  %v10544_v46 = vadd.f32 %v10447_v55, %v3421_v57  ;;  %v3512_v3 = vsel %vm3487_vm8, %v10551_v50, 0.0  ;;  %v3579_v55 = vmul.f32 %v10534_v15, %v10534_v15  ;;  %v3577_v7 = vmul.f32 %v10551_v50, %v10551_v50 }
 0x230   : > { %3507 = vadd.xlane.f32.xlu0 %v3506_v2  ;;  %v3521_v63 = vsel %vm3487_vm8, %v10528_v21, 0.0  ;;  %v3580_v43 = vmul.f32 %v10528_v21, %v10528_v21 }
 0x231   : > { %v3515_v4 = vsel %vm3487_vm8, %v10544_v46, 0.0  ;;  %v3578_v49 = vmul.f32 %v10544_v46, %v10544_v46  ;;  %v3619_v59 = vsel %vm3487_vm8, %v3579_v55, 0.0  ;;  %v3613_v10 = vsel %vm3487_vm8, %v3577_v7, 0.0 }
 0x232   : > { %v3622_v12 = vsel %vm3487_vm8, %v3580_v43, 0.0 }
 0x233   : > { %3504 = vadd.xlane.f32.xlu1 %v3503_v20  ;;  %v8692_v5 = vpop.f32.mrb[12].mxu0  ;;  %v3616_v19 = vsel %vm3487_vm8, %v3578_v49, 0.0 }
 0x234   : > { %v10509_v13 = vadd.f32 %v8692_v5, %v667_v6  ;;  %3501 = vadd.xlane.f32.xlu0 %v3500_v51  ;;  %v3434_v31 = vpop.f32.mrb[13].mxu0 }
 0x235   : > { %v10511_v8 = vadd.f32 %v3434_v31, %v665_v23  ;;  %v8693_v42 = vpop.f32.mrb[14].mxu0 }
 0x236   : > { %v10513_v26 = vadd.f32 %v8693_v42, %v668_v36  ;;  %v3437_v45 = vpop.f32.mrb[15].mxu0  ;;  %v3530_v57 = vsel %vm3487_vm8, %v10509_v13, 0.0  ;;  %v3583_v23 = vmul.f32 %v10509_v13, %v10509_v13 }
 0x237   : > { %v10518_v32 = vadd.f32 %v3437_v45, %v666_v41  ;;  %3611 = vadd.xlane.f32.xlu1 %v3610_v24  ;;  %v3524_v6 = vsel %vm3487_vm8, %v10511_v8, 0.0  ;;  %v3581_v5 = vmul.f32 %v10511_v8, %v10511_v8 }
 0x238   : > { %3608 = vadd.xlane.f32.xlu0 %v3607_v18  ;;  %v3533_v30 = vsel %vm3487_vm8, %v10513_v26, 0.0  ;;  %v3584_v2 = vmul.f32 %v10513_v26, %v10513_v26  ;;  %v3631_v61 = vsel %vm3487_vm8, %v3583_v23, 0.0 }
 0x239   : > { %v3527_v44 = vsel %vm3487_vm8, %v10518_v32, 0.0  ;;  %v3582_v20 = vmul.f32 %v10518_v32, %v10518_v32  ;;  %v3625_v51 = vsel %vm3487_vm8, %v3581_v5, 0.0 }
 0x23a   : > { %v3634_v36 = vsel %vm3487_vm8, %v3584_v2, 0.0 }
 0x23b   : > { %3605 = vadd.xlane.f32.xlu1 %v3604_v56  ;;  %v8696_v0 = vpop.f32.mrb[16].mxu0  ;;  %v3628_v41 = vsel %vm3487_vm8, %v3582_v20, 0.0 }
 0x23c   : > { %v10539_v62 = vadd.f32 %v8696_v0, %v671_v40  ;;  %3602 = vadd.xlane.f32.xlu0 %v3601_v39  ;;  %v3450_v54 = vpop.f32.mrb[17].mxu0 }
 0x23d   : > { %v10541_v58 = vadd.f32 %v3450_v54, %v669_v33  ;;  %v8697_v34 = vpop.f32.mrb[18].mxu0 }
 0x23e   : > { %v10546_v29 = vadd.f32 %v8697_v34, %v672_v35  ;;  %v3453_v47 = vpop.f32.mrb[19].mxu0  ;;  %v3542_v31 = vsel %vm3487_vm8, %v10539_v62, 0.0  ;;  %v3587_v33 = vmul.f32 %v10539_v62, %v10539_v62 }
 0x23f   : > { %v10553_v38 = vadd.f32 %v3453_v47, %v670_v16  ;;  %3522 = vadd.xlane.f32.xlu1 %v3521_v63  ;;  %v3536_v24 = vsel %vm3487_vm8, %v10541_v58, 0.0  ;;  %v3585_v22 = vmul.f32 %v10541_v58, %v10541_v58 }
 0x240   : > { %3519 = vadd.xlane.f32.xlu0 %v3518_v53  ;;  %v3545_v28 = vsel %vm3487_vm8, %v10546_v29, 0.0  ;;  %v3588_v11 = vmul.f32 %v10546_v29, %v10546_v29  ;;  %v3643_v56 = vsel %vm3487_vm8, %v3587_v33, 0.0 }
 0x241   : > { %v3539_v42 = vsel %vm3487_vm8, %v10553_v38, 0.0  ;;  %v3586_v45 = vmul.f32 %v10553_v38, %v10553_v38  ;;  %v3637_v40 = vsel %vm3487_vm8, %v3585_v22, 0.0 }
 0x242   : > { %v3646_v35 = vsel %vm3487_vm8, %v3588_v11, 0.0 }
 0x243   : > { %3516 = vadd.xlane.f32.xlu1 %v3515_v4  ;;  %v3640_v18 = vsel %vm3487_vm8, %v3586_v45, 0.0 }
 0x244   : > { %3513 = vadd.xlane.f32.xlu0 %v3512_v3 }
 0x247   : > { %3623 = vadd.xlane.f32.xlu1 %v3622_v12 }
 0x248   : > { %3620 = vadd.xlane.f32.xlu0 %v3619_v59 }
 0x24b   : > { %3617 = vadd.xlane.f32.xlu1 %v3616_v19 }
 0x24c   : > { %3614 = vadd.xlane.f32.xlu0 %v3613_v10 }
 0x24f   : > { %3534 = vadd.xlane.f32.xlu1 %v3533_v30 }
 0x250   : > { %3531 = vadd.xlane.f32.xlu0 %v3530_v57 }
 0x253   : > { %3528 = vadd.xlane.f32.xlu1 %v3527_v44 }
 0x254   : > { %3525 = vadd.xlane.f32.xlu0 %v3524_v6 }
 0x257   : > { %3635 = vadd.xlane.f32.xlu1 %v3634_v36 }
 0x258   : > { %3632 = vadd.xlane.f32.xlu0 %v3631_v61 }
 0x25b   : > { %3629 = vadd.xlane.f32.xlu1 %v3628_v41 }
 0x25c   : > { %3626 = vadd.xlane.f32.xlu0 %v3625_v51 }
 0x25f   : > { %3546 = vadd.xlane.f32.xlu1 %v3545_v28 }
 0x260   : > { %3543 = vadd.xlane.f32.xlu0 %v3542_v31 }
 0x263   : > { %3540 = vadd.xlane.f32.xlu1 %v3539_v42 }
 0x264   : > { %3537 = vadd.xlane.f32.xlu0 %v3536_v24 }
 0x267   : > { %3641 = vadd.xlane.f32.xlu1 %v3640_v18 }
 0x268   : > { %3638 = vadd.xlane.f32.xlu0 %v3637_v40 }
 0x26b   : > { %3647 = vadd.xlane.f32.xlu1 %v3646_v35  ;;  %v10629_v35 = vld [vmem:[%s12051_s3] ss:$0 sm:$0xff] }
 0x26c   : > { %3644 = vadd.xlane.f32.xlu0 %v3643_v56 }
 0x2ac   : > { %v3496_v0 = vpop.xlane.xlu1 %3495 }
 0x2ad   : > { %v3490_v16 = vpop.xlane.xlu0 %3489  ;;  %v3551_v39 = vmul.f32 0.125, %v3496_v0 }
 0x2ae   : > { %v10613_v49 = vmul.f32 0.125, %v3490_v16 }
 0x2af   : > { %v3671_v63 = vmul.f32 %v3551_v39, %v3551_v39  ;;  %v3771_v40 = vsub.f32 %v10450_v14, %v3551_v39  ;;  %v10639_v14 = vld [vmem:[%s12052_s4] ss:$0 sm:$0xff] }
 0x2b0   : > { %v3499_v54 = vpop.xlane.xlu1 %3498  ;;  %v3669_v23 = vmul.f32 %v10613_v49, %v10613_v49 }
 0x2b1   : > { %v3552_v34 = vmul.f32 0.125, %v3499_v54  ;;  %v3597_v47 = vpop.xlane.xlu0 %3596 }
 0x2b2   : > { %v3651_v53 = vmul.f32 0.125, %v3597_v47 }
 0x2b3   : > { %v3672_v3 = vmul.f32 %v3552_v34, %v3552_v34 }
 0x2b4   : > { %v3691_v4 = vsub.f32 %v3651_v53, %v3671_v63  ;;  %v3600_v43 = vpop.xlane.xlu1 %3599  ;;  %v3772_v53 = vsub.f32 %v10456_v25, %v3552_v34 }
 0x2b5   : > { %v3652_v55 = vmul.f32 0.125, %v3600_v43  ;;  %v3493_v12 = vpop.xlane.xlu0 %3492 }
 0x2b6   : > { %v3711_v59 = vmax.f32 %v3691_v4, 0.0  ;;  %v10615_v7 = vmul.f32 0.125, %v3493_v12 }
 0x2b7   : > { %v3692_v19 = vsub.f32 %v3652_v55, %v3672_v3 }
 0x2b8   : > { %v3731_v10 = vadd.f32 1e-05, %v3711_v59  ;;  %v3670_v30 = vmul.f32 %v10615_v7, %v10615_v7  ;;  %v3594_v57 = vpop.xlane.xlu1 %3593  ;;  %v3769_v59 = vsub.f32 %v10453_v60, %v10613_v49  ;;  %v3770_v34 = vsub.f32 %v10465_v1, %v10615_v7 }
 0x2b9   : > { %v3712_v44 = vmax.f32 %v3692_v19, 0.0  ;;  %v3650_v2 = vmul.f32 0.125, %v3594_v57  ;;  %v3591_v6 = vpop.xlane.xlu0 %3590 }
 0x2ba   : > { %9297 = vrsqrt.f32 %v3731_v10  ;;  %v3649_v36 = vmul.f32 0.125, %v3591_v6 }
 0x2bb   : > { %v3732_v20 = vadd.f32 1e-05, %v3712_v44  ;;  %v3690_v61 = vsub.f32 %v3650_v2, %v3670_v30 }
 0x2bc   : > { %v3689_v5 = vsub.f32 %v3649_v36, %v3669_v23  ;;  %v3511_v41 = vpop.xlane.xlu1 %3510 }
 0x2bd   : > { %9299 = vrsqrt.f32 %v3732_v20  ;;  %v3710_v51 = vmax.f32 %v3690_v61, 0.0  ;;  %v3508_v28 = vpop.xlane.xlu0 %3507  ;;  %v10621_v22 = vmul.f32 0.125, %v3511_v41 }
 0x2be   : > { %v3709_v31 = vmax.f32 %v3689_v5, 0.0  ;;  %v10623_v11 = vmul.f32 0.125, %v3508_v28 }
 0x2bf   : > { %v3730_v42 = vadd.f32 1e-05, %v3710_v51  ;;  %v3676_v16 = vmul.f32 %v10621_v22, %v10621_v22 }
 0x2c0   : > { %v3729_v45 = vadd.f32 1e-05, %v3709_v31  ;;  %v3505_v24 = vpop.xlane.xlu1 %3504  ;;  %v3675_v39 = vmul.f32 %v10623_v11, %v10623_v11 }
 0x2c1   : > { %9301 = vrsqrt.f32 %v3730_v42  ;;  %v3502_v18 = vpop.xlane.xlu0 %3501  ;;  %v10633_v54 = vmul.f32 0.125, %v3505_v24 }
 0x2c2   : > { %9303 = vrsqrt.f32 %v3729_v45  ;;  %v10643_v4 = vmul.f32 0.125, %v3502_v18 }
 0x2c3   : > { %v3674_v57 = vmul.f32 %v10633_v54, %v10633_v54 }
 0x2c4   : > { %v9298_v33 = vpop.eup %9297  ;;  %v3612_v56 = vpop.xlane.xlu1 %3611  ;;  %v3673_v49 = vmul.f32 %v10643_v4, %v10643_v4 }
 0x2c5   : > { %v3791_v0 = vmul.f32 %v9298_v33, %v3771_v40  ;;  %v3656_v47 = vmul.f32 0.125, %v3612_v56  ;;  %v3609_v63 = vpop.xlane.xlu0 %3608 }
 0x2c6   : > { %v3655_v43 = vmul.f32 0.125, %v3609_v63 }
 0x2c7   : > { %v9300_v3 = vpop.eup %9299  ;;  %v3817_v55 = vmul.f32 %v10629_v35, %v3791_v0  ;;  %v3696_v12 = vsub.f32 %v3656_v47, %v3676_v16 }
 0x2c8   : > { %v3792_v25 = vmul.f32 %v9300_v3, %v3772_v53  ;;  %v3695_v19 = vsub.f32 %v3655_v43, %v3675_v39  ;;  %v3606_v10 = vpop.xlane.xlu1 %3605  ;;  %v3776_v3 = vsub.f32 %v10480_v27, %v10621_v22 }
 0x2c9   : > { %v3843_v30 = vadd.f32 %v10639_v14, %v3817_v55  ;;  %v3716_v44 = vmax.f32 %v3696_v12, 0.0  ;;  %v3654_v2 = vmul.f32 0.125, %v3606_v10  ;;  %v3603_v6 = vpop.xlane.xlu0 %3602 }
 0x2ca   : > { %v3818_v60 = vmul.f32 %v10629_v35, %v3792_v25  ;;  %v3715_v23 = vmax.f32 %v3695_v19, 0.0  ;;  %v3653_v36 = vmul.f32 0.125, %v3603_v6 }
 0x2cb   : > { %v9302_v1 = vpop.eup %9301  ;;  %vm3863_vm13 = vcmp.ge.f32.partialorder %v3843_v30, 0.0  ;;  %v3883_v7 = vmul.f32 0.01, %v3843_v30  ;;  %v3736_v20 = vadd.f32 1e-05, %v3716_v44  ;;  %v3694_v61 = vsub.f32 %v3654_v2, %v3674_v57 }
 0x2cc   : > { %v9304_v5 = vpop.eup %9303  ;;  %v3844_v41 = vadd.f32 %v10639_v14, %v3818_v60  ;;  %v3790_v51 = vmul.f32 %v9302_v1, %v3770_v34  ;;  %v3735_v28 = vadd.f32 1e-05, %v3715_v23  ;;  %v3693_v31 = vsub.f32 %v3653_v36, %v3673_v49  ;;  %v3523_v42 = vpop.xlane.xlu1 %3522  ;;  %v4197_v44 = vld [vmem:[#allocation2 + $0xc] sm:$0xf] }
 0x2cd   : > { %v3903_v45 = vsel %vm3863_vm13, %v3843_v30, %v3883_v7  ;;  %v3789_v24 = vmul.f32 %v9304_v5, %v3769_v59  ;;  %9305 = vrsqrt.f32 %v3736_v20  ;;  %v3714_v18 = vmax.f32 %v3694_v61, 0.0  ;;  %v3520_v40 = vpop.xlane.xlu0 %3519  ;;  %vm10687_vm13 = vmor %vm3981_vm11, %vm3982_vm14 }
 0x2ce   : > { %v8293_v33 = vpack.c.bf16 %v3903_v45, %v3903_v45  ;;  %vm3864_vm15 = vcmp.ge.f32.partialorder %v3844_v41, 0.0  ;;  %v3884_v56 = vmul.f32 0.01, %v3844_v41  ;;  %v3816_v0 = vmul.f32 %v10629_v35, %v3790_v51  ;;  %vm10727_vm14 = vmand %vm4192_vm12, %vm4185_vm10 }
 0x2cf   : > { %v3815_v16 = vmul.f32 %v10629_v35, %v3789_v24  ;;  %9307 = vrsqrt.f32 %v3735_v28  ;;  %v3734_v47 = vadd.f32 1e-05, %v3714_v18  ;;  %v3713_v63 = vmax.f32 %v3693_v31, 0.0 }
 0x2d0   : > { %v4002_v53 = vshrl.u32 %v8293_v33, 16  ;;  %v3904_v39 = vsel %vm3864_vm15, %v3844_v41, %v3884_v56  ;;  %v3842_v43 = vadd.f32 %v10639_v14, %v3816_v0  ;;  %v3517_v55 = vpop.xlane.xlu1 %3516  ;;  %v4005_v10 = vshll.u32 %v8293_v33, 16  ;;  %v4201_v41 = vld [vmem:[#allocation2 + $0x14] sm:$0x1] }
 0x2d1   : > { %v8294_v12 = vpack.c.bf16 %v3904_v39, %v3904_v39  ;;  %v3841_v59 = vadd.f32 %v10639_v14, %v3815_v16  ;;  %9309 = vrsqrt.f32 %v3734_v47  ;;  %v3733_v25 = vadd.f32 1e-05, %v3713_v63  ;;  %v10663_v34 = vpop.xlane.xlu0 %3513  ;;  %v4194_v39 = vld [vmem:[#allocation2 + $0x8] sm:$0x1] }
 0x2d2   : > { %v4004_v19 = vrot.slane %v4002_v53, 7  ;;  %vm3862_vm2 = vcmp.ge.f32.partialorder %v3842_v43, 0.0  ;;  %v3882_v30 = vmul.f32 0.01, %v3842_v43  ;;  %v3775_v2 = vsub.f32 %v10484_v48, %v10623_v11 }
 0x2d3   : > { %v4010_v27 = vshrl.u32 %v8294_v12, 16  ;;  %vm3861_vm5 = vcmp.ge.f32.partialorder %v3841_v59, 0.0  ;;  %v3881_v22 = vmul.f32 0.01, %v3841_v59  ;;  %9311 = vrsqrt.f32 %v3733_v25 }
 0x2d4   : > { %v4007_v6 = vor.u32 %v4005_v10, %v4004_v19  ;;  %v3902_v60 = vsel %vm3862_vm2, %v3842_v43, %v3882_v30  ;;  %v10673_v49 = vmul.f32 0.125, %v3523_v42  ;;  %v3624_v23 = vpop.xlane.xlu1 %3623  ;;  %v4013_v7 = vshll.u32 %v8294_v12, 16  ;;  %v4187_v30 = vld [vmem:[#allocation2] sm:$0xf] }
 0x2d5   : > { %v4012_v1 = vrot.slane %v4010_v27, 7  ;;  %v8292_v20 = vpack.c.bf16 %v3902_v60, %v3902_v60  ;;  %v3901_v61 = vsel %vm3861_vm5, %v3841_v59, %v3881_v22  ;;  %v10681_v5 = vpop.xlane.xlu0 %3620  ;;  %v3774_v28 = vsub.f32 %v10488_v52, %v10633_v54 }
 0x2d6   : > { %v4198_v48 = vsel %vm10667_vm3, %v4007_v6, %v4197_v44  ;;  %v8291_v51 = vpack.c.bf16 %v3901_v61, %v3901_v61  ;;  %v3773_v31 = vsub.f32 %v10493_v17, %v10643_v4  ;;  %v4008_v45 = vrot.slane %v4004_v19, 4 }
 0x2d7   : > { %v9306_v42 = vpop.eup %9305  ;;  %4199 = vst [vmem:[#allocation2 + $0xc] sm:$0xf] %v4198_v48  ;;  %v4015_v24 = vor.u32 %v4013_v7, %v4012_v1  ;;  %v4017_v18 = vrot.slane %v4012_v1, 4  ;;  %v3993_v33 = vshrl.u32 %v8292_v20, 16  ;;  %v3680_v16 = vmul.f32 %v10673_v49, %v10673_v49 }
 0x2d8   : > { %v3985_v56 = vshrl.u32 %v8291_v51, 16  ;;  %v3796_v0 = vmul.f32 %v9306_v42, %v3776_v3  ;;  %v10697_v47 = vmul.f32 0.125, %v3520_v40  ;;  %v10699_v63 = vpop.xlane.xlu1 %3617  ;;  %v3996_v4 = vshll.u32 %v8292_v20, 16 }
 0x2d9   : > { %v9308_v53 = vpop.eup %9307  ;;  %v4016_v52 = vsel %vm10687_vm13, %v4008_v45, %v4015_v24  ;;  %v4202_v17 = vsel %vm10677_vm6, %v4017_v18, %v4201_v41  ;;  %v3995_v54 = vrot.slane %v3993_v33, 7  ;;  %v3988_v3 = vshll.u32 %v8291_v51, 16  ;;  %v3615_v59 = vpop.xlane.xlu0 %3614 }
 0x2da   : > { %4200 = vst.msk [vmem:[#allocation2 + $0x10] sm:$0xf] %vm4184_vm9, %v4016_v52  ;;  %4203 = vst [vmem:[#allocation2 + $0x14] sm:$0x1] %v4202_v17  ;;  %v3987_v43 = vrot.slane %v3985_v56, 7  ;;  %v3822_v40 = vmul.f32 %v10629_v35, %v3796_v0  ;;  %v3795_v12 = vmul.f32 %v9308_v53, %v3775_v2  ;;  %v10707_v44 = vmul.f32 0.125, %v3517_v55 }
 0x2db   : > { %v9310_v25 = vpop.eup %9309  ;;  %v3998_v19 = vor.u32 %v3996_v4, %v3995_v54  ;;  %v4000_v10 = vrot.slane %v3995_v54, 4  ;;  %v3660_v27 = vmul.f32 0.125, %v3624_v23  ;;  %v3780_v61 = vsub.f32 %v10528_v21, %v10673_v49 }
 0x2dc   : > { %v3990_v22 = vor.u32 %v3988_v3, %v3987_v43  ;;  %v3991_v6 = vrot.slane %v3987_v43, 4  ;;  %v3848_v60 = vadd.f32 %v10639_v14, %v3822_v40  ;;  %v3821_v1 = vmul.f32 %v10629_v35, %v3795_v12  ;;  %v10711_v7 = vpop.xlane.xlu1 %3534 }
 0x2dd   : > { %v4195_v20 = vsel %vm10677_vm6, %v4000_v10, %v4194_v39  ;;  %v3794_v2 = vmul.f32 %v9310_v25, %v3774_v28  ;;  %v10719_v55 = vmul.f32 %v10697_v47, %v10697_v47  ;;  %v9312_v23 = vpop.eup %9311  ;;  %v10738_v0 = vmul.f32 %v10707_v44, %v10707_v44  ;;  %v10743_v17 = vpop.xlane.xlu0 %3531  ;;  %v4215_v10 = vld [vmem:[#allocation2 + $0x2c] sm:$0x1] }
 0x2de   : > { %v4263_v48 = vld [vmem:[#allocation2 + $0xc] sm:$0x1]  ;;  %4196 = vst [vmem:[#allocation2 + $0x8] sm:$0x1] %v4195_v20  ;;  %v3999_v41 = vsel %vm10687_vm13, %v3991_v6, %v3998_v19  ;;  %v4188_v51 = vsel %vm10667_vm3, %v3990_v22, %v4187_v30  ;;  %vm3868_vm11 = vcmp.ge.f32.partialorder %v3848_v60, 0.0  ;;  %v3847_v24 = vadd.f32 %v10639_v14, %v3821_v1 }
 0x2df   : > { %v3888_v42 = vmul.f32 0.01, %v3848_v60  ;;  %v4264_v45 = vsel %vm10677_vm6, 0, %v4263_v48  ;;  %4189 = vst [vmem:[#allocation2] sm:$0xf] %v4188_v51  ;;  %v3820_v18 = vmul.f32 %v10629_v35, %v3794_v2  ;;  %v3793_v33 = vmul.f32 %v9312_v23, %v3773_v31 }
 0x2e0   : > { %4191 = vst.msk [vmem:[#allocation2 + $0x4] sm:$0xf] %vm4184_vm9, %v3999_v41  ;;  %4265 = vst [vmem:[#allocation2 + $0xc] sm:$0x1] %v4264_v45  ;;  %v10741_v53 = vmul.f32 0.125, %v10663_v34  ;;  %v3700_v52 = vsub.f32 %v3660_v27, %v3680_v16  ;;  %v10745_v54 = vpop.xlane.xlu1 %3528  ;;  %vm3867_vm10 = vcmp.ge.f32.partialorder %v3847_v24, 0.0 }
 0x2e1   : > { %v3908_v56 = vsel %vm3868_vm11, %v3848_v60, %v3888_v42  ;;  %v4294_v4 = vld [vmem:[#allocation2 + $0x14] sm:$0x1]  ;;  %v3887_v43 = vmul.f32 0.01, %v3847_v24  ;;  %v3846_v31 = vadd.f32 %v10639_v14, %v3820_v18  ;;  %v3819_v40 = vmul.f32 %v10629_v35, %v3793_v33  ;;  %v3526_v45 = vpop.xlane.xlu0 %3525 }
 0x2e2   : > { %v8298_v39 = vpack.c.bf16 %v3908_v56, %v3908_v56  ;;  %v4295_v3 = vsel %vm10727_vm14, 0, %v4294_v4  ;;  %v3720_v12 = vmax.f32 %v3700_v52, 0.0  ;;  %v3659_v34 = vmul.f32 0.125, %v10681_v5  ;;  %v4211_v4 = vld [vmem:[#allocation2 + $0x24] sm:$0xf] }
 0x2e3   : > { %4296 = vst [vmem:[#allocation2 + $0x14] sm:$0x1] %v4295_v3  ;;  %v3907_v19 = vsel %vm3867_vm10, %v3847_v24, %v3887_v43  ;;  %vm3866_vm15 = vcmp.ge.f32.partialorder %v3846_v31, 0.0  ;;  %v3886_v27 = vmul.f32 0.01, %v3846_v31  ;;  %v3845_v22 = vadd.f32 %v10639_v14, %v3819_v40 }
 0x2e4   : > { %v4044_v16 = vshrl.u32 %v8298_v39, 16  ;;  %v4047_v25 = vshll.u32 %v8298_v39, 16  ;;  %v8297_v30 = vpack.c.bf16 %v3907_v19, %v3907_v19  ;;  %v3740_v6 = vadd.f32 1e-05, %v3720_v12  ;;  %v10757_v24 = vpop.xlane.xlu1 %3635 }
 0x2e5   : > { %v4291_v60 = vld [vmem:[#allocation2 + $0x8] sm:$0x1]  ;;  %v3699_v20 = vsub.f32 %v3659_v34, %v10719_v55  ;;  %v3658_v2 = vmul.f32 0.125, %v10699_v63  ;;  %v3657_v23 = vmul.f32 0.125, %v3615_v59  ;;  %v3906_v42 = vsel %vm3866_vm15, %v3846_v31, %v3886_v27 }
 0x2e6   : > { %v4046_v1 = vrot.slane %v4044_v16, 7  ;;  %v4292_v5 = vsel %vm10727_vm14, 0, %v4291_v60  ;;  %v4260_v48 = vld [vmem:[#allocation2] sm:$0x1]  ;;  %v4036_v41 = vshrl.u32 %v8297_v30, 16  ;;  %v4039_v51 = vshll.u32 %v8297_v30, 16 }
 0x2e7   : > { %4293 = vst [vmem:[#allocation2 + $0x8] sm:$0x1] %v4292_v5  ;;  %v4261_v18 = vsel %vm10677_vm6, 0, %v4260_v48  ;;  %v8296_v55 = vpack.c.bf16 %v3906_v42, %v3906_v42  ;;  %vm3865_vm2 = vcmp.ge.f32.partialorder %v3845_v22, 0.0  ;;  %v3885_v59 = vmul.f32 0.01, %v3845_v22 }
 0x2e8   : > { %v4049_v33 = vor.u32 %v4047_v25, %v4046_v1  ;;  %v4051_v56 = vrot.slane %v4046_v1, 4  ;;  %4262 = vst [vmem:[#allocation2] sm:$0x1] %v4261_v18  ;;  %v4038_v63 = vrot.slane %v4036_v41, 7  ;;  %9313 = vrsqrt.f32 %v3740_v6  ;;  %v4208_v6 = vld [vmem:[#allocation2 + $0x20] sm:$0x1]  ;;  %v3630_v5 = vpop.xlane.xlu1 %3629 }
 0x2e9   : > { %v4027_v39 = vshrl.u32 %v8296_v55, 16  ;;  %v3677_v43 = vmul.f32 %v10741_v53, %v10741_v53  ;;  %v3719_v31 = vmax.f32 %v3699_v20, 0.0  ;;  %v3905_v12 = vsel %vm3865_vm2, %v3845_v22, %v3885_v59  ;;  %v3633_v20 = vpop.xlane.xlu0 %3632 }
 0x2ea   : > { %v4216_v52 = vsel %vm10677_vm6, %v4051_v56, %v4215_v10  ;;  %v4041_v3 = vor.u32 %v4039_v51, %v4038_v63  ;;  %v4042_v40 = vrot.slane %v4038_v63, 4  ;;  %v3698_v34 = vsub.f32 %v3658_v2, %v10738_v0 }
 0x2eb   : > { %4217 = vst [vmem:[#allocation2 + $0x2c] sm:$0x1] %v4216_v52  ;;  %v4029_v16 = vrot.slane %v4027_v39, 7  ;;  %v8295_v25 = vpack.c.bf16 %v3905_v12, %v3905_v12  ;;  %v3739_v19 = vadd.f32 1e-05, %v3719_v31  ;;  %v3697_v30 = vsub.f32 %v3657_v23, %v3677_v43 }
 0x2ec   : > { %v4050_v27 = vsel %vm10687_vm13, %v4042_v40, %v4049_v33  ;;  %v4212_v10 = vsel %vm10667_vm3, %v4041_v3, %v4211_v4  ;;  %v4030_v60 = vshll.u32 %v8296_v55, 16  ;;  %v3718_v1 = vmax.f32 %v3698_v34, 0.0  ;;  %v4204_v55 = vld [vmem:[#allocation2 + $0x18] sm:$0xf]  ;;  %v3547_v40 = vpop.xlane.xlu1 %3546 }
 0x2ed   : > { %4213 = vst [vmem:[#allocation2 + $0x24] sm:$0xf] %v4212_v10  ;;  %4214 = vst.msk [vmem:[#allocation2 + $0x28] sm:$0xf] %vm4184_vm9, %v4050_v27  ;;  %v4034_v22 = vrot.slane %v4029_v16, 4  ;;  %v4019_v0 = vshrl.u32 %v8295_v25, 16  ;;  %v3779_v2 = vsub.f32 %v10534_v15, %v10697_v47  ;;  %9315 = vrsqrt.f32 %v3739_v19 }
 0x2ee   : > { %v10774_v23 = vmul.f32 0.125, %v10711_v7  ;;  %v4032_v48 = vor.u32 %v4030_v60, %v4029_v16  ;;  %v3738_v41 = vadd.f32 1e-05, %v3718_v1  ;;  %v3717_v51 = vmax.f32 %v3697_v30, 0.0 }
 0x2ef   : > { %v4209_v42 = vsel %vm10677_vm6, %v4034_v22, %v4208_v6  ;;  %v4021_v18 = vrot.slane %v4019_v0, 7  ;;  %v4022_v33 = vshll.u32 %v8295_v25, 16  ;;  %v10779_v56 = vmul.f32 0.125, %v10743_v17 }
 0x2f0   : > { %4210 = vst [vmem:[#allocation2 + $0x20] sm:$0x1] %v4209_v42  ;;  %v3778_v63 = vsub.f32 %v10544_v46, %v10707_v44  ;;  %9317 = vrsqrt.f32 %v3738_v41  ;;  %v3737_v7 = vadd.f32 1e-05, %v3717_v51  ;;  %v10784_v59 = vmul.f32 0.125, %v10745_v54  ;;  %v3627_v54 = vpop.xlane.xlu0 %3626 }
 0x2f1   : > { %v4024_v4 = vor.u32 %v4022_v33, %v4021_v18  ;;  %v4025_v39 = vrot.slane %v4021_v18, 4  ;;  %v3777_v43 = vsub.f32 %v10551_v50, %v10741_v53  ;;  %v10788_v31 = vmul.f32 0.125, %v3526_v45 }
 0x2f2   : > { %v4300_v52 = vld [vmem:[#allocation2 + $0x2c] sm:$0x1]  ;;  %v9314_v17 = vpop.eup %9313  ;;  %9319 = vrsqrt.f32 %v3737_v7  ;;  %v3684_v46 = vmul.f32 %v10774_v23, %v10774_v23  ;;  %v3784_v44 = vsub.f32 %v10513_v26, %v10774_v23  ;;  %v3683_v16 = vmul.f32 %v10779_v56, %v10779_v56 }
 0x2f3   : > { %v4301_v3 = vsel %vm10727_vm14, 0, %v4300_v52  ;;  %v4033_v12 = vsel %vm10687_vm13, %v4025_v39, %v4032_v48  ;;  %v4205_v45 = vsel %vm10667_vm3, %v4024_v4, %v4204_v55  ;;  %v3800_v34 = vmul.f32 %v9314_v17, %v3780_v61  ;;  %v3541_v52 = vpop.xlane.xlu1 %3540 }
 0x2f4   : > { %4302 = vst [vmem:[#allocation2 + $0x2c] sm:$0x1] %v4301_v3  ;;  %v4269_v25 = vld [vmem:[#allocation2 + $0x24] sm:$0x1]  ;;  %4206 = vst [vmem:[#allocation2 + $0x18] sm:$0xf] %v4205_v45  ;;  %v3682_v19 = vmul.f32 %v10784_v59, %v10784_v59  ;;  %v3681_v49 = vmul.f32 %v10788_v31, %v10788_v31  ;;  %v3783_v60 = vsub.f32 %v10509_v13, %v10779_v56  ;;  %v3544_v7 = vpop.xlane.xlu0 %3543 }
 0x2f5   : > { %4207 = vst.msk [vmem:[#allocation2 + $0x1c] sm:$0xf] %vm4184_vm9, %v4033_v12  ;;  %v3664_v30 = vmul.f32 0.125, %v10757_v24  ;;  %v3663_v27 = vmul.f32 0.125, %v3633_v20  ;;  %v3662_v10 = vmul.f32 0.125, %v3630_v5  ;;  %v4270_v6 = vsel %vm10677_vm6, 0, %v4269_v25 }
 0x2f6   : > { %v3826_v21 = vmul.f32 %v10629_v35, %v3800_v34  ;;  %v3661_v61 = vmul.f32 0.125, %v3627_v54  ;;  %4271 = vst [vmem:[#allocation2 + $0x24] sm:$0x1] %v4270_v6  ;;  %v3782_v20 = vsub.f32 %v10518_v32, %v10784_v59  ;;  %v10819_v41 = vmul.f32 0.125, %v3547_v40 }
 0x2f7   : > { %v3704_v1 = vsub.f32 %v3664_v30, %v3684_v46  ;;  %v3703_v22 = vsub.f32 %v3663_v27, %v3683_v16  ;;  %v3702_v0 = vsub.f32 %v3662_v10, %v3682_v19  ;;  %v4297_v48 = vld [vmem:[#allocation2 + $0x20] sm:$0x1]  ;;  %v9316_v51 = vpop.eup %9315  ;;  %v3781_v46 = vsub.f32 %v10511_v8, %v10788_v31 }
 0x2f8   : > { %v3852_v24 = vadd.f32 %v10639_v14, %v3826_v21  ;;  %v3701_v5 = vsub.f32 %v3661_v61, %v3681_v49  ;;  %v4298_v42 = vsel %vm10727_vm14, 0, %v4297_v48  ;;  %v3799_v39 = vmul.f32 %v9316_v51, %v3779_v2  ;;  %v3538_v61 = vpop.xlane.xlu0 %3537 }
 0x2f9   : > { %v3724_v18 = vmax.f32 %v3704_v1, 0.0  ;;  %v3723_v33 = vmax.f32 %v3703_v22, 0.0  ;;  %v3722_v55 = vmax.f32 %v3702_v0, 0.0  ;;  %4299 = vst [vmem:[#allocation2 + $0x20] sm:$0x1] %v4298_v42  ;;  %v10829_v19 = vmul.f32 0.125, %v3544_v7  ;;  %v3642_v1 = vpop.xlane.xlu1 %3641 }
 0x2fa   : > { %vm3872_vm5 = vcmp.ge.f32.partialorder %v3852_v24, 0.0  ;;  %v3892_v4 = vmul.f32 0.01, %v3852_v24  ;;  %v3721_v17 = vmax.f32 %v3701_v5, 0.0  ;;  %v9318_v3 = vpop.eup %9317  ;;  %v3825_v16 = vmul.f32 %v10629_v35, %v3799_v39 }
 0x2fb   : > { %v3744_v54 = vadd.f32 1e-05, %v3724_v18  ;;  %v3743_v40 = vadd.f32 1e-05, %v3723_v33  ;;  %v3742_v12 = vadd.f32 1e-05, %v3722_v55  ;;  %v3798_v25 = vmul.f32 %v9318_v3, %v3778_v63 }
 0x2fc   : > { %v4266_v45 = vld [vmem:[#allocation2 + $0x18] sm:$0x1]  ;;  %v3912_v34 = vsel %vm3872_vm5, %v3852_v24, %v3892_v4  ;;  %v9320_v30 = vpop.eup %9319  ;;  %v3741_v2 = vadd.f32 1e-05, %v3721_v17  ;;  %v3851_v27 = vadd.f32 %v10639_v14, %v3825_v16  ;;  %v10840_v21 = vmul.f32 %v10819_v41, %v10819_v41 }
 0x2fd   : > { %v4267_v15 = vsel %vm10677_vm6, 0, %v4266_v45  ;;  %v8302_v47 = vpack.c.bf16 %v3912_v34, %v3912_v34  ;;  %9321 = vrsqrt.f32 %v3744_v54  ;;  %v3824_v10 = vmul.f32 %v10629_v35, %v3798_v25  ;;  %v3648_v45 = vpop.xlane.xlu1 %3647 }
 0x2fe   : > { %4268 = vst [vmem:[#allocation2 + $0x18] sm:$0x1] %v4267_v15  ;;  %v3797_v6 = vmul.f32 %v9320_v30, %v3777_v43  ;;  %9323 = vrsqrt.f32 %v3743_v40  ;;  %v10842_v49 = vmul.f32 0.125, %v3541_v52  ;;  %vm3871_vm11 = vcmp.ge.f32.partialorder %v3851_v27, 0.0  ;;  %v4229_v43 = vld [vmem:[#allocation2 + $0x44] sm:$0x1] }
 0x2ff   : > { %v4078_v63 = vshrl.u32 %v8302_v47, 16  ;;  %9325 = vrsqrt.f32 %v3742_v12  ;;  %v3891_v22 = vmul.f32 0.01, %v3851_v27  ;;  %v3850_v0 = vadd.f32 %v10639_v14, %v3824_v10  ;;  %v3639_v12 = vpop.xlane.xlu0 %3638 }
 0x300   : > { %v3823_v48 = vmul.f32 %v10629_v35, %v3797_v6  ;;  %v4081_v50 = vshll.u32 %v8302_v47, 16  ;;  %9327 = vrsqrt.f32 %v3741_v2  ;;  %v10848_v53 = vmul.f32 %v10829_v19, %v10829_v19 }
 0x301   : > { %v4080_v24 = vrot.slane %v4078_v63, 7  ;;  %v3911_v5 = vsel %vm3871_vm11, %v3851_v27, %v3891_v22  ;;  %vm3870_vm10 = vcmp.ge.f32.partialorder %v3850_v0, 0.0  ;;  %v3890_v51 = vmul.f32 0.01, %v3850_v0  ;;  %v4225_v63 = vld [vmem:[#allocation2 + $0x3c] sm:$0xf] }
 0x302   : > { %v3849_v42 = vadd.f32 %v10639_v14, %v3823_v48  ;;  %v8301_v33 = vpack.c.bf16 %v3911_v5, %v3911_v5  ;;  %v3686_v55 = vmul.f32 %v10842_v49, %v10842_v49  ;;  %v10853_v7 = vmul.f32 0.125, %v3538_v61 }
 0x303   : > { %v4085_v18 = vrot.slane %v4080_v24, 4  ;;  %v3910_v52 = vsel %vm3870_vm10, %v3850_v0, %v3890_v51  ;;  %v3666_v39 = vmul.f32 0.125, %v3642_v1  ;;  %v4083_v17 = vor.u32 %v4081_v50, %v4080_v24  ;;  %v4222_v51 = vld [vmem:[#allocation2 + $0x38] sm:$0x1] }
 0x304   : > { %vm3869_vm15 = vcmp.ge.f32.partialorder %v3849_v42, 0.0  ;;  %v3889_v4 = vmul.f32 0.01, %v3849_v42  ;;  %v4070_v54 = vshrl.u32 %v8301_v33, 16  ;;  %v8300_v40 = vpack.c.bf16 %v3910_v52, %v3910_v52 }
 0x305   : > { %v4230_v3 = vsel %vm10677_vm6, %v4085_v18, %v4229_v43  ;;  %v4073_v34 = vshll.u32 %v8301_v33, 16  ;;  %v3685_v25 = vmul.f32 %v10853_v7, %v10853_v7  ;;  %v3706_v30 = vsub.f32 %v3666_v39, %v3686_v55 }
 0x306   : > { %4231 = vst [vmem:[#allocation2 + $0x44] sm:$0x1] %v4230_v3  ;;  %v3909_v16 = vsel %vm3869_vm15, %v3849_v42, %v3889_v4  ;;  %v4072_v47 = vrot.slane %v4070_v54, 7  ;;  %v4061_v2 = vshrl.u32 %v8300_v40, 16  ;;  %v4064_v27 = vshll.u32 %v8300_v40, 16 }
 0x307   : > { %v9322_v15 = vpop.eup %9321  ;;  %v8299_v10 = vpack.c.bf16 %v3909_v16, %v3909_v16  ;;  %v3726_v1 = vmax.f32 %v3706_v30, 0.0  ;;  %v3665_v22 = vmul.f32 0.125, %v3639_v12  ;;  %v10862_v0 = vmul.f32 0.125, %v3648_v45 }
 0x308   : > { %v9324_v6 = vpop.eup %9323  ;;  %v3804_v61 = vmul.f32 %v9322_v15, %v3784_v44  ;;  %v4075_v24 = vor.u32 %v4073_v34, %v4072_v47  ;;  %v4076_v50 = vrot.slane %v4072_v47, 4  ;;  %v4063_v43 = vrot.slane %v4061_v2, 7 }
 0x309   : > { %v9326_v48 = vpop.eup %9325  ;;  %v4053_v5 = vshrl.u32 %v8299_v10, 16  ;;  %v4056_v42 = vshll.u32 %v8299_v10, 16  ;;  %v3803_v33 = vmul.f32 %v9324_v6, %v3783_v60  ;;  %v3746_v3 = vadd.f32 1e-05, %v3726_v1 }
 0x30a   : > { %v3830_v18 = vmul.f32 %v10629_v35, %v3804_v61  ;;  %v3802_v26 = vmul.f32 %v9326_v48, %v3782_v20  ;;  %v9328_v23 = vpop.eup %9327  ;;  %v4084_v44 = vsel %vm10687_vm13, %v4076_v50, %v4083_v17  ;;  %v4226_v55 = vsel %vm10667_vm3, %v4075_v24, %v4225_v63  ;;  %v4218_v20 = vld [vmem:[#allocation2 + $0x30] sm:$0xf] }
 0x30b   : > { %v4066_v52 = vor.u32 %v4064_v27, %v4063_v43  ;;  %v4068_v4 = vrot.slane %v4063_v43, 4  ;;  %4227 = vst [vmem:[#allocation2 + $0x3c] sm:$0xf] %v4226_v55  ;;  %4228 = vst.msk [vmem:[#allocation2 + $0x40] sm:$0xf] %vm4184_vm9, %v4084_v44  ;;  %v4055_v39 = vrot.slane %v4053_v5, 7  ;;  %v3829_v56 = vmul.f32 %v10629_v35, %v3803_v33 }
 0x30c   : > { %v3856_v13 = vadd.f32 %v10639_v14, %v3830_v18  ;;  %v3828_v32 = vmul.f32 %v10629_v35, %v3802_v26  ;;  %v3801_v17 = vmul.f32 %v9328_v23, %v3781_v46  ;;  %v3705_v54 = vsub.f32 %v3665_v22, %v3685_v25  ;;  %v3645_v25 = vpop.xlane.xlu0 %3644 }
 0x30d   : > { %v4306_v59 = vld [vmem:[#allocation2 + $0x44] sm:$0x1]  ;;  %v4223_v60 = vsel %vm10677_vm6, %v4068_v4, %v4222_v51  ;;  %v4058_v12 = vor.u32 %v4056_v42, %v4055_v39  ;;  %v4059_v45 = vrot.slane %v4055_v39, 4  ;;  %v3855_v16 = vadd.f32 %v10639_v14, %v3829_v56  ;;  %v4239_v56 = vld [vmem:[#allocation2 + $0x54] sm:$0xf] }
 0x30e   : > { %v4307_v40 = vsel %vm10727_vm14, 0, %v4306_v59  ;;  %4224 = vst [vmem:[#allocation2 + $0x38] sm:$0x1] %v4223_v60  ;;  %vm3876_vm2 = vcmp.ge.f32.partialorder %v3856_v13, 0.0  ;;  %v3896_v34 = vmul.f32 0.01, %v3856_v13  ;;  %v3854_v30 = vadd.f32 %v10639_v14, %v3828_v32 }
 0x30f   : > { %4308 = vst [vmem:[#allocation2 + $0x44] sm:$0x1] %v4307_v40  ;;  %v3827_v15 = vmul.f32 %v10629_v35, %v3801_v17  ;;  %v4067_v8 = vsel %vm10687_vm13, %v4059_v45, %v4066_v52  ;;  %v4219_v31 = vsel %vm10667_vm3, %v4058_v12, %v4218_v20  ;;  %9329 = vrsqrt.f32 %v3746_v3 }
 0x310   : > { %v3725_v46 = vmax.f32 %v3705_v54, 0.0  ;;  %4220 = vst [vmem:[#allocation2 + $0x30] sm:$0xf] %v4219_v31  ;;  %4221 = vst.msk [vmem:[#allocation2 + $0x34] sm:$0xf] %vm4184_vm9, %v4067_v8  ;;  %v3916_v47 = vsel %vm3876_vm2, %v3856_v13, %v3896_v34  ;;  %vm3875_vm5 = vcmp.ge.f32.partialorder %v3855_v16, 0.0  ;;  %v3786_v22 = vsub.f32 %v10553_v38, %v10842_v49 }
 0x311   : > { %v3895_v2 = vmul.f32 0.01, %v3855_v16  ;;  %vm3874_vm11 = vcmp.ge.f32.partialorder %v3854_v30, 0.0  ;;  %v8306_v27 = vpack.c.bf16 %v3916_v47, %v3916_v47  ;;  %v3894_v10 = vmul.f32 0.01, %v3854_v30 }
 0x312   : > { %v3853_v6 = vadd.f32 %v10639_v14, %v3827_v15  ;;  %v3745_v63 = vadd.f32 1e-05, %v3725_v46  ;;  %v4275_v61 = vld [vmem:[#allocation2 + $0x3c] sm:$0x1]  ;;  %v3708_v48 = vsub.f32 %v10862_v0, %v10840_v21  ;;  %v3667_v24 = vmul.f32 0.125, %v3645_v25 }
 0x313   : > { %v3915_v1 = vsel %vm3875_vm5, %v3855_v16, %v3895_v2  ;;  %v4276_v50 = vsel %vm10677_vm6, 0, %v4275_v61  ;;  %v4112_v43 = vshrl.u32 %v8306_v27, 16  ;;  %v4115_v5 = vshll.u32 %v8306_v27, 16  ;;  %v4243_v0 = vld [vmem:[#allocation2 + $0x5c] sm:$0x1] }
 0x314   : > { %v8305_v51 = vpack.c.bf16 %v3915_v1, %v3915_v1  ;;  %4277 = vst [vmem:[#allocation2 + $0x3c] sm:$0x1] %v4276_v50  ;;  %v3914_v18 = vsel %vm3874_vm11, %v3854_v30, %v3894_v10  ;;  %vm3873_vm10 = vcmp.ge.f32.partialorder %v3853_v6, 0.0  ;;  %v3893_v33 = vmul.f32 0.01, %v3853_v6 }
 0x315   : > { %v4303_v42 = vld [vmem:[#allocation2 + $0x38] sm:$0x1]  ;;  %9331 = vrsqrt.f32 %v3745_v63  ;;  %v4114_v49 = vrot.slane %v4112_v43, 7  ;;  %v8304_v23 = vpack.c.bf16 %v3914_v18, %v3914_v18  ;;  %v3728_v55 = vmax.f32 %v3708_v48, 0.0  ;;  %v4236_v31 = vld [vmem:[#allocation2 + $0x50] sm:$0x1] }
 0x316   : > { %v4304_v38 = vsel %vm10727_vm14, 0, %v4303_v42  ;;  %v4104_v26 = vshrl.u32 %v8305_v51, 16  ;;  %v4107_v21 = vshll.u32 %v8305_v51, 16  ;;  %v3913_v44 = vsel %vm3873_vm10, %v3853_v6, %v3893_v33  ;;  %v4232_v27 = vld [vmem:[#allocation2 + $0x48] sm:$0xf] }
 0x317   : > { %4305 = vst [vmem:[#allocation2 + $0x38] sm:$0x1] %v4304_v38  ;;  %v3707_v52 = vsub.f32 %v3667_v24, %v10848_v53  ;;  %v4272_v4 = vld [vmem:[#allocation2 + $0x30] sm:$0x1]  ;;  %v4117_v39 = vor.u32 %v4115_v5, %v4114_v49  ;;  %v4119_v13 = vrot.slane %v4114_v49, 4  ;;  %v8303_v59 = vpack.c.bf16 %v3913_v44, %v3913_v44 }
 0x318   : > { %v4106_v32 = vrot.slane %v4104_v26, 7  ;;  %v4273_v60 = vsel %vm10677_vm6, 0, %v4272_v4  ;;  %v4095_v20 = vshrl.u32 %v8304_v23, 16  ;;  %v4098_v17 = vshll.u32 %v8304_v23, 16 }
 0x319   : > { %v3748_v3 = vadd.f32 1e-05, %v3728_v55  ;;  %v9330_v54 = vpop.eup %9329  ;;  %4274 = vst [vmem:[#allocation2 + $0x30] sm:$0x1] %v4273_v60  ;;  %v4244_v40 = vsel %vm10677_vm6, %v4119_v13, %v4243_v0  ;;  %v4087_v53 = vshrl.u32 %v8303_v59, 16  ;;  %v4090_v16 = vshll.u32 %v8303_v59, 16 }
 0x31a   : > { %v4109_v12 = vor.u32 %v4107_v21, %v4106_v32  ;;  %v4110_v45 = vrot.slane %v4106_v32, 4  ;;  %4245 = vst [vmem:[#allocation2 + $0x5c] sm:$0x1] %v4244_v40  ;;  %v4097_v34 = vrot.slane %v4095_v20, 7  ;;  %v3806_v30 = vmul.f32 %v9330_v54, %v3786_v22 }
 0x31b   : > { %9333 = vrsqrt.f32 %v3748_v3  ;;  %v4089_v46 = vrot.slane %v4087_v53, 7  ;;  %v3727_v25 = vmax.f32 %v3707_v52, 0.0  ;;  %v3785_v61 = vsub.f32 %v10541_v58, %v10853_v7 }
 0x31c   : > { %v4118_v15 = vsel %vm10687_vm13, %v4110_v45, %v4117_v39  ;;  %v4240_v8 = vsel %vm10667_vm3, %v4109_v12, %v4239_v56  ;;  %v4100_v47 = vor.u32 %v4098_v17, %v4097_v34  ;;  %v4102_v2 = vrot.slane %v4097_v34, 4 }
 0x31d   : > { %4241 = vst [vmem:[#allocation2 + $0x54] sm:$0xf] %v4240_v8  ;;  %4242 = vst.msk [vmem:[#allocation2 + $0x58] sm:$0xf] %vm4184_vm9, %v4118_v15  ;;  %v3832_v10 = vmul.f32 %v10629_v35, %v3806_v30  ;;  %v4092_v6 = vor.u32 %v4090_v16, %v4089_v46  ;;  %v4093_v63 = vrot.slane %v4089_v46, 4  ;;  %v3788_v0 = vsub.f32 %v10546_v29, %v10819_v41 }
 0x31e   : > { %v3747_v1 = vadd.f32 1e-05, %v3727_v25  ;;  %v4237_v48 = vsel %vm10677_vm6, %v4102_v2, %v4236_v31  ;;  %v3787_v59 = vsub.f32 %v10539_v62, %v10829_v19  ;;  %v4250_v29 = vld [vmem:[#allocation2 + $0x68] sm:$0x1]  ;;  %v4246_v30 = vld [vmem:[#allocation2 + $0x60] sm:$0xf] }
 0x31f   : > { %v9332_v22 = vpop.eup %9331  ;;  %v3858_v24 = vadd.f32 %v10639_v14, %v3832_v10  ;;  %4238 = vst [vmem:[#allocation2 + $0x50] sm:$0x1] %v4237_v48  ;;  %v4101_v50 = vsel %vm10687_vm13, %v4093_v63, %v4100_v47  ;;  %v4233_v43 = vsel %vm10667_vm3, %v4092_v6, %v4232_v27  ;;  %v4257_v48 = vld [vmem:[#allocation2 + $0x74] sm:$0x1]  ;;  %v9435_v11 = vmov (!%p8067_p8), 0  }
 0x320   : > { %v3805_v5 = vmul.f32 %v9332_v22, %v3785_v61  ;;  %9335 = vrsqrt.f32 %v3747_v1  ;;  %4234 = vst [vmem:[#allocation2 + $0x48] sm:$0xf] %v4233_v43  ;;  %4235 = vst.msk [vmem:[#allocation2 + $0x4c] sm:$0xf] %vm4184_vm9, %v4101_v50 }
 0x321   : > { %vm3878_vm15 = vcmp.ge.f32.partialorder %v3858_v24, 0.0  ;;  %v3898_v58 = vmul.f32 0.01, %v3858_v24  ;;  %v4312_v7 = vld [vmem:[#allocation2 + $0x5c] sm:$0x1] }
 0x322   : > { %v3831_v51 = vmul.f32 %v10629_v35, %v3805_v5  ;;  %v4313_v42 = vsel %vm10727_vm14, 0, %v4312_v7  ;;  %4325 = vst.msk [vmem:[#allocation2] sm:$0xf] (!%p8067_p8), %vm4184_vm9, %v9435_v11  ;;  %4326 = vst.msk [vmem:[#allocation2 + $0x4] sm:$0xf] (!%p8067_p8), %vm4184_vm9, %v9435_v11 }
 0x323   : > { %v3918_v18 = vsel %vm3878_vm15, %v3858_v24, %v3898_v58  ;;  %4314 = vst [vmem:[#allocation2 + $0x5c] sm:$0x1] %v4313_v42  ;;  %4328 = vst.msk [vmem:[#allocation2 + $0x8] sm:$0x1] (!%p8067_p8), %vm4192_vm12, %v9435_v11 }
 0x324   : > { %v4281_v33 = vld [vmem:[#allocation2 + $0x54] sm:$0x1]  ;;  %v8308_v38 = vpack.c.bf16 %v3918_v18, %v3918_v18  ;;  %v3857_v49 = vadd.f32 %v10639_v14, %v3831_v51  ;;  %v4253_v18 = vld [vmem:[#allocation2 + $0x6c] sm:$0xf] }
 0x325   : > { %v9334_v26 = vpop.eup %9333  ;;  %v4282_v21 = vsel %vm10677_vm6, 0, %v4281_v33 }
 0x326   : > { %4283 = vst [vmem:[#allocation2 + $0x54] sm:$0x1] %v4282_v21  ;;  %v4129_v23 = vshrl.u32 %v8308_v38, 16  ;;  %vm3877_vm2 = vcmp.ge.f32.partialorder %v3857_v49, 0.0  ;;  %v3897_v44 = vmul.f32 0.01, %v3857_v49  ;;  %v3808_v52 = vmul.f32 %v9334_v26, %v3788_v0 }
 0x327   : > { %v4309_v55 = vld [vmem:[#allocation2 + $0x50] sm:$0x1]  ;;  %v4278_v39 = vld [vmem:[#allocation2 + $0x48] sm:$0x1]  ;;  %v4132_v17 = vshll.u32 %v8308_v38, 16 }
 0x328   : > { %v4310_v4 = vsel %vm10727_vm14, 0, %v4309_v55  ;;  %v4131_v13 = vrot.slane %v4129_v23, 7  ;;  %v3917_v56 = vsel %vm3877_vm2, %v3857_v49, %v3897_v44  ;;  %v4279_v32 = vsel %vm10677_vm6, 0, %v4278_v39 }
 0x329   : > { %4311 = vst [vmem:[#allocation2 + $0x50] sm:$0x1] %v4310_v4  ;;  %v8307_v41 = vpack.c.bf16 %v3917_v56, %v3917_v56  ;;  %v3834_v60 = vmul.f32 %v10629_v35, %v3808_v52  ;;  %4280 = vst [vmem:[#allocation2 + $0x48] sm:$0x1] %v4279_v32  ;;  %v9337_v35 = vld [vmem:[%s12051_s3] ss:$0 sm:$0xff] }
 0x32a   : > { %v9336_v20 = vpop.eup %9335  ;;  %v4136_v3 = vrot.slane %v4131_v13, 4  ;;  %v4134_v45 = vor.u32 %v4132_v17, %v4131_v13 }
 0x32b   : > { %v4121_v54 = vshrl.u32 %v8307_v41, 16  ;;  %v3860_v40 = vadd.f32 %v10639_v14, %v3834_v60  ;;  %v3807_v12 = vmul.f32 %v9336_v20, %v3787_v59  ;;  %v4124_v34 = vshll.u32 %v8307_v41, 16  ;;  %v9338_v14 = vld [vmem:[%s12052_s4] ss:$0 sm:$0xff] }
 0x32c   : > { %v4251_v53 = vsel %vm10677_vm6, %v4136_v3, %v4250_v29 }
 0x32d   : > { %4252 = vst [vmem:[#allocation2 + $0x68] sm:$0x1] %v4251_v53  ;;  %v4123_v16 = vrot.slane %v4121_v54, 7  ;;  %vm3880_vm5 = vcmp.ge.f32.partialorder %v3860_v40, 0.0  ;;  %v3900_v62 = vmul.f32 0.01, %v3860_v40  ;;  %v3833_v19 = vmul.f32 %v9337_v35, %v3807_v12 }
 0x32f   : > { %v4126_v15 = vor.u32 %v4124_v34, %v4123_v16  ;;  %v4127_v8 = vrot.slane %v4123_v16, 4  ;;  %v3920_v31 = vsel %vm3880_vm5, %v3860_v40, %v3900_v62  ;;  %v3859_v46 = vadd.f32 %v9338_v14, %v3833_v19 }
 0x330   : > { %v8310_v25 = vpack.c.bf16 %v3920_v31, %v3920_v31 }
 0x331   : > { %v4135_v47 = vsel %vm10687_vm13, %v4127_v8, %v4134_v45  ;;  %v4247_v2 = vsel %vm10667_vm3, %v4126_v15, %v4246_v30  ;;  %vm3879_vm11 = vcmp.ge.f32.partialorder %v3859_v46, 0.0  ;;  %v3899_v27 = vmul.f32 0.01, %v3859_v46 }
 0x332   : > { %4248 = vst [vmem:[#allocation2 + $0x60] sm:$0xf] %v4247_v2  ;;  %4249 = vst.msk [vmem:[#allocation2 + $0x64] sm:$0xf] %vm4184_vm9, %v4135_v47  ;;  %v4146_v10 = vshrl.u32 %v8310_v25, 16  ;;  %v4149_v24 = vshll.u32 %v8310_v25, 16 }
 0x333   : > { %v3919_v6 = vsel %vm3879_vm11, %v3859_v46, %v3899_v27 }
 0x334   : > { %v4315_v63 = vld [vmem:[#allocation2 + $0x68] sm:$0x1]  ;;  %v4148_v61 = vrot.slane %v4146_v10, 7  ;;  %v8309_v1 = vpack.c.bf16 %v3919_v6, %v3919_v6 }
 0x335   : > { %v4316_v22 = vsel %vm10727_vm14, 0, %v4315_v63 }
 0x336   : > { %4317 = vst [vmem:[#allocation2 + $0x68] sm:$0x1] %v4316_v22  ;;  %v4153_v50 = vrot.slane %v4148_v61, 4  ;;  %v4138_v43 = vshrl.u32 %v8309_v1, 16  ;;  %v4151_v5 = vor.u32 %v4149_v24, %v4148_v61  ;;  %v4141_v51 = vshll.u32 %v8309_v1, 16 }
 0x338   : > { %v4258_v58 = vsel %vm10677_vm6, %v4153_v50, %v4257_v48  ;;  %v4140_v7 = vrot.slane %v4138_v43, 7 }
 0x339   : > { %v4284_v42 = vld [vmem:[#allocation2 + $0x60] sm:$0x1]  ;;  %4259 = vst [vmem:[#allocation2 + $0x74] sm:$0x1] %v4258_v58 }
 0x33a   : > { %v4285_v33 = vsel %vm10677_vm6, 0, %v4284_v42  ;;  %v4143_v38 = vor.u32 %v4141_v51, %v4140_v7  ;;  %v4144_v49 = vrot.slane %v4140_v7, 4 }
 0x33b   : > { %4286 = vst [vmem:[#allocation2 + $0x60] sm:$0x1] %v4285_v33 }
 0x33c   : > { %v4152_v26 = vsel %vm10687_vm13, %v4144_v49, %v4151_v5  ;;  %v4254_v21 = vsel %vm10667_vm3, %v4143_v38, %v4253_v18 }
 0x33d   : > { %4255 = vst [vmem:[#allocation2 + $0x6c] sm:$0xf] %v4254_v21  ;;  %4256 = vst.msk [vmem:[#allocation2 + $0x70] sm:$0xf] %vm4184_vm9, %v4152_v26 }
 0x340   : > { %v4318_v0 = vld [vmem:[#allocation2 + $0x74] sm:$0x1]  ;;  %4324 = sbr.rel (%p8067_p8) target bundleno = 839 (0x347), region = 68 }
 0x341   : > { %v4319_v23 = vsel %vm10727_vm14, 0, %v4318_v0 }
 0x342   : > { %4320 = vst [vmem:[#allocation2 + $0x74] sm:$0x1] %v4319_v23 }
 0x344   : > { %v4287_v44 = vld [vmem:[#allocation2 + $0x6c] sm:$0x1] }
 0x345   : > { %v4288_v55 = vsel %vm10677_vm6, 0, %v4287_v44 }
 0x346   : > { %4289 = vst [vmem:[#allocation2 + $0x6c] sm:$0x1] %v4288_v55 }
 0x347 PF: > { %p8068_p9 = scmp.ne.s32.totalorder %s9417_s17, 1 }
 0x348   : > { %v9436_v57 = vmov (!%p8068_p9), 0  }
 0x349   : > { %4332 = sbr.rel (%p8068_p9) target bundleno = 848 (0x350), region = 72  ;;  %4334 = vst.msk [vmem:[#allocation2 + $0x6c] sm:$0xf] (!%p8068_p9), %vm4184_vm9, %v9436_v57  ;;  %4335 = vst.msk [vmem:[#allocation2 + $0x70] sm:$0xf] (!%p8068_p9), %vm4184_vm9, %v9436_v57 }
 0x34a   : > { %4337 = vst.msk [vmem:[#allocation2 + $0x74] sm:$0x1] (!%p8068_p9), %vm4192_vm12, %v9436_v57 }
 0x350 PF: > { %v4361_v36 = vld [vmem:[%s12053_s5] sm:$0xf]  ;;  %vm4426_vm3 = vcmask 1043456   ;;  %v9340_v4 = vld [vmem:[#allocation2 + $0xc] sm:$0xff]   ;;  %v8086_v39 = vld [vmem:[%s12053_s5 + $0x4] sm:$0xf] }
 0x351   : > { %v9339_v28 = vld [vmem:[#allocation2] sm:$0xff]   ;;  %9214 = vmatprep.subr.msk.bf16.mxu1 %vm4426_vm3, %v4361_v36  ;;  %v4428_v52 = vsel %vm4426_vm3, %v4361_v36, 0  ;;  %v4810_v13 = vsel %vm4426_vm3, %v8086_v39, 0  ;;  %v9341_v56 = vld [vmem:[#allocation2 + $0x18] sm:$0xff]   ;;  %v10992_v41 = vld [vmem:[#allocation2 + $0x8] sm:$0x1] }
 0x352   : > { %8699 = vmatpush3.bf16.msra.mxu1 %v4428_v52  ;;  %8700 = vmatprep.mubr.msk.bf16.mxu1 %vm3487_vm8, %v9339_v28  ;;  %v9342_v32 = vld [vmem:[#allocation2 + $0x24] sm:$0xff]   ;;  %v4543_v59 = vld [vmem:[#allocation2] sm:$0xf]  ;;  %v9343_v17 = vld [vmem:[#allocation2 + $0x30] sm:$0xff]   ;;  %v4587_v35 = vshll.u32 %v10992_v41, 16 }
 0x353   : > { %9215 = vmatprep.subr.msk.bf16.mxu1 %vm4426_vm3, %v8086_v39  ;;  %v10990_v29 = vld [vmem:[#allocation2 + $0x4] sm:$0xf]  ;;  %v4568_v60 = vshrl.u32 %v4543_v59, 16  ;;  %v4571_v20 = vshll.u32 %v4543_v59, 16  ;;  %v4546_v40 = vld [vmem:[#allocation2 + $0xc] sm:$0xf] }
 0x354   : > { %v4577_v3 = vshll.u32 %v10990_v29, 16  ;;  %v4581_v54 = vshrl.u32 %v10990_v29, 16  ;;  %v10996_v53 = vld [vmem:[#allocation2 + $0x10] sm:$0xf]  ;;  %v10998_v34 = vld [vmem:[#allocation2 + $0x14] sm:$0x1] }
 0x355   : > { %8701 = vmatmul.mubr.msk.bf16.vlgmr.msra.gmra.mrb[8].mxu1 %vm3487_vm8, %v9340_v4  ;;  %v4570_v12 = vrot.slane %v4568_v60, 4  ;;  %v4573_v45 = vrot.slane %v4571_v20, 5  ;;  %v4592_v19 = vshrl.u32 %v4546_v40, 16  ;;  %v11004_v30 = vld [vmem:[%s12053_s5 + $0x8] sm:$0xf]  ;;  %v4595_v8 = vshll.u32 %v4546_v40, 16 }
 0x356   : > { %8717 = vmatpush3.bf16.msra.mxu1 %v4810_v13  ;;  %8704 = vmatprep.mubr.msk.bf16.mxu1 %vm3487_vm8, %v9341_v56  ;;  %v4579_v16 = vrot.slane %v4577_v3, 5  ;;  %v4583_v62 = vrot.slane %v4581_v54, 4  ;;  %v4601_v31 = vshll.u32 %v10996_v53, 16  ;;  %v4605_v14 = vshrl.u32 %v10996_v53, 16  ;;  %v4549_v46 = vld [vmem:[#allocation2 + $0x18] sm:$0xf] }
 0x357   : > { %v4574_v15 = vor.u32 %v4573_v45, %v4570_v12  ;;  %9216 = vmatprep.subr.msk.bf16.mxu1 %vm4426_vm3, %v11004_v30  ;;  %v4594_v47 = vrot.slane %v4592_v19, 4  ;;  %v4611_v2 = vshll.u32 %v10998_v34, 16  ;;  %v11013_v27 = vld [vmem:[#allocation2 + $0x1c] sm:$0xf]  ;;  %v4597_v6 = vrot.slane %v4595_v8, 5  ;;  %v9345_v51 = vld [vmem:[#allocation2 + $0x48] sm:$0xff]  }
 0x358   : > { %v4584_v25 = vor.u32 %v4583_v62, %v4579_v16  ;;  %v11015_v63 = vrot.slane %v4601_v31, 5  ;;  %v4607_v61 = vrot.slane %v4605_v14, 4  ;;  %v4589_v1 = vrot.slane %v4587_v35, 5  ;;  %v9344_v24 = vld [vmem:[#allocation2 + $0x3c] sm:$0xff]   ;;  %v4552_v7 = vld [vmem:[#allocation2 + $0x24] sm:$0xf] }
 0x359   : > { %v4575_v10 = vrot.slane %v4574_v15, 4  ;;  %v4616_v22 = vshrl.u32 %v4549_v46, 16  ;;  %v4619_v48 = vshll.u32 %v4549_v46, 16  ;;  %v4598_v43 = vor.u32 %v4597_v6, %v4594_v47  ;;  %v11020_v38 = vld [vmem:[#allocation2 + $0x28] sm:$0xf] }
 0x35a   : > { %v4585_v50 = vrot.slane %v4584_v25, 4  ;;  %v4608_v5 = vor.u32 %v4607_v61, %v11015_v63  ;;  %v4625_v58 = vshll.u32 %v11013_v27, 16  ;;  %v4629_v33 = vshrl.u32 %v11013_v27, 16  ;;  %v11024_v21 = vld [vmem:[#allocation2 + $0x20] sm:$0x1] }
 0x35b   : > { %v4618_v42 = vrot.slane %v4616_v22, 4  ;;  %v4621_v18 = vrot.slane %v4619_v48, 5  ;;  %v4580_v49 = vsel %vm9600_vm4, %v4575_v10, %v4579_v16  ;;  %v4613_v26 = vrot.slane %v4611_v2, 5  ;;  %v4555_v4 = vld [vmem:[#allocation2 + $0x30] sm:$0xf] }
 0x35c   : > { %v11026_v0 = vrot.slane %v4625_v58, 5  ;;  %v4599_v23 = vrot.slane %v4598_v43, 4  ;;  %v4609_v44 = vrot.slane %v4608_v5, 4  ;;  %v4631_v55 = vrot.slane %v4629_v33, 4  ;;  %v11035_v56 = vld [vmem:[#allocation2 + $0x34] sm:$0xf] }
 0x35d   : > { %8705 = vmatmul.mubr.msk.bf16.gmra.mrb[12].mxu1 %vm3487_vm8, %v9342_v32  ;;  %v4640_v11 = vshrl.u32 %v4552_v7, 16  ;;  %v4590_v57 = vsel %vm9600_vm4, %v4585_v50, %v4589_v1  ;;  %v4622_v36 = vor.u32 %v4621_v18, %v4618_v42  ;;  %v4643_v28 = vshll.u32 %v4552_v7, 16  ;;  %v11045_v12 = vld [vmem:[#allocation2 + $0x2c] sm:$0x1]  ;;  %v11047_v45 = vld [vmem:[#allocation2 + $0x38] sm:$0x1] }
 0x35e   : > { %8708 = vmatprep.mubr.msk.bf16.mxu1 %vm3487_vm8, %v9343_v17  ;;  %v4649_v52 = vshll.u32 %v11020_v38, 16  ;;  %v4632_v39 = vor.u32 %v4631_v55, %v11026_v0  ;;  %v4635_v13 = vshll.u32 %v11024_v21, 16  ;;  %v4653_v20 = vshrl.u32 %v11020_v38, 16  ;;  %v9346_v17 = vld [vmem:[#allocation2 + $0x54] sm:$0xff]   ;;  %v4558_v8 = vld [vmem:[#allocation2 + $0x3c] sm:$0xf] }
 0x35f   : > { %v4642_v32 = vrot.slane %v4640_v11, 4  ;;  %v4645_v59 = vrot.slane %v4643_v28, 5  ;;  %v8087_v3 = vcombine.low %v4580_v49, %v4590_v57  ;;  %v4604_v54 = vsel %vm9600_vm4, %v4599_v23, %v11015_v63  ;;  %v11053_v63 = vld [vmem:[#allocation2 + $0x40] sm:$0xf]  ;;  %v11065_v42 = vld [vmem:[#allocation2 + $0x44] sm:$0x1] }
 0x360   : > { %v11037_v60 = vrot.slane %v4649_v52, 5  ;;  %v4614_v40 = vsel %vm9600_vm4, %v4609_v44, %v4613_v26  ;;  %v4664_v16 = vshrl.u32 %v4555_v4, 16  ;;  %v4623_v62 = vrot.slane %v4622_v36, 4  ;;  %v4561_v33 = vld [vmem:[#allocation2 + $0x48] sm:$0xf] }
 0x361   : > { %v4655_v35 = vrot.slane %v4653_v20, 4  ;;  %v4667_v19 = vshll.u32 %v4555_v4, 16  ;;  %v4673_v15 = vshll.u32 %v11035_v56, 16  ;;  %v4633_v31 = vrot.slane %v4632_v39, 4  ;;  %v11069_v44 = vld [vmem:[#allocation2 + $0x4c] sm:$0xf] }
 0x362   : > { %v4637_v14 = vrot.slane %v4635_v13, 5  ;;  %v4666_v46 = vrot.slane %v4664_v16, 4  ;;  %v4677_v25 = vshrl.u32 %v11035_v56, 16  ;;  %v4646_v47 = vor.u32 %v4645_v59, %v4642_v32  ;;  %v11071_v36 = vld [vmem:[#allocation2 + $0x50] sm:$0x1] }
 0x363   : > { %v4656_v2 = vor.u32 %v4655_v35, %v11037_v60  ;;  %v4659_v10 = vshll.u32 %v11045_v12, 16  ;;  %v4669_v6 = vrot.slane %v4667_v19, 5  ;;  %v4675_v61 = vrot.slane %v4673_v15, 5  ;;  %v4564_v13 = vld [vmem:[#allocation2 + $0x54] sm:$0xf] }
 0x364   : > { %v4679_v1 = vrot.slane %v4677_v25, 4  ;;  %v4683_v22 = vshll.u32 %v11047_v45, 16  ;;  %v4688_v48 = vshrl.u32 %v4558_v8, 16  ;;  %v5064_v50 = vsel %vm4426_vm3, %v11004_v30, 0  ;;  %v11073_v32 = vld [vmem:[#allocation2 + $0x58] sm:$0xf] }
 0x365   : > { %8709 = vmatmul.mubr.msk.bf16.gmra.mrb[16].mxu1 %vm3487_vm8, %v9344_v24  ;;  %v8088_v24 = vcombine.low %v4604_v54, %v4614_v40  ;;  %v4670_v43 = vor.u32 %v4669_v6, %v4666_v46  ;;  %v4691_v5 = vshll.u32 %v4558_v8, 16  ;;  %v4628_v58 = vsel %vm9600_vm4, %v4623_v62, %v11026_v0 }
 0x366   : > { %8712 = vmatprep.mubr.msk.bf16.mxu1 %vm3487_vm8, %v9345_v51  ;;  %v4638_v7 = vsel %vm9600_vm4, %v4633_v31, %v4637_v14  ;;  %v4680_v51 = vor.u32 %v4679_v1, %v4675_v61  ;;  %v4697_v18 = vshll.u32 %v11053_v63, 16  ;;  %v4647_v49 = vrot.slane %v4646_v47, 4 }
 0x367   : > { %v4657_v26 = vrot.slane %v4656_v2, 4  ;;  %v4661_v30 = vrot.slane %v4659_v10, 5  ;;  %v4701_v23 = vshrl.u32 %v11053_v63, 16  ;;  %v4671_v55 = vrot.slane %v4670_v43, 4 }
 0x368   : > { %v4685_v11 = vrot.slane %v4683_v22, 5  ;;  %v4690_v57 = vrot.slane %v4688_v48, 4  ;;  %v4693_v0 = vrot.slane %v4691_v5, 5  ;;  %v4681_v28 = vrot.slane %v4680_v51, 4 }
 0x369   : > { %v4699_v52 = vrot.slane %v4697_v18, 5  ;;  %v4703_v4 = vrot.slane %v4701_v23, 4  ;;  %v4712_v39 = vshrl.u32 %v4561_v33, 16  ;;  %v8089_v59 = vcombine.low %v4628_v58, %v4638_v7  ;;  %v11099_v58 = vld [vmem:[#allocation2 + $0x5c] sm:$0x1] }
 0x36a   : > { %v4715_v20 = vshll.u32 %v4561_v33, 16  ;;  %v4652_v54 = vsel %vm9600_vm4, %v4647_v49, %v11037_v60  ;;  %v4662_v40 = vsel %vm9600_vm4, %v4657_v26, %v4661_v30  ;;  %v4707_v16 = vshll.u32 %v11065_v42, 16 }
 0x36b   : > { %v4714_v62 = vrot.slane %v4712_v39, 4  ;;  %v4676_v35 = vsel %vm9600_vm4, %v4671_v55, %v4675_v61  ;;  %v4725_v8 = vshrl.u32 %v11069_v44, 16  ;;  %v4686_v31 = vsel %vm9600_vm4, %v4681_v28, %v4685_v11  ;;  %v4925_v39 = vld [vmem:[#allocation2] sm:$0xe] }
 0x36c   : > { %v4717_v19 = vrot.slane %v4715_v20, 5  ;;  %v4694_v14 = vor.u32 %v4693_v0, %v4690_v57  ;;  %v4704_v60 = vor.u32 %v4703_v4, %v4699_v52  ;;  %v4731_v46 = vshll.u32 %v11071_v36, 16 }
 0x36d   : > { %8713 = vmatmul.mubr.msk.bf16.gmra.mrb[20].mxu1 %vm3487_vm8, %v9346_v17  ;;  %v4721_v17 = vshll.u32 %v11069_v44, 16  ;;  %v4727_v25 = vrot.slane %v4725_v8, 4  ;;  %v4736_v47 = vshrl.u32 %v4564_v13, 16  ;;  %v4739_v2 = vshll.u32 %v4564_v13, 16  ;;  %v4926_v8 = vld [vmem:[#allocation2 + $0xc] sm:$0xe] }
 0x36e   : > { %8718 = vmatprep.mubr.msk.bf16.mxu1 %vm3487_vm8, %v8087_v3  ;;  %v11079_v3 = vld [vmem:[%s12053_s5 + $0xc] sm:$0xf]  ;;  %v4745_v10 = vshll.u32 %v11073_v32, 16  ;;  %v4718_v6 = vor.u32 %v4717_v19, %v4714_v62  ;;  %v4749_v61 = vshrl.u32 %v11073_v32, 16  ;;  %v8090_v1 = vcombine.low %v4652_v54, %v4662_v40 }
 0x36f   : > { %v4723_v15 = vrot.slane %v4721_v17, 5  ;;  %v4709_v22 = vrot.slane %v4707_v16, 5  ;;  %v4695_v43 = vrot.slane %v4694_v14, 4  ;;  %v4705_v5 = vrot.slane %v4704_v60, 4 }
 0x370   : > { %v4738_v7 = vrot.slane %v4736_v47, 4  ;;  %v4741_v51 = vrot.slane %v4739_v2, 5  ;;  %v4747_v18 = vrot.slane %v4745_v10, 5  ;;  %v4751_v33 = vrot.slane %v4749_v61, 4 }
 0x371   : > { %v4728_v48 = vor.u32 %v4727_v25, %v4723_v15  ;;  %v4719_v49 = vrot.slane %v4718_v6, 4  ;;  %v4700_v30 = vsel %vm9600_vm4, %v4695_v43, %v4699_v52  ;;  %v4710_v23 = vsel %vm9600_vm4, %v4705_v5, %v4709_v22  ;;  %v4928_v22 = vld [vmem:[#allocation2 + $0x24] sm:$0xe] }
 0x372   : > { %v4742_v55 = vor.u32 %v4741_v51, %v4738_v7  ;;  %v4752_v11 = vor.u32 %v4751_v33, %v4747_v18  ;;  %v4755_v57 = vshll.u32 %v11099_v58, 16  ;;  %v4959_v4 = vrot.slane %v10990_v29, 5 }
 0x373   : > { %v4729_v26 = vrot.slane %v4728_v48, 4  ;;  %v4724_v0 = vsel %vm9600_vm4, %v4719_v49, %v4723_v15  ;;  %v8092_v13 = vcombine.low %v4700_v30, %v4710_v23  ;;  %v8103_v54 = vrot.slane %v4925_v39, 9  ;;  %v4929_v48 = vld [vmem:[#allocation2 + $0x30] sm:$0xe]  ;;  %v4930_v30 = vld [vmem:[#allocation2 + $0x3c] sm:$0xe] }
 0x374   : > { %v4753_v20 = vrot.slane %v4752_v11, 4  ;;  %v4757_v17 = vrot.slane %v4755_v57, 5  ;;  %v4961_v40 = vrot.slane %v4959_v4, 4  ;;  %v4962_v16 = vrot.slane %v10992_v41, 5  ;;  %v8145_v49 = vld [vmem:[%s12053_s5 + $0x10] sm:$0xf] }
 0x375   : > { %8719 = vmatmul.mubr.msk.bf16.vlgmr.msra.gmra.mrb[8].mxu1 %vm3487_vm8, %v8088_v24  ;;  %v8091_v24 = vcombine.low %v4676_v35, %v4686_v31  ;;  %v4966_v35 = vrot.slane %v10996_v53, 5  ;;  %v4960_v19 = vsel %vm9738_vm7, %v8103_v54, %v4959_v4  ;;  %v4973_v41 = vrot.slane %v11013_v27, 5  ;;  %v4927_v31 = vld [vmem:[#allocation2 + $0x18] sm:$0xe] }
 0x376   : > { %8735 = vmatpush3.bf16.msra.mxu1 %v5064_v50  ;;  %8722 = vmatprep.mubr.msk.bf16.mxu1 %vm3487_vm8, %v8089_v59  ;;  %v4733_v50 = vrot.slane %v4731_v46, 5  ;;  %v4743_v59 = vrot.slane %v4742_v55, 4  ;;  %v4758_v29 = vsel %vm9600_vm4, %v4753_v20, %v4757_v17  ;;  %v4963_v15 = vsel %vm9738_vm7, %v4961_v40, %v4962_v16  ;;  %v4931_v55 = vld [vmem:[#allocation2 + $0x48] sm:$0xe]  ;;  %v4932_v17 = vld [vmem:[#allocation2 + $0x54] sm:$0xe] }
 0x377   : > { %9217 = vmatprep.subr.msk.bf16.mxu1 %vm4426_vm3, %v11079_v3  ;;  %v8112_v60 = vcombine.low %v4960_v19, %v4963_v15  ;;  %v8104_v46 = vrot.slane %v4926_v8, 9  ;;  %v4968_v25 = vrot.slane %v4966_v35, 4  ;;  %v4969_v47 = vrot.slane %v10998_v34, 5  ;;  %v9347_v19 = vld [vmem:[#allocation2 + $0xc] sm:$0xff]   ;;  %v9348_v8 = vld [vmem:[#allocation2 + $0x18] sm:$0xff]  }
 0x378   : > { %v4734_v28 = vsel %vm9600_vm4, %v4729_v26, %v4733_v50  ;;  %v4748_v62 = vsel %vm9600_vm4, %v4743_v59, %v4747_v18  ;;  %v8105_v2 = vrot.slane %v4927_v31, 9  ;;  %v4975_v10 = vrot.slane %v4973_v41, 4  ;;  %v5378_v15 = vld [vmem:[#allocation2 + $0xc] sm:$0xf] }
 0x379   : > { %v8093_v52 = vcombine.low %v4724_v0, %v4734_v28  ;;  %v8094_v14 = vcombine.low %v4748_v62, %v4758_v29  ;;  %v4976_v53 = vrot.slane %v11024_v21, 5  ;;  %v4967_v6 = vsel %vm9738_vm7, %v8104_v46, %v4966_v35  ;;  %v5381_v46 = vld [vmem:[#allocation2 + $0x18] sm:$0xf] }
 0x37a   : > { %v4970_v27 = vsel %vm9738_vm7, %v4968_v25, %v4969_v47  ;;  %v4980_v61 = vrot.slane %v11020_v38, 5  ;;  %v4987_v21 = vrot.slane %v11035_v56, 5  ;;  %v8106_v5 = vrot.slane %v4928_v22, 9  ;;  %v11185_v25 = vld [vmem:[#allocation2 + $0x1c] sm:$0xf]  ;;  %v9350_v22 = vld [vmem:[#allocation2 + $0x30] sm:$0xff]  }
 0x37b   : > { %v4977_v34 = vsel %vm9738_vm7, %v4975_v10, %v4976_v53  ;;  %v4983_v7 = vrot.slane %v11045_v12, 5  ;;  %v5263_v51 = vsel %vm4426_vm3, %v11079_v3, 0  ;;  %v8107_v38 = vrot.slane %v4929_v48, 9  ;;  %v11190_v47 = vld [vmem:[%s12053_s5 + $0x14] sm:$0xf] }
 0x37c   : > { %v4982_v50 = vrot.slane %v4980_v61, 4  ;;  %v4989_v18 = vrot.slane %v4987_v21, 4  ;;  %v4990_v33 = vrot.slane %v11047_v45, 5  ;;  %v4981_v56 = vsel %vm9738_vm7, %v8106_v5, %v4980_v61 }
 0x37d   : > { %8723 = vmatmul.mubr.msk.bf16.gmra.mrb[12].mxu1 %vm3487_vm8, %v8090_v1  ;;  %v4974_v1 = vsel %vm9738_vm7, %v8105_v2, %v4973_v41  ;;  %v4994_v3 = vrot.slane %v11053_v63, 5  ;;  %v4988_v45 = vsel %vm9738_vm7, %v8107_v38, %v4987_v21  ;;  %v5001_v23 = vrot.slane %v11069_v44, 5  ;;  %v9349_v41 = vld [vmem:[#allocation2 + $0x24] sm:$0xff]  }
 0x37e   : > { %8726 = vmatprep.mubr.msk.bf16.mxu1 %vm3487_vm8, %v8091_v24  ;;  %v8113_v24 = vcombine.low %v4967_v6, %v4970_v27  ;;  %v8114_v43 = vcombine.low %v4974_v1, %v4977_v34  ;;  %v4984_v12 = vsel %vm9738_vm7, %v4982_v50, %v4983_v7  ;;  %v4991_v26 = vsel %vm9738_vm7, %v4989_v18, %v4990_v33  ;;  %v5384_v50 = vld [vmem:[#allocation2 + $0x24] sm:$0xf]  ;;  %v11206_v33 = vld [vmem:[#allocation2 + $0x28] sm:$0xf] }
 0x37f   : > { %v8115_v11 = vcombine.low %v4981_v56, %v4984_v12  ;;  %v8116_v57 = vcombine.low %v4988_v45, %v4991_v26  ;;  %v8108_v0 = vrot.slane %v4930_v30, 9  ;;  %v4996_v28 = vrot.slane %v4994_v3, 4 }
 0x380   : > { %v4997_v4 = vrot.slane %v11065_v42, 5  ;;  %v8109_v39 = vrot.slane %v4931_v55, 9  ;;  %v5003_v63 = vrot.slane %v5001_v23, 4  ;;  %v5008_v59 = vrot.slane %v11073_v32, 5 }
 0x381   : > { %v4995_v44 = vsel %vm9738_vm7, %v8108_v0, %v4994_v3  ;;  %v8110_v40 = vrot.slane %v4932_v17, 9  ;;  %v5011_v62 = vrot.slane %v11099_v58, 5  ;;  %v11182_v58 = vld [vmem:[#allocation2 + $0x10] sm:$0xf]  ;;  %v5403_v31 = vshrl.u32 %v5378_v15, 16 }
 0x382   : > { %v5002_v20 = vsel %vm9738_vm7, %v8109_v39, %v5001_v23  ;;  %v5010_v16 = vrot.slane %v5008_v59, 4  ;;  %v5412_v2 = vshll.u32 %v11182_v58, 16  ;;  %v5416_v10 = vshrl.u32 %v11182_v58, 16  ;;  %v9352_v23 = vld [vmem:[#allocation2 + $0x48] sm:$0xff]  }
 0x383   : > { %v5009_v32 = vsel %vm9738_vm7, %v8110_v40, %v5008_v59  ;;  %v5405_v53 = vrot.slane %v5403_v31, 4  ;;  %v5427_v27 = vshrl.u32 %v5381_v46, 16  ;;  %v5430_v61 = vshll.u32 %v5381_v46, 16  ;;  %v11218_v39 = vld [vmem:[#allocation2 + $0x2c] sm:$0x1] }
 0x384   : > { %v5012_v29 = vsel %vm9738_vm7, %v5010_v16, %v5011_v62  ;;  %v5436_v1 = vshll.u32 %v11185_v25, 16  ;;  %v5440_v34 = vshrl.u32 %v11185_v25, 16  ;;  %v11200_v21 = vrot.slane %v5412_v2, 5  ;;  %v11224_v40 = vld [vmem:[#allocation2 + $0x40] sm:$0xf] }
 0x385   : > { %8727 = vmatmul.mubr.msk.bf16.gmra.mrb[16].mxu1 %vm3487_vm8, %v8092_v13  ;;  %v5004_v13 = vrot.slane %v11071_v36, 5  ;;  %v8119_v35 = vcombine.low %v5009_v32, %v5012_v29  ;;  %v5418_v48 = vrot.slane %v5416_v10, 4  ;;  %v5429_v7 = vrot.slane %v5427_v27, 4 }
 0x386   : > { %8730 = vmatprep.mubr.msk.bf16.mxu1 %vm3487_vm8, %v8093_v52  ;;  %v4998_v52 = vsel %vm9738_vm7, %v4996_v28, %v4997_v4  ;;  %v11204_v38 = vrot.slane %v5436_v1, 5  ;;  %v5442_v18 = vrot.slane %v5440_v34, 4  ;;  %v5451_v3 = vshrl.u32 %v5384_v50, 16  ;;  %v5387_v28 = vld [vmem:[#allocation2 + $0x30] sm:$0xf]  ;;  %v9353_v4 = vld [vmem:[#allocation2 + $0x54] sm:$0xff]  }
 0x387   : > { %v5005_v42 = vsel %vm9738_vm7, %v5003_v63, %v5004_v13  ;;  %v8117_v36 = vcombine.low %v4995_v44, %v4998_v52  ;;  %v5419_v56 = vor.u32 %v5418_v48, %v11200_v21  ;;  %v5454_v45 = vshll.u32 %v5384_v50, 16  ;;  %v11220_v63 = vld [vmem:[#allocation2 + $0x34] sm:$0xf] }
 0x388   : > { %v8118_v54 = vcombine.low %v5002_v20, %v5005_v42  ;;  %v5460_v26 = vshll.u32 %v11206_v33, 16  ;;  %v5464_v30 = vshrl.u32 %v11206_v33, 16  ;;  %v5453_v52 = vrot.slane %v5451_v3, 4  ;;  %v5390_v20 = vld [vmem:[#allocation2 + $0x3c] sm:$0xf] }
 0x389   : > { %v5420_v13 = vrot.slane %v5419_v56, 4  ;;  %v5456_v59 = vrot.slane %v5454_v45, 5  ;;  %v5470_v31 = vshll.u32 %v11218_v39, 16  ;;  %v11253_v45 = vld [vmem:[#allocation2 + $0x4c] sm:$0xf] }
 0x38a   : > { %v11222_v42 = vrot.slane %v5460_v26, 5  ;;  %v5466_v17 = vrot.slane %v5464_v30, 4 }
 0x38b   : > { %v5457_v46 = vor.u32 %v5456_v59, %v5453_v52  ;;  %v5472_v50 = vrot.slane %v5470_v31, 5 }
 0x38c   : > { %v5467_v2 = vor.u32 %v5466_v17, %v11222_v42 }
 0x38d   : > { %8731 = vmatmul.mubr.msk.bf16.gmra.mrb[20].mxu1 %vm3487_vm8, %v8094_v14  ;;  %v5406_v14 = vshll.u32 %v5378_v15, 16  ;;  %v5499_v15 = vshrl.u32 %v5390_v20, 16 }
 0x38e   : > { %8736 = vmatprep.mubr.msk.bf16.mxu1 %vm3487_vm8, %v8112_v60  ;;  %v5645_v60 = vsel %vm4426_vm3, %v8145_v49, 0  ;;  %v5468_v56 = vrot.slane %v5467_v2, 4 }
 0x38f   : > { %v5408_v6 = vrot.slane %v5406_v14, 5  ;;  %v5508_v14 = vshll.u32 %v11224_v40, 16 }
 0x390   : > { %v5473_v59 = vsel %vm9600_vm4, %v5468_v56, %v5472_v50 }
 0x391   : > { %v5409_v5 = vor.u32 %v5408_v6, %v5405_v53 }
 0x393   : > { %v5410_v55 = vrot.slane %v5409_v5, 4 }
 0x395   : > { %8737 = vmatmul.mubr.msk.bf16.vlgmr.msra.gmra.mrb[8].mxu1 %vm3487_vm8, %v8113_v24  ;;  %v9351_v24 = vld [vmem:[#allocation2 + $0x3c] sm:$0xff]   ;;  %v5415_v16 = vsel %vm9600_vm4, %v5410_v55, %v11200_v21  ;;  %v5501_v21 = vrot.slane %v5499_v15, 4 }
 0x396   : > { %8753 = vmatpush3.bf16.msra.mxu1 %v5263_v51  ;;  %8740 = vmatprep.mubr.msk.bf16.mxu1 %vm3487_vm8, %v8114_v43  ;;  %v11202_v43 = vld [vmem:[#allocation2 + $0x14] sm:$0x1]  ;;  %v5432_v51 = vrot.slane %v5430_v61, 5  ;;  %v11244_v61 = vld [vmem:[#allocation2 + $0x38] sm:$0x1] }
 0x397   : > { %9218 = vmatprep.subr.msk.bf16.mxu1 %vm4426_vm3, %v8145_v49  ;;  %v11208_v49 = vld [vmem:[#allocation2 + $0x20] sm:$0x1]  ;;  %v5422_v12 = vshll.u32 %v11202_v43, 16  ;;  %v5494_v3 = vshll.u32 %v11244_v61, 16 }
 0x398   : > { %v5446_v0 = vshll.u32 %v11208_v49, 16 }
 0x399   : > { %v5424_v44 = vrot.slane %v5422_v12, 5  ;;  %v5496_v17 = vrot.slane %v5494_v3, 5 }
 0x39a   : > { %v5448_v29 = vrot.slane %v5446_v0, 5  ;;  %v11257_v0 = vld [vmem:[#allocation2 + $0x58] sm:$0xf] }
 0x39d   : > { %8741 = vmatmul.mubr.msk.bf16.gmra.mrb[12].mxu1 %vm3487_vm8, %v8115_v11  ;;  %v5433_v11 = vor.u32 %v5432_v51, %v5429_v7  ;;  %v11250_v7 = vrot.slane %v5508_v14, 5  ;;  %v5899_v14 = vsel %vm4426_vm3, %v11190_v47, 0 }
 0x39e   : > { %8744 = vmatprep.mubr.msk.bf16.mxu1 %vm3487_vm8, %v8116_v57  ;;  %v5443_v57 = vor.u32 %v5442_v18, %v11204_v38  ;;  %v5393_v18 = vld [vmem:[#allocation2 + $0x48] sm:$0xf] }
 0x39f   : > { %v5434_v62 = vrot.slane %v5433_v11, 4  ;;  %v5523_v11 = vshrl.u32 %v5393_v18, 16 }
 0x3a0   : > { %v5444_v32 = vrot.slane %v5443_v57, 4  ;;  %v5396_v57 = vld [vmem:[#allocation2 + $0x54] sm:$0xf] }
 0x3a1   : > { %v5439_v6 = vsel %vm9600_vm4, %v5434_v62, %v11204_v38  ;;  %v5458_v38 = vrot.slane %v5457_v46, 4  ;;  %v5560_v62 = vshrl.u32 %v11257_v0, 16  ;;  %v5399_v46 = vld [vmem:[#allocation2 + $0x60] sm:$0xf] }
 0x3a2   : > { %v5449_v27 = vsel %vm9600_vm4, %v5444_v32, %v5448_v29 }
 0x3a3   : > { %v8147_v26 = vcombine.low %v5439_v6, %v5449_v27  ;;  %v5463_v52 = vsel %vm9600_vm4, %v5458_v38, %v11222_v42  ;;  %v5562_v6 = vrot.slane %v5560_v62, 4  ;;  %v11275_v27 = vld [vmem:[#allocation2 + $0x64] sm:$0xf]  ;;  %v5574_v38 = vshll.u32 %v5399_v46, 16 }
 0x3a4   : > { %v5580_v56 = vshll.u32 %v11275_v27, 16 }
 0x3a5   : > { %8745 = vmatmul.mubr.msk.bf16.gmra.mrb[16].mxu1 %vm3487_vm8, %v8117_v36  ;;  %v5475_v36 = vshrl.u32 %v5387_v28, 16 }
 0x3a6   : > { %8748 = vmatprep.mubr.msk.bf16.mxu1 %vm3487_vm8, %v8118_v54  ;;  %v5478_v54 = vshll.u32 %v5387_v28, 16 }
 0x3a7   : > { %v5477_v10 = vrot.slane %v5475_v36, 4  ;;  %v5547_v36 = vshrl.u32 %v5396_v57, 16 }
 0x3a8   : > { %v5480_v53 = vrot.slane %v5478_v54, 5  ;;  %v5550_v54 = vshll.u32 %v5396_v57, 16 }
 0x3a9   : > { %v5549_v2 = vrot.slane %v5547_v36, 4 }
 0x3aa   : > { %v5481_v12 = vor.u32 %v5480_v53, %v5477_v10  ;;  %v5552_v10 = vrot.slane %v5550_v54, 5 }
 0x3ac   : > { %v5553_v3 = vor.u32 %v5552_v10, %v5549_v2  ;;  %v5797_v10 = vrot.slane %v11202_v43, 5  ;;  %v5808_v43 = vrot.slane %v11206_v33, 5 }
 0x3ad   : > { %8749 = vmatmul.mubr.msk.bf16.gmra.mrb[20].mxu1 %vm3487_vm8, %v8119_v35  ;;  %v5484_v35 = vshll.u32 %v11220_v63, 16 }
 0x3ae   : > { %8754 = vmatprep.mubr.msk.bf16.mxu1 %vm3487_vm8, %v9347_v19  ;;  %v5488_v19 = vshrl.u32 %v11220_v63, 16 }
 0x3af   : > { %v11246_v1 = vrot.slane %v5484_v35, 5 }
 0x3b0   : > { %v5490_v34 = vrot.slane %v5488_v19, 4  ;;  %v5525_v19 = vrot.slane %v5523_v11, 4 }
 0x3b2   : > { %v5491_v30 = vor.u32 %v5490_v34, %v11246_v1 }
 0x3b4   : > { %v5492_v32 = vrot.slane %v5491_v30, 4 }
 0x3b5   : > { %8755 = vmatmul.mubr.msk.bf16.vlgmr.msra.gmra.mrb[8].mxu1 %vm3487_vm8, %v9348_v8  ;;  %v5502_v8 = vshll.u32 %v5390_v20, 16  ;;  %v5482_v20 = vrot.slane %v5481_v12, 4  ;;  %v5584_v12 = vshrl.u32 %v11275_v27, 16 }
 0x3b6   : > { %8771 = vmatpush3.bf16.msra.mxu1 %v5645_v60  ;;  %8758 = vmatprep.mubr.msk.bf16.mxu1 %vm3487_vm8, %v9349_v41  ;;  %v5425_v41 = vsel %vm9600_vm4, %v5420_v13, %v5424_v44  ;;  %v5512_v60 = vshrl.u32 %v11224_v40, 16  ;;  %v5532_v13 = vshll.u32 %v11253_v45, 16  ;;  %v5536_v44 = vshrl.u32 %v11253_v45, 16 }
 0x3b7   : > { %9219 = vmatprep.subr.msk.bf16.mxu1 %vm4426_vm3, %v11190_v47  ;;  %v5504_v48 = vrot.slane %v5502_v8, 5  ;;  %v8146_v5 = vcombine.low %v5415_v16, %v5425_v41  ;;  %v5556_v16 = vshll.u32 %v11257_v0, 16  ;;  %v11271_v8 = vld [vmem:[#allocation2 + $0x50] sm:$0x1]  ;;  %v5487_v34 = vsel %vm9600_vm4, %v5482_v20, %v11246_v1  ;;  %v11288_v47 = vld [vmem:[%s12053_s5 + $0x18] sm:$0xf] }
 0x3b8   : > { %v5514_v51 = vrot.slane %v5512_v60, 4  ;;  %v5534_v42 = vrot.slane %v5532_v13, 5  ;;  %v5538_v31 = vrot.slane %v5536_v44, 4  ;;  %v8148_v60 = vcombine.low %v5463_v52, %v5473_v59 }
 0x3b9   : > { %v5558_v53 = vrot.slane %v5556_v16, 5  ;;  %v5582_v13 = vrot.slane %v5580_v56, 5  ;;  %v5586_v44 = vrot.slane %v5584_v12, 4  ;;  %v5554_v52 = vrot.slane %v5553_v3, 4 }
 0x3ba   : > { %v5515_v28 = vor.u32 %v5514_v51, %v11250_v7  ;;  %v5539_v51 = vor.u32 %v5538_v31, %v5534_v42  ;;  %v5810_v12 = vrot.slane %v5808_v43, 4 }
 0x3bb   : > { %v5587_v62 = vor.u32 %v5586_v44, %v5582_v13 }
 0x3bc   : > { %v5516_v15 = vrot.slane %v5515_v28, 4  ;;  %v5540_v11 = vrot.slane %v5539_v51, 4 }
 0x3bd   : > { %8759 = vmatmul.mubr.msk.bf16.gmra.mrb[12].mxu1 %vm3487_vm8, %v9350_v22  ;;  %v11248_v22 = vld [vmem:[#allocation2 + $0x44] sm:$0x1] }
 0x3be   : > { %8762 = vmatprep.mubr.msk.bf16.mxu1 %vm3487_vm8, %v9351_v24  ;;  %v9354_v24 = vld [vmem:[#allocation2 + $0x60] sm:$0xff]   ;;  %v5518_v55 = vshll.u32 %v11248_v22, 16 }
 0x3c0   : > { %v5520_v35 = vrot.slane %v5518_v55, 5 }
 0x3c2   : > { %v5521_v1 = vsel %vm9600_vm4, %v5516_v15, %v5520_v35  ;;  %v5760_v15 = vld [vmem:[#allocation2 + $0xc] sm:$0xe] }
 0x3c5   : > { %8763 = vmatmul.mubr.msk.bf16.gmra.mrb[16].mxu1 %vm3487_vm8, %v9352_v23  ;;  %v5505_v23 = vor.u32 %v5504_v48, %v5501_v21  ;;  %v5497_v21 = vsel %vm9600_vm4, %v5492_v32, %v5496_v17  ;;  %v5542_v48 = vshll.u32 %v11271_v8, 16  ;;  %v11302_v17 = vld [vmem:[#allocation2 + $0x68] sm:$0x1] }
 0x3c6   : > { %8766 = vmatprep.mubr.msk.bf16.mxu1 %vm3487_vm8, %v9353_v4  ;;  %v5526_v4 = vshll.u32 %v5393_v18, 16  ;;  %v5571_v18 = vshrl.u32 %v5399_v46, 16  ;;  %v5590_v32 = vshll.u32 %v11302_v17, 16  ;;  %v8162_v46 = vrot.slane %v5760_v15, 9 }
 0x3c7   : > { %v5506_v29 = vrot.slane %v5505_v23, 4  ;;  %v5544_v57 = vrot.slane %v5542_v48, 5  ;;  %v5761_v48 = vld [vmem:[#allocation2 + $0x18] sm:$0xe] }
 0x3c8   : > { %v5528_v41 = vrot.slane %v5526_v4, 5  ;;  %v5573_v28 = vrot.slane %v5571_v18, 4  ;;  %v5576_v4 = vrot.slane %v5574_v38, 5  ;;  %v8163_v51 = vrot.slane %v5761_v48, 9  ;;  %v9356_v48 = vld [vmem:[#allocation2 + $0x24] sm:$0xff]  }
 0x3c9   : > { %v5545_v54 = vsel %vm9600_vm4, %v5540_v11, %v5544_v57  ;;  %v5804_v38 = vrot.slane %v11208_v49, 5 }
 0x3ca   : > { %v5529_v50 = vor.u32 %v5528_v41, %v5525_v19  ;;  %v5577_v16 = vor.u32 %v5576_v4, %v5573_v28  ;;  %v5794_v19 = vrot.slane %v11182_v58, 5  ;;  %v5818_v4 = vrot.slane %v11244_v61, 5 }
 0x3cc   : > { %v5530_v55 = vrot.slane %v5529_v50, 4  ;;  %v5578_v31 = vrot.slane %v5577_v16, 4  ;;  %v5796_v2 = vrot.slane %v5794_v19, 4  ;;  %v5766_v16 = vld [vmem:[#allocation2 + $0x54] sm:$0xe] }
 0x3cd   : > { %8767 = vmatmul.mubr.msk.bf16.gmra.mrb[20].mxu1 %vm3487_vm8, %v9354_v24  ;;  %v11283_v24 = vld [vmem:[#allocation2 + $0x5c] sm:$0x1]  ;;  %v8168_v15 = vrot.slane %v5766_v16, 9 }
 0x3ce   : > { %8772 = vmatprep.mubr.msk.bf16.mxu1 %vm3487_vm8, %v8146_v5  ;;  %v5511_v5 = vsel %vm9600_vm4, %v5506_v29, %v11250_v7  ;;  %v5566_v30 = vshll.u32 %v11283_v24, 16  ;;  %v8149_v7 = vcombine.low %v5487_v34, %v5497_v21  ;;  %v5535_v36 = vsel %vm9600_vm4, %v5530_v55, %v5534_v42 }
 0x3cf   : > { %v8150_v23 = vcombine.low %v5511_v5, %v5521_v1  ;;  %v5559_v29 = vsel %vm9600_vm4, %v5554_v52, %v5558_v53  ;;  %v8151_v41 = vcombine.low %v5535_v36, %v5545_v54  ;;  %v5795_v34 = vsel %vm9738_vm7, %v8162_v46, %v5794_v19  ;;  %v5762_v5 = vld [vmem:[#allocation2 + $0x24] sm:$0xe]  ;;  %v5765_v36 = vld [vmem:[#allocation2 + $0x48] sm:$0xe] }
 0x3d0   : > { %v5568_v20 = vrot.slane %v5566_v30, 5  ;;  %v5798_v21 = vsel %vm9738_vm7, %v5796_v2, %v5797_v10  ;;  %v8164_v56 = vrot.slane %v5762_v5, 9  ;;  %v5825_v52 = vrot.slane %v11248_v22, 5 }
 0x3d1   : > { %v8171_v50 = vcombine.low %v5795_v34, %v5798_v21  ;;  %v5836_v54 = vrot.slane %v11257_v0, 5  ;;  %v5832_v19 = vrot.slane %v11271_v8, 5  ;;  %v9355_v34 = vld [vmem:[#allocation2 + $0x18] sm:$0xff]  }
 0x3d2   : > { %v5809_v30 = vsel %vm9738_vm7, %v8164_v56, %v5808_v43  ;;  %v6213_v21 = vld [vmem:[#allocation2 + $0x18] sm:$0xf]  ;;  %v9357_v43 = vld [vmem:[#allocation2 + $0x30] sm:$0xff]  }
 0x3d3   : > { %v6238_v5 = vshrl.u32 %v6213_v21, 16 }
 0x3d5   : > { %8773 = vmatmul.mubr.msk.bf16.vlgmr.msra.gmra.mrb[8].mxu1 %vm3487_vm8, %v8147_v26  ;;  %v5563_v26 = vor.u32 %v5562_v6, %v5558_v53  ;;  %v5583_v53 = vsel %vm9600_vm4, %v5578_v31, %v5582_v13  ;;  %v5801_v6 = vrot.slane %v11185_v25, 5  ;;  %v5811_v25 = vrot.slane %v11218_v39, 5 }
 0x3d6   : > { %8789 = vmatpush3.bf16.msra.mxu1 %v5899_v14  ;;  %8776 = vmatprep.mubr.msk.bf16.mxu1 %vm3487_vm8, %v8148_v60  ;;  %v5588_v14 = vrot.slane %v5587_v62, 4  ;;  %v5592_v60 = vrot.slane %v5590_v32, 5  ;;  %v5822_v39 = vrot.slane %v11224_v40, 5  ;;  %v6098_v13 = vsel %vm4426_vm3, %v11288_v47, 0 }
 0x3d7   : > { %9220 = vmatprep.subr.msk.bf16.mxu1 %vm4426_vm3, %v11288_v47  ;;  %v5564_v59 = vrot.slane %v5563_v26, 4  ;;  %v5803_v18 = vrot.slane %v5801_v6, 4  ;;  %v5802_v3 = vsel %vm9738_vm7, %v8163_v51, %v5801_v6  ;;  %v5815_v26 = vrot.slane %v11220_v63, 5  ;;  %v6216_v51 = vld [vmem:[#allocation2 + $0x24] sm:$0xf] }
 0x3d8   : > { %v5593_v58 = vsel %vm9600_vm4, %v5588_v14, %v5592_v60  ;;  %v5812_v49 = vsel %vm9738_vm7, %v5810_v12, %v5811_v25  ;;  %v5824_v44 = vrot.slane %v5822_v39, 4  ;;  %v5829_v47 = vrot.slane %v11253_v45, 5  ;;  %v5767_v60 = vld [vmem:[#allocation2 + $0x60] sm:$0xe] }
 0x3d9   : > { %v5569_v35 = vsel %vm9600_vm4, %v5564_v59, %v5568_v20  ;;  %v8153_v1 = vcombine.low %v5583_v53, %v5593_v58  ;;  %v5805_v33 = vsel %vm9738_vm7, %v5803_v18, %v5804_v38  ;;  %v8173_v11 = vcombine.low %v5809_v30, %v5812_v49  ;;  %v8204_v59 = vld [vmem:[%s12053_s5 + $0x1c] sm:$0xf]  ;;  %v11388_v18 = vld [vmem:[#allocation2 + $0x28] sm:$0xf]  ;;  %v11393_v38 = vld [vmem:[%s12053_s5 + $0x20] sm:$0xf] }
 0x3da   : > { %v8152_v42 = vcombine.low %v5559_v29, %v5569_v35  ;;  %v8172_v55 = vcombine.low %v5802_v3, %v5805_v33  ;;  %v5817_v28 = vrot.slane %v5815_v26, 4  ;;  %v5826_v20 = vsel %vm9738_vm7, %v5824_v44, %v5825_v52  ;;  %v11409_v52 = vld [vmem:[#allocation2 + $0x34] sm:$0xf] }
 0x3db   : > { %v8167_v29 = vrot.slane %v5765_v36, 9  ;;  %v5831_v35 = vrot.slane %v5829_v47, 4  ;;  %v5838_v45 = vrot.slane %v5836_v54, 4  ;;  %v5843_v31 = vrot.slane %v11275_v27, 5 }
 0x3dc   : > { %v5819_v61 = vsel %vm9738_vm7, %v5817_v28, %v5818_v4  ;;  %v5837_v14 = vsel %vm9738_vm7, %v8168_v15, %v5836_v54  ;;  %v8169_v2 = vrot.slane %v5767_v60, 9  ;;  %v5846_v53 = vrot.slane %v11302_v17, 5  ;;  %v11385_v17 = vld [vmem:[#allocation2 + $0x1c] sm:$0xf]  ;;  %v6219_v28 = vld [vmem:[#allocation2 + $0x30] sm:$0xf] }
 0x3dd   : > { %8777 = vmatmul.mubr.msk.bf16.gmra.mrb[12].mxu1 %vm3487_vm8, %v8149_v7  ;;  %v5763_v7 = vld [vmem:[#allocation2 + $0x30] sm:$0xe]  ;;  %v5830_v0 = vsel %vm9738_vm7, %v8167_v29, %v5829_v47  ;;  %v5845_v10 = vrot.slane %v5843_v31, 4  ;;  %v6247_v56 = vshll.u32 %v11385_v17, 16  ;;  %v6251_v12 = vshrl.u32 %v11385_v17, 16  ;;  %v9360_v54 = vld [vmem:[#allocation2 + $0x54] sm:$0xff]  }
 0x3de   : > { %8780 = vmatprep.mubr.msk.bf16.mxu1 %vm3487_vm8, %v8150_v23  ;;  %v5764_v23 = vld [vmem:[#allocation2 + $0x3c] sm:$0xe]  ;;  %v8165_v57 = vrot.slane %v5763_v7, 9  ;;  %v5844_v27 = vsel %vm9738_vm7, %v8169_v2, %v5843_v31  ;;  %v6240_v25 = vrot.slane %v6238_v5, 4  ;;  %v6262_v3 = vshrl.u32 %v6216_v51, 16 }
 0x3df   : > { %v8166_v63 = vrot.slane %v5764_v23, 9  ;;  %v5847_v58 = vsel %vm9738_vm7, %v5845_v10, %v5846_v53  ;;  %v6271_v30 = vshll.u32 %v11388_v18, 16  ;;  %v6275_v49 = vshrl.u32 %v11388_v18, 16  ;;  %v9358_v7 = vld [vmem:[#allocation2 + $0x3c] sm:$0xff]   ;;  %v11421_v15 = vld [vmem:[#allocation2 + $0x38] sm:$0x1] }
 0x3e0   : > { %v5816_v40 = vsel %vm9738_vm7, %v8165_v57, %v5815_v26  ;;  %v8178_v6 = vcombine.low %v5844_v27, %v5847_v58  ;;  %v6265_v26 = vshll.u32 %v6216_v51, 16  ;;  %v6253_v23 = vrot.slane %v6251_v12, 4  ;;  %v11427_v2 = vld [vmem:[#allocation2 + $0x4c] sm:$0xf] }
 0x3e1   : > { %v5823_v22 = vsel %vm9738_vm7, %v8166_v63, %v5822_v39  ;;  %v8174_v62 = vcombine.low %v5816_v40, %v5819_v61  ;;  %v11403_v39 = vrot.slane %v6247_v56, 5  ;;  %v6264_v57 = vrot.slane %v6262_v3, 4 }
 0x3e2   : > { %v8175_v32 = vcombine.low %v5823_v22, %v5826_v20  ;;  %v11407_v63 = vrot.slane %v6271_v30, 5  ;;  %v6277_v44 = vrot.slane %v6275_v49, 4  ;;  %v6286_v47 = vshrl.u32 %v6219_v28, 16 }
 0x3e3   : > { %v6254_v40 = vor.u32 %v6253_v23, %v11403_v39  ;;  %v6289_v22 = vshll.u32 %v6219_v28, 16  ;;  %v6295_v20 = vshll.u32 %v11409_v52, 16  ;;  %v6299_v36 = vshrl.u32 %v11409_v52, 16  ;;  %v6228_v23 = vld [vmem:[#allocation2 + $0x54] sm:$0xf] }
 0x3e4   : > { %v6305_v5 = vshll.u32 %v11421_v15, 16 }
 0x3e5   : > { %8781 = vmatmul.mubr.msk.bf16.gmra.mrb[16].mxu1 %vm3487_vm8, %v8151_v41  ;;  %v5839_v41 = vrot.slane %v11283_v24, 5  ;;  %v6291_v31 = vrot.slane %v6289_v22, 5  ;;  %v6301_v60 = vrot.slane %v6299_v36, 4  ;;  %v11456_v22 = vld [vmem:[#allocation2 + $0x58] sm:$0xf] }
 0x3e6   : > { %8784 = vmatprep.mubr.msk.bf16.mxu1 %vm3487_vm8, %v8152_v42  ;;  %v5833_v42 = vsel %vm9738_vm7, %v5831_v35, %v5832_v19  ;;  %v6222_v35 = vld [vmem:[#allocation2 + $0x3c] sm:$0xf]  ;;  %v9361_v19 = vld [vmem:[#allocation2 + $0x60] sm:$0xff]   ;;  %v6307_v28 = vrot.slane %v6305_v5, 5 }
 0x3e7   : > { %v5840_v8 = vsel %vm9738_vm7, %v5838_v45, %v5839_v41  ;;  %v8176_v24 = vcombine.low %v5830_v0, %v5833_v42  ;;  %v11423_v45 = vld [vmem:[#allocation2 + $0x40] sm:$0xf]  ;;  %v6255_v41 = vrot.slane %v6254_v40, 4  ;;  %v6288_v42 = vrot.slane %v6286_v47, 4 }
 0x3e8   : > { %v8177_v46 = vcombine.low %v5837_v14, %v5840_v8  ;;  %v6225_v14 = vld [vmem:[#allocation2 + $0x48] sm:$0xf]  ;;  %v11425_v8 = vrot.slane %v6295_v20, 5 }
 0x3e9   : > { %v6292_v51 = vor.u32 %v6291_v31, %v6288_v42 }
 0x3ea   : > { %v6302_v56 = vor.u32 %v6301_v60, %v11425_v8 }
 0x3ec   : > { %v6303_v40 = vrot.slane %v6302_v56, 4 }
 0x3ed   : > { %8785 = vmatmul.mubr.msk.bf16.gmra.mrb[20].mxu1 %vm3487_vm8, %v8153_v1  ;;  %v6480_v1 = vsel %vm4426_vm3, %v8204_v59, 0 }
 0x3ee   : > { %8790 = vmatprep.mubr.msk.bf16.mxu1 %vm3487_vm8, %v8171_v50  ;;  %v6241_v50 = vshll.u32 %v6213_v21, 16  ;;  %v6334_v21 = vshrl.u32 %v6225_v14, 16  ;;  %v6308_v31 = vsel %vm9600_vm4, %v6303_v40, %v6307_v28 }
 0x3f0   : > { %v6243_v33 = vrot.slane %v6241_v50, 5  ;;  %v6347_v50 = vshrl.u32 %v11427_v2, 16 }
 0x3f2   : > { %v6244_v4 = vor.u32 %v6243_v33, %v6240_v25 }
 0x3f4   : > { %v6245_v16 = vrot.slane %v6244_v4, 4  ;;  %v11451_v4 = vld [vmem:[#allocation2 + $0x50] sm:$0x1] }
 0x3f5   : > { %8791 = vmatmul.mubr.msk.bf16.vlgmr.msra.gmra.mrb[8].mxu1 %vm3487_vm8, %v8172_v55  ;;  %v9359_v55 = vld [vmem:[#allocation2 + $0x48] sm:$0xff]  }
 0x3f6   : > { %8807 = vmatpush3.bf16.msra.mxu1 %v6098_v13  ;;  %8794 = vmatprep.mubr.msk.bf16.mxu1 %vm3487_vm8, %v8173_v11  ;;  %v11405_v11 = vld [vmem:[#allocation2 + $0x20] sm:$0x1]  ;;  %v6267_v13 = vrot.slane %v6265_v26, 5  ;;  %v6250_v10 = vsel %vm9600_vm4, %v6245_v16, %v11403_v39  ;;  %v11447_v26 = vld [vmem:[#allocation2 + $0x44] sm:$0x1]  ;;  %v6353_v16 = vshll.u32 %v11451_v4, 16 }
 0x3f7   : > { %9221 = vmatprep.subr.msk.bf16.mxu1 %vm4426_vm3, %v8204_v59  ;;  %v11411_v59 = vld [vmem:[#allocation2 + $0x2c] sm:$0x1]  ;;  %v6257_v61 = vshll.u32 %v11405_v11, 16  ;;  %v6329_v47 = vshll.u32 %v11447_v26, 16 }
 0x3f8   : > { %v6281_v29 = vshll.u32 %v11411_v59, 16 }
 0x3f9   : > { %v6259_v0 = vrot.slane %v6257_v61, 5  ;;  %v6331_v60 = vrot.slane %v6329_v47, 5 }
 0x3fa   : > { %v6283_v58 = vrot.slane %v6281_v29, 5  ;;  %v11460_v29 = vld [vmem:[#allocation2 + $0x64] sm:$0xf] }
 0x3fd   : > { %8795 = vmatmul.mubr.msk.bf16.gmra.mrb[12].mxu1 %vm3487_vm8, %v8174_v62  ;;  %v6268_v62 = vor.u32 %v6267_v13, %v6264_v57 }
 0x3fe   : > { %8798 = vmatprep.mubr.msk.bf16.mxu1 %vm3487_vm8, %v8175_v32  ;;  %v6278_v32 = vor.u32 %v6277_v44, %v11407_v63  ;;  %v6349_v44 = vrot.slane %v6347_v50, 4 }
 0x3ff   : > { %v6269_v53 = vrot.slane %v6268_v62, 4  ;;  %v6358_v62 = vshrl.u32 %v6228_v23, 16 }
 0x400   : > { %v6279_v27 = vrot.slane %v6278_v32, 4  ;;  %v6231_v32 = vld [vmem:[#allocation2 + $0x60] sm:$0xf] }
 0x401   : > { %v6274_v3 = vsel %vm9600_vm4, %v6269_v53, %v11407_v63  ;;  %v6293_v63 = vrot.slane %v6292_v51, 4  ;;  %v6395_v53 = vshrl.u32 %v11460_v29, 16  ;;  %v6234_v51 = vld [vmem:[#allocation2 + $0x6c] sm:$0xf] }
 0x402   : > { %v6284_v33 = vsel %vm9600_vm4, %v6279_v27, %v6283_v58 }
 0x403   : > { %v8206_v20 = vcombine.low %v6274_v3, %v6284_v33  ;;  %v6298_v42 = vsel %vm9600_vm4, %v6293_v63, %v11425_v8  ;;  %v6397_v3 = vrot.slane %v6395_v53, 4  ;;  %v11478_v33 = vld [vmem:[#allocation2 + $0x70] sm:$0xf]  ;;  %v6409_v63 = vshll.u32 %v6234_v51, 16 }
 0x404   : > { %v8207_v50 = vcombine.low %v6298_v42, %v6308_v31  ;;  %v6415_v40 = vshll.u32 %v11478_v33, 16 }
 0x405   : > { %8799 = vmatmul.mubr.msk.bf16.gmra.mrb[16].mxu1 %vm3487_vm8, %v8176_v24  ;;  %v6310_v24 = vshrl.u32 %v6222_v35, 16 }
 0x406   : > { %8802 = vmatprep.mubr.msk.bf16.mxu1 %vm3487_vm8, %v8177_v46  ;;  %v6313_v46 = vshll.u32 %v6222_v35, 16 }
 0x407   : > { %v6312_v12 = vrot.slane %v6310_v24, 4  ;;  %v6382_v24 = vshrl.u32 %v6231_v32, 16 }
 0x408   : > { %v6315_v25 = vrot.slane %v6313_v46, 5  ;;  %v6385_v46 = vshll.u32 %v6231_v32, 16 }
 0x409   : > { %v6384_v56 = vrot.slane %v6382_v24, 4 }
 0x40a   : > { %v6316_v61 = vor.u32 %v6315_v25, %v6312_v12  ;;  %v6387_v12 = vrot.slane %v6385_v46, 5 }
 0x40c   : > { %v6388_v47 = vor.u32 %v6387_v12, %v6384_v56  ;;  %v6632_v12 = vrot.slane %v11405_v11, 5  ;;  %v6643_v11 = vrot.slane %v11409_v52, 5 }
 0x40d   : > { %8803 = vmatmul.mubr.msk.bf16.gmra.mrb[20].mxu1 %vm3487_vm8, %v8178_v6  ;;  %v6319_v6 = vshll.u32 %v11423_v45, 16 }
 0x40e   : > { %8808 = vmatprep.mubr.msk.bf16.mxu1 %vm3487_vm8, %v9355_v34  ;;  %v6323_v34 = vshrl.u32 %v11423_v45, 16  ;;  %v6389_v42 = vrot.slane %v6388_v47, 4  ;;  %v6650_v47 = vrot.slane %v11423_v45, 5 }
 0x40f   : > { %v11449_v30 = vrot.slane %v6319_v6, 5  ;;  %v6355_v6 = vrot.slane %v6353_v16, 5 }
 0x410   : > { %v6325_v49 = vrot.slane %v6323_v34, 4  ;;  %v6360_v34 = vrot.slane %v6358_v62, 4 }
 0x412   : > { %v6326_v36 = vor.u32 %v6325_v49, %v11449_v30 }
 0x414   : > { %v6327_v27 = vrot.slane %v6326_v36, 4 }
 0x415   : > { %8809 = vmatmul.mubr.msk.bf16.vlgmr.msra.gmra.mrb[8].mxu1 %vm3487_vm8, %v9356_v48  ;;  %v6337_v48 = vshll.u32 %v6225_v14, 16  ;;  %v6317_v14 = vrot.slane %v6316_v61, 4  ;;  %v6419_v61 = vshrl.u32 %v11478_v33, 16 }
 0x416   : > { %8825 = vmatpush3.bf16.msra.mxu1 %v6480_v1  ;;  %8812 = vmatprep.mubr.msk.bf16.mxu1 %vm3487_vm8, %v9357_v43  ;;  %v6260_v43 = vsel %vm9600_vm4, %v6255_v41, %v6259_v0  ;;  %v6343_v1 = vshll.u32 %v11427_v2, 16  ;;  %v6367_v41 = vshll.u32 %v11456_v22, 16  ;;  %v6371_v0 = vshrl.u32 %v11456_v22, 16 }
 0x417   : > { %9222 = vmatprep.subr.msk.bf16.mxu1 %vm4426_vm3, %v11393_v38  ;;  %v6339_v39 = vrot.slane %v6337_v48, 5  ;;  %v8205_v57 = vcombine.low %v6250_v10, %v6260_v43  ;;  %v6391_v10 = vshll.u32 %v11460_v29, 16  ;;  %v11474_v48 = vld [vmem:[#allocation2 + $0x5c] sm:$0x1]  ;;  %v6322_v49 = vsel %vm9600_vm4, %v6317_v14, %v11449_v30 }
 0x418   : > { %v11453_v13 = vrot.slane %v6343_v1, 5  ;;  %v6369_v8 = vrot.slane %v6367_v41, 5  ;;  %v6373_v5 = vrot.slane %v6371_v0, 4  ;;  %v6734_v1 = vsel %vm4426_vm3, %v11393_v38, 0  ;;  %v11491_v38 = vld [vmem:[%s12057_s9] sm:$0x3] }
 0x419   : > { %v6393_v25 = vrot.slane %v6391_v10, 5  ;;  %v6417_v41 = vrot.slane %v6415_v40, 5  ;;  %v6421_v0 = vrot.slane %v6419_v61, 4  ;;  %v6645_v61 = vrot.slane %v6643_v11, 4 }
 0x41a   : > { %v6350_v35 = vor.u32 %v6349_v44, %v11453_v13  ;;  %v6374_v28 = vor.u32 %v6373_v5, %v6369_v8  ;;  %v6406_v44 = vshrl.u32 %v6234_v51, 16 }
 0x41b   : > { %v6422_v53 = vor.u32 %v6421_v0, %v6417_v41 }
 0x41c   : > { %v6375_v62 = vrot.slane %v6374_v28, 4 }
 0x41d   : > { %8813 = vmatmul.mubr.msk.bf16.gmra.mrb[12].mxu1 %vm3487_vm8, %v9358_v7  ;;  %v6336_v7 = vrot.slane %v6334_v21, 4  ;;  %v6351_v21 = vrot.slane %v6350_v35, 4  ;;  %v6408_v35 = vrot.slane %v6406_v44, 4 }
 0x41e   : > { %8816 = vmatprep.mubr.msk.bf16.mxu1 %vm3487_vm8, %v9359_v55  ;;  %v9362_v55 = vld [vmem:[#allocation2 + $0x6c] sm:$0xff]  }
 0x41f   : > { %v6356_v30 = vsel %vm9600_vm4, %v6351_v21, %v6355_v6  ;;  %v6595_v21 = vld [vmem:[#allocation2 + $0x18] sm:$0xe] }
 0x420   : > { %v8221_v51 = vrot.slane %v6595_v21, 9 }
 0x425   : > { %8817 = vmatmul.mubr.msk.bf16.gmra.mrb[16].mxu1 %vm3487_vm8, %v9360_v54  ;;  %v6340_v54 = vor.u32 %v6339_v39, %v6336_v7  ;;  %v6332_v7 = vsel %vm9600_vm4, %v6327_v27, %v6331_v60  ;;  %v6377_v39 = vshll.u32 %v11474_v48, 16  ;;  %v11505_v60 = vld [vmem:[#allocation2 + $0x74] sm:$0x1] }
 0x426   : > { %8820 = vmatprep.mubr.msk.bf16.mxu1 %vm3487_vm8, %v9361_v19  ;;  %v6361_v19 = vshll.u32 %v6228_v23, 16  ;;  %v11486_v23 = vld [vmem:[#allocation2 + $0x68] sm:$0x1]  ;;  %v6425_v27 = vshll.u32 %v11505_v60, 16 }
 0x427   : > { %v6341_v58 = vrot.slane %v6340_v54, 4  ;;  %v6401_v36 = vshll.u32 %v11486_v23, 16  ;;  %v6379_v32 = vrot.slane %v6377_v39, 5  ;;  %v6596_v39 = vld [vmem:[#allocation2 + $0x24] sm:$0xe] }
 0x428   : > { %v6363_v43 = vrot.slane %v6361_v19, 5  ;;  %v6411_v19 = vrot.slane %v6409_v63, 5  ;;  %v8222_v28 = vrot.slane %v6596_v39, 9  ;;  %v6639_v63 = vrot.slane %v11411_v59, 5  ;;  %v8252_v39 = vld [vmem:[%s9554_s22 + $0x28] sm:$0xf] }
 0x429   : > { %v6403_v14 = vrot.slane %v6401_v36, 5  ;;  %v6380_v46 = vsel %vm9600_vm4, %v6375_v62, %v6379_v32  ;;  %v6657_v59 = vrot.slane %v11427_v2, 5  ;;  %v6653_v62 = vrot.slane %v11447_v26, 5  ;;  %v8248_v2 = vld [vmem:[%s9554_s22 + $0x18] sm:$0xf] }
 0x42a   : > { %v6412_v10 = vor.u32 %v6411_v19, %v6408_v35  ;;  %v6600_v35 = vld [vmem:[#allocation2 + $0x54] sm:$0xe] }
 0x42b   : > { %v6659_v0 = vrot.slane %v6657_v59, 4 }
 0x42c   : > { %v6413_v5 = vrot.slane %v6412_v10, 4  ;;  %v8226_v10 = vrot.slane %v6600_v35, 9 }
 0x42d   : > { %8821 = vmatmul.mubr.msk.bf16.gmra.mrb[20].mxu1 %vm3487_vm8, %v9362_v55  ;;  %v6346_v55 = vsel %vm9600_vm4, %v6341_v58, %v11453_v13  ;;  %v8208_v13 = vcombine.low %v6322_v49, %v6332_v7  ;;  %v6394_v58 = vsel %vm9600_vm4, %v6389_v42, %v6393_v25  ;;  %v6660_v42 = vrot.slane %v11451_v4, 5  ;;  %v6601_v4 = vld [vmem:[#allocation2 + $0x60] sm:$0xe] }
 0x42e   : > { %8826 = vmatprep.mubr.msk.bf16.mxu1 %vm3487_vm8, %v8205_v57  ;;  %v6364_v57 = vor.u32 %v6363_v43, %v6360_v34  ;;  %v8209_v54 = vcombine.low %v6346_v55, %v6356_v30  ;;  %v6629_v34 = vrot.slane %v11385_v17, 5  ;;  %v6597_v55 = vld [vmem:[#allocation2 + $0x30] sm:$0xe] }
 0x42f   : > { %v8223_v40 = vrot.slane %v6597_v55, 9 }
 0x430   : > { %v6365_v16 = vrot.slane %v6364_v57, 4  ;;  %v6631_v56 = vrot.slane %v6629_v34, 4  ;;  %v6630_v49 = vsel %vm9738_vm7, %v8221_v51, %v6629_v34 }
 0x432   : > { %v6370_v24 = vsel %vm9600_vm4, %v6365_v16, %v6369_v8  ;;  %v6633_v7 = vsel %vm9738_vm7, %v6631_v56, %v6632_v12  ;;  %v6652_v16 = vrot.slane %v6650_v47, 4  ;;  %v6674_v56 = vrot.slane %v11486_v23, 5 }
 0x433   : > { %v8210_v43 = vcombine.low %v6370_v24, %v6380_v46  ;;  %v8230_v57 = vcombine.low %v6630_v49, %v6633_v7  ;;  %v8249_v24 = vld [vmem:[%s9554_s22 + $0x1c] sm:$0xf] }
 0x434   : > { %v6654_v26 = vsel %vm9738_vm7, %v6652_v16, %v6653_v62  ;;  %v7233_v34 = vshll.u32 %v8249_v24, 16 }
 0x435   : > { %8827 = vmatmul.mubr.msk.bf16.vlgmr.msra.gmra.mrb[8].mxu1 %vm3487_vm8, %v8206_v20  ;;  %v6398_v20 = vor.u32 %v6397_v3, %v6393_v25  ;;  %v6418_v25 = vsel %vm9600_vm4, %v6413_v5, %v6417_v41  ;;  %v6636_v3 = vrot.slane %v11388_v18, 5  ;;  %v6646_v18 = vrot.slane %v11421_v15, 5 }
 0x436   : > { %8843 = vmatpush3.bf16.msra.mxu1 %v6734_v1  ;;  %8830 = vmatprep.mubr.msk.bf16.mxu1 %vm3487_vm8, %v8207_v50  ;;  %v6423_v1 = vrot.slane %v6422_v53, 4  ;;  %v6427_v50 = vrot.slane %v6425_v27, 5  ;;  %v6644_v15 = vsel %vm9738_vm7, %v8223_v40, %v6643_v11  ;;  %v6671_v53 = vrot.slane %v11460_v29, 5  ;;  %v6602_v27 = vld [vmem:[#allocation2 + $0x6c] sm:$0xe] }
 0x437   : > { %9223 = vmatprep.subr.msk.bf16.mxu1 %vm536_vm0, %v11491_v38  ;;  %v6399_v31 = vrot.slane %v6398_v20, 4  ;;  %v6638_v44 = vrot.slane %v6636_v3, 4  ;;  %v6598_v20 = vld [vmem:[#allocation2 + $0x3c] sm:$0xe]  ;;  %v6637_v52 = vsel %vm9738_vm7, %v8222_v28, %v6636_v3  ;;  %v6647_v45 = vsel %vm9738_vm7, %v6645_v61, %v6646_v18  ;;  %v8254_v11 = vld [vmem:[%s9554_s22 + $0x30] sm:$0xf] }
 0x438   : > { %v6428_v17 = vsel %vm9600_vm4, %v6423_v1, %v6427_v50  ;;  %v8232_v19 = vcombine.low %v6644_v15, %v6647_v45  ;;  %v7237_v29 = vshrl.u32 %v8249_v24, 16  ;;  %v6678_v5 = vrot.slane %v11478_v33, 5  ;;  %v8251_v1 = vld [vmem:[%s9554_s22 + $0x24] sm:$0xf] }
 0x439   : > { %v6404_v6 = vsel %vm9600_vm4, %v6399_v31, %v6403_v14  ;;  %v8212_v30 = vcombine.low %v6418_v25, %v6428_v17  ;;  %v6640_v36 = vsel %vm9738_vm7, %v6638_v44, %v6639_v63  ;;  %v6664_v31 = vrot.slane %v11456_v22, 5  ;;  %v8250_v25 = vld [vmem:[%s9554_s22 + $0x20] sm:$0x1] }
 0x43a   : > { %v8211_v8 = vcombine.low %v6394_v58, %v6404_v6  ;;  %v8231_v32 = vcombine.low %v6637_v52, %v6640_v36  ;;  %v7472_v14 = vsel %vm536_vm0, %v11491_v38, 0  ;;  %v7224_v58 = vshrl.u32 %v8248_v2, 16 }
 0x43b   : > { %v7227_v22 = vshll.u32 %v8248_v2, 16  ;;  %v6661_v6 = vsel %vm9738_vm7, %v6659_v0, %v6660_v42  ;;  %v8227_v50 = vrot.slane %v6601_v4, 9  ;;  %v6673_v51 = vrot.slane %v6671_v53, 4  ;;  %v8258_v4 = vld [vmem:[%s9554_s22 + $0x40] sm:$0xf] }
 0x43c   : > { %v8228_v12 = vrot.slane %v6602_v27, 9  ;;  %v6665_v3 = vsel %vm9738_vm7, %v8226_v10, %v6664_v31  ;;  %v7226_v49 = vrot.slane %v7224_v58, 4  ;;  %v11573_v55 = vrot.slane %v7233_v34, 5  ;;  %v8260_v34 = vld [vmem:[%s9554_s22 + $0x48] sm:$0xf] }
 0x43d   : > { %8831 = vmatmul.mubr.msk.bf16.gmra.mrb[12].mxu1 %vm3487_vm8, %v8208_v13  ;;  %v6599_v13 = vld [vmem:[#allocation2 + $0x48] sm:$0xe]  ;;  %v7229_v7 = vrot.slane %v7227_v22, 5  ;;  %v7248_v33 = vshrl.u32 %v8251_v1, 16  ;;  %v6680_v23 = vrot.slane %v6678_v5, 4  ;;  %v6681_v44 = vrot.slane %v11505_v60, 5 }
 0x43e   : > { %8834 = vmatprep.mubr.msk.bf16.mxu1 %vm3487_vm8, %v8209_v54  ;;  %v8224_v54 = vrot.slane %v6598_v20, 9  ;;  %v8225_v41 = vrot.slane %v6599_v13, 9  ;;  %v7243_v63 = vshll.u32 %v8250_v25, 16  ;;  %v7257_v40 = vshll.u32 %v8252_v39, 16 }
 0x43f   : > { %v7261_v61 = vshrl.u32 %v8252_v39, 16  ;;  %v7272_v18 = vshrl.u32 %v8254_v11, 16  ;;  %v6672_v20 = vsel %vm9738_vm7, %v8227_v50, %v6671_v53  ;;  %v6675_v52 = vsel %vm9738_vm7, %v6673_v51, %v6674_v56 }
 0x440   : > { %v6651_v46 = vsel %vm9738_vm7, %v8224_v54, %v6650_v47  ;;  %v6658_v38 = vsel %vm9738_vm7, %v8225_v41, %v6657_v59  ;;  %v7275_v47 = vshll.u32 %v8254_v11, 16  ;;  %v7230_v60 = vor.u32 %v7229_v7, %v7226_v49 }
 0x441   : > { %v8233_v21 = vcombine.low %v6651_v46, %v6654_v26  ;;  %v8234_v17 = vcombine.low %v6658_v38, %v6661_v6  ;;  %v7250_v45 = vrot.slane %v7248_v33, 4  ;;  %v6679_v54 = vsel %vm9738_vm7, %v8228_v12, %v6678_v5  ;;  %v8257_v46 = vld [vmem:[%s9554_s22 + $0x3c] sm:$0xf]  ;;  %v8259_v33 = vld [vmem:[%s9554_s22 + $0x44] sm:$0x1] }
 0x442   : > { %v6682_v16 = vsel %vm9738_vm7, %v6680_v23, %v6681_v44  ;;  %v7245_v62 = vrot.slane %v7243_v63, 5  ;;  %v11591_v35 = vrot.slane %v7257_v40, 5  ;;  %v7274_v41 = vrot.slane %v7272_v18, 4  ;;  %v8263_v23 = vld [vmem:[%s9554_s22 + $0x54] sm:$0xf] }
 0x443   : > { %v7277_v0 = vrot.slane %v7275_v47, 5  ;;  %v8236_v2 = vcombine.low %v6672_v20, %v6675_v52  ;;  %v7231_v26 = vrot.slane %v7230_v60, 4  ;;  %v8237_v27 = vcombine.low %v6679_v54, %v6682_v16  ;;  %v8264_v18 = vld [vmem:[%s9554_s22 + $0x58] sm:$0xf] }
 0x444   : > { %v7296_v6 = vshrl.u32 %v8257_v46, 16  ;;  %v7309_v5 = vshrl.u32 %v8258_v4, 16  ;;  %v7320_v12 = vshrl.u32 %v8260_v34, 16  ;;  %v7323_v25 = vshll.u32 %v8260_v34, 16 }
 0x445   : > { %8835 = vmatmul.mubr.msk.bf16.gmra.mrb[16].mxu1 %vm3487_vm8, %v8210_v43  ;;  %v6666_v43 = vrot.slane %v6664_v31, 4  ;;  %v8256_v31 = vld [vmem:[%s9554_s22 + $0x38] sm:$0x1]  ;;  %v7278_v22 = vor.u32 %v7277_v0, %v7274_v41  ;;  %v7315_v52 = vshll.u32 %v8259_v33, 16  ;;  %v7347_v54 = vshll.u32 %v8263_v23, 16 }
 0x446   : > { %8838 = vmatprep.mubr.msk.bf16.mxu1 %vm3487_vm8, %v8211_v8  ;;  %v6667_v8 = vrot.slane %v11474_v48, 5  ;;  %v7239_v48 = vrot.slane %v7237_v29, 4  ;;  %v7291_v38 = vshll.u32 %v8256_v31, 16  ;;  %v8261_v29 = vld [vmem:[%s9554_s22 + $0x4c] sm:$0xf]  ;;  %v7298_v11 = vrot.slane %v7296_v6, 4 }
 0x447   : > { %v7279_v7 = vrot.slane %v7278_v22, 4  ;;  %v7322_v44 = vrot.slane %v7320_v12, 4  ;;  %v7325_v63 = vrot.slane %v7323_v25, 5  ;;  %v7353_v16 = vshll.u32 %v8264_v18, 16  ;;  %v8266_v12 = vld [vmem:[%s9554_s22 + $0x60] sm:$0xf] }
 0x448   : > { %v6668_v28 = vsel %vm9738_vm7, %v6666_v43, %v6667_v8  ;;  %v7240_v15 = vor.u32 %v7239_v48, %v11573_v55  ;;  %v7299_v43 = vshll.u32 %v8257_v46, 16  ;;  %v7305_v8 = vshll.u32 %v8258_v4, 16  ;;  %v8265_v4 = vld [vmem:[%s9554_s22 + $0x5c] sm:$0x1]  ;;  %v8267_v25 = vld [vmem:[%s9554_s22 + $0x64] sm:$0xf] }
 0x449   : > { %v8235_v42 = vcombine.low %v6665_v3, %v6668_v28  ;;  %v7333_v3 = vshrl.u32 %v8261_v29, 16  ;;  %v7293_v39 = vrot.slane %v7291_v38, 5  ;;  %v7317_v31 = vrot.slane %v7315_v52, 5  ;;  %v8271_v52 = vld [vmem:[%s9554_s22 + $0x74] sm:$0x1] }
 0x44a   : > { %v7241_v9 = vrot.slane %v7240_v15, 4  ;;  %v7355_v46 = vrot.slane %v7353_v16, 5  ;;  %v7363_v6 = vshll.u32 %v8265_v4, 16 }
 0x44c   : > { %v7246_v50 = vsel %vm9600_vm4, %v7241_v9, %v7245_v62  ;;  %v7357_v62 = vshrl.u32 %v8264_v18, 16 }
 0x44d   : > { %8839 = vmatmul.mubr.msk.bf16.gmra.mrb[20].mxu1 %vm3487_vm8, %v8212_v30  ;;  %v7251_v30 = vshll.u32 %v8251_v1, 16  ;;  %v7236_v1 = vsel %vm9600_vm4, %v7231_v26, %v11573_v55  ;;  %v7307_v55 = vrot.slane %v7305_v8, 5 }
 0x44e   : > { %8844 = vmatprep.mubr.msk.bf16.mxu1 %vm3487_vm8, %v8230_v57  ;;  %v8255_v57 = vld [vmem:[%s9554_s22 + $0x34] sm:$0xf]  ;;  %v8273_v28 = vcombine.low %v7236_v1, %v7246_v50  ;;  %v7359_v26 = vrot.slane %v7357_v62, 4  ;;  %v7365_v1 = vrot.slane %v7363_v6, 5 }
 0x44f   : > { %v7281_v36 = vshll.u32 %v8255_v57, 16  ;;  %v7285_v59 = vshrl.u32 %v8255_v57, 16  ;;  %v7253_v13 = vrot.slane %v7251_v30, 5  ;;  %v7301_v30 = vrot.slane %v7299_v43, 5 }
 0x450   : > { %v7311_v57 = vrot.slane %v7309_v5, 4  ;;  %v7360_v38 = vor.u32 %v7359_v26, %v7355_v46 }
 0x451   : > { %v7287_v24 = vrot.slane %v7285_v59, 4  ;;  %v7254_v10 = vor.u32 %v7253_v13, %v7250_v45  ;;  %v7302_v15 = vor.u32 %v7301_v30, %v7298_v11  ;;  %v7344_v13 = vshrl.u32 %v8263_v23, 16  ;;  %v8270_v11 = vld [vmem:[%s9554_s22 + $0x70] sm:$0xf]  ;;  %v8268_v23 = vld [vmem:[%s9554_s22 + $0x68] sm:$0x1] }
 0x452   : > { %v7312_v45 = vor.u32 %v7311_v57, %v7307_v55  ;;  %v7361_v5 = vrot.slane %v7360_v38, 4 }
 0x453   : > { %v7255_v51 = vrot.slane %v7254_v10, 4 }
 0x455   : > { %8845 = vmatmul.mubr.msk.bf16.vlgmr.msra.gmra.mrb[8].mxu1 %vm3487_vm8, %v8231_v32  ;;  %v8253_v32 = vld [vmem:[%s9554_s22 + $0x2c] sm:$0x1]  ;;  %v7260_v47 = vsel %vm9600_vm4, %v7255_v51, %v11591_v35  ;;  %v7366_v51 = vsel %vm9600_vm4, %v7361_v5, %v7365_v1 }
 0x456   : > { %8848 = vmatprep.mubr.msk.bf16.mxu1 %vm3487_vm8, %v8232_v19  ;;  %8861 = vmatpush3.bf16.msra.mxu1 %v7472_v14  ;;  %v7263_v19 = vrot.slane %v7261_v61, 4  ;;  %v11594_v14 = vrot.slane %v7281_v36, 5  ;;  %v7267_v53 = vshll.u32 %v8253_v32, 16  ;;  %v7335_v61 = vrot.slane %v7333_v3, 4  ;;  %v8262_v36 = vld [vmem:[%s9554_s22 + $0x50] sm:$0x1] }
 0x457   : > { %v7326_v32 = vor.u32 %v7325_v63, %v7322_v44  ;;  %v7371_v3 = vshll.u32 %v8266_v12, 16 }
 0x458   : > { %v7264_v58 = vor.u32 %v7263_v19, %v11591_v35  ;;  %v7269_v56 = vrot.slane %v7267_v53, 5  ;;  %v7284_v59 = vsel %vm9600_vm4, %v7279_v7, %v11594_v14  ;;  %v7339_v19 = vshll.u32 %v8262_v36, 16 }
 0x459   : > { %v7327_v9 = vrot.slane %v7326_v32, 4  ;;  %v7381_v7 = vshrl.u32 %v8267_v25, 16 }
 0x45a   : > { %v7265_v49 = vrot.slane %v7264_v58, 4  ;;  %v7341_v53 = vrot.slane %v7339_v19, 5 }
 0x45c   : > { %v7270_v20 = vsel %vm9600_vm4, %v7265_v49, %v7269_v56  ;;  %v7377_v49 = vshll.u32 %v8267_v25, 16 }
 0x45d   : > { %8849 = vmatmul.mubr.msk.bf16.gmra.mrb[12].mxu1 %vm3487_vm8, %v8233_v21  ;;  %v7288_v21 = vor.u32 %v7287_v24, %v11594_v14  ;;  %v8274_v41 = vcombine.low %v7260_v47, %v7270_v20  ;;  %v7346_v14 = vrot.slane %v7344_v13, 4  ;;  %v7349_v24 = vrot.slane %v7347_v54, 5 }
 0x45e   : > { %8852 = vmatprep.mubr.msk.bf16.mxu1 %vm3487_vm8, %v8234_v17  ;;  %v7329_v17 = vshll.u32 %v8261_v29, 16  ;;  %v7379_v57 = vrot.slane %v7377_v49, 5  ;;  %v7387_v20 = vshll.u32 %v8268_v23, 16 }
 0x45f   : > { %v7289_v48 = vrot.slane %v7288_v21, 4  ;;  %v7350_v22 = vor.u32 %v7349_v24, %v7346_v14  ;;  %v11662_v14 = vld [vmem:[%s12054_s6] ss:$0 sm:$0xff] }
 0x460   : > { %v7331_v40 = vrot.slane %v7329_v17, 5  ;;  %v7368_v17 = vshrl.u32 %v8266_v12, 16  ;;  %v7389_v54 = vrot.slane %v7387_v20, 5 }
 0x461   : > { %v7294_v60 = vsel %vm9600_vm4, %v7289_v48, %v7293_v39  ;;  %v7351_v8 = vrot.slane %v7350_v22, 4  ;;  %v8269_v39 = vld [vmem:[%s9554_s22 + $0x6c] sm:$0xf] }
 0x462   : > { %v7336_v35 = vor.u32 %v7335_v61, %v7331_v40  ;;  %v8275_v0 = vcombine.low %v7284_v59, %v7294_v60  ;;  %v7332_v34 = vsel %vm9600_vm4, %v7327_v9, %v7331_v40  ;;  %v7392_v48 = vshrl.u32 %v8269_v39, 16 }
 0x463   : > { %v7356_v50 = vsel %vm9600_vm4, %v7351_v8, %v7355_v46  ;;  %v7395_v33 = vshll.u32 %v8269_v39, 16  ;;  %v7370_v30 = vrot.slane %v7368_v17, 4  ;;  %v7401_v40 = vshll.u32 %v8270_v11, 16 }
 0x464   : > { %v7337_v10 = vrot.slane %v7336_v35, 4  ;;  %v8278_v56 = vcombine.low %v7356_v50, %v7366_v51  ;;  %v7394_v44 = vrot.slane %v7392_v48, 4  ;;  %v7405_v61 = vshrl.u32 %v8270_v11, 16 }
 0x465   : > { %8853 = vmatmul.mubr.msk.bf16.gmra.mrb[16].mxu1 %vm3487_vm8, %v8235_v42  ;;  %v7303_v42 = vrot.slane %v7302_v15, 4  ;;  %v7397_v63 = vrot.slane %v7395_v33, 5  ;;  %v7403_v59 = vrot.slane %v7401_v40, 5  ;;  %v7411_v15 = vshll.u32 %v8271_v52, 16 }
 0x466   : > { %8856 = vmatprep.mubr.msk.bf16.mxu1 %vm3487_vm8, %v8236_v2  ;;  %v7313_v2 = vrot.slane %v7312_v45, 4  ;;  %v7342_v29 = vsel %vm9600_vm4, %v7337_v10, %v7341_v53  ;;  %v7407_v60 = vrot.slane %v7405_v61, 4 }
 0x467   : > { %v8277_v43 = vcombine.low %v7332_v34, %v7342_v29  ;;  %v7398_v36 = vor.u32 %v7397_v63, %v7394_v44  ;;  %v7413_v32 = vrot.slane %v7411_v15, 5 }
 0x468   : > { %v7318_v58 = vsel %vm9600_vm4, %v7313_v2, %v7317_v31  ;;  %v7408_v62 = vor.u32 %v7407_v60, %v7403_v59 }
 0x469   : > { %v7399_v16 = vrot.slane %v7398_v36, 4 }
 0x46d   : > { %8857 = vmatmul.mubr.msk.bf16.gmra.mrb[20].mxu1 %vm3487_vm8, %v8237_v27  ;;  %v7308_v27 = vsel %vm9600_vm4, %v7303_v42, %v7307_v55  ;;  %v7373_v55 = vrot.slane %v7371_v3, 5  ;;  %v7409_v42 = vrot.slane %v7408_v62, 4 }
 0x46e   : > { %8862 = vmatprep.mubr.msk.bf16.mxu1 %vm505_vm1, %v8273_v28  ;;  %v8276_v21 = vcombine.low %v7308_v27, %v7318_v58  ;;  %v7383_v28 = vrot.slane %v7381_v7, 4 }
 0x46f   : > { %v7374_v18 = vor.u32 %v7373_v55, %v7370_v30  ;;  %v7414_v2 = vsel %vm9600_vm4, %v7409_v42, %v7413_v32 }
 0x470   : > { %v7384_v47 = vor.u32 %v7383_v28, %v7379_v57 }
 0x471   : > { %v7375_v45 = vrot.slane %v7374_v18, 4 }
 0x472   : > { %v7385_v13 = vrot.slane %v7384_v47, 4 }
 0x473   : > { %v7380_v35 = vsel %vm9600_vm4, %v7375_v45, %v7379_v57 }
 0x474   : > { %v7390_v19 = vsel %vm9600_vm4, %v7385_v13, %v7389_v54 }
 0x475   : > { %8863 = vmatmul.mubr.msk.bf16.vlgmr.msra.gmra.mrb[24].mxu1 %vm505_vm1, %v8274_v41  ;;  %v8279_v41 = vcombine.low %v7380_v35, %v7390_v19 }
 0x476   : > { %8866 = vmatprep.mubr.msk.bf16.mxu1 %vm505_vm1, %v8275_v0  ;;  %v7404_v0 = vsel %vm9600_vm4, %v7399_v16, %v7403_v59 }
 0x477   : > { %v8280_v31 = vcombine.low %v7404_v0, %v7414_v2 }
 0x47d   : > { %8867 = vmatmul.mubr.msk.bf16.gmra.mrb[28].mxu1 %vm505_vm1, %v8276_v21 }
 0x47e   : > { %8870 = vmatprep.mubr.msk.bf16.mxu1 %vm505_vm1, %v8277_v43 }
 0x485   : > { %8871 = vmatmul.mubr.msk.bf16.gmra.mrb[32].mxu1 %vm505_vm1, %v8278_v56 }
 0x486   : > { %8874 = vmatprep.mubr.msk.bf16.mxu1 %vm505_vm1, %v8279_v41 }
 0x48d   : > { %8875 = vmatmul.mubr.msk.bf16.gmra.mrb[36].mxu1 %vm505_vm1, %v8280_v31 }
 0x528   : > { %v8846_v24 = vpop.f32.mrb[8].mxu1 }
 0x529   : > { %v11665_v46 = vadd.f32 %v8846_v24, %v11662_v14  ;;  %v6770_v26 = vpop.f32.mrb[9].mxu1 }
 0x52a   : > { %v11668_v9 = vadd.f32 %v11662_v14, %v6770_v26  ;;  %v8847_v10 = vpop.f32.mrb[10].mxu1 }
 0x52b   : > { %v11671_v37 = vadd.f32 %v8847_v10, %v11662_v14  ;;  %v6773_v53 = vpop.f32.mrb[11].mxu1  ;;  %v6857_v4 = vsel %vm3487_vm8, %v11665_v46, 0.0  ;;  %v6917_v58 = vmul.f32 %v11665_v46, %v11665_v46 }
 0x52c   : > { %6858 = vadd.xlane.f32.xlu1 %v6857_v4  ;;  %v6851_v27 = vsel %vm3487_vm8, %v11668_v9, 0.0  ;;  %v11680_v22 = vadd.f32 %v11662_v14, %v6773_v53  ;;  %v6915_v51 = vmul.f32 %v11668_v9, %v11668_v9 }
 0x52d   : > { %6852 = vadd.xlane.f32.xlu0 %v6851_v27  ;;  %v6860_v38 = vsel %vm3487_vm8, %v11671_v37, 0.0  ;;  %v6918_v6 = vmul.f32 %v11671_v37, %v11671_v37  ;;  %v6937_v29 = vsel %vm3487_vm8, %v6917_v58, 0.0 }
 0x52e   : > { %v6916_v1 = vmul.f32 %v11680_v22, %v11680_v22  ;;  %v6854_v50 = vsel %vm3487_vm8, %v11680_v22, 0.0  ;;  %v6931_v3 = vsel %vm3487_vm8, %v6915_v51, 0.0 }
 0x52f   : > { %v6940_v5 = vsel %vm3487_vm8, %v6918_v6, 0.0 }
 0x530   : > { %v8850_v34 = vpop.f32.mrb[12].mxu1  ;;  %6861 = vadd.xlane.f32.xlu1 %v6860_v38  ;;  %v6934_v12 = vsel %vm3487_vm8, %v6916_v1, 0.0 }
 0x531   : > { %v6786_v21 = vpop.f32.mrb[13].mxu1  ;;  %6938 = vadd.xlane.f32.xlu0 %v6937_v29  ;;  %v11699_v25 = vadd.f32 %v8850_v34, %v11662_v14 }
 0x532   : > { %v8851_v43 = vpop.f32.mrb[14].mxu1  ;;  %v11708_v33 = vadd.f32 %v11662_v14, %v6786_v21 }
 0x533   : > { %v6789_v8 = vpop.f32.mrb[15].mxu1  ;;  %v11695_v56 = vadd.f32 %v8851_v43, %v11662_v14  ;;  %v6869_v30 = vsel %vm3487_vm8, %v11699_v25, 0.0  ;;  %v6921_v44 = vmul.f32 %v11699_v25, %v11699_v25 }
 0x534   : > { %6941 = vadd.xlane.f32.xlu1 %v6940_v5  ;;  %v11703_v39 = vadd.f32 %v11662_v14, %v6789_v8  ;;  %v6863_v23 = vsel %vm3487_vm8, %v11708_v33, 0.0  ;;  %v6919_v52 = vmul.f32 %v11708_v33, %v11708_v33 }
 0x535   : > { %6855 = vadd.xlane.f32.xlu0 %v6854_v50  ;;  %v6872_v48 = vsel %vm3487_vm8, %v11695_v56, 0.0  ;;  %v6922_v57 = vmul.f32 %v11695_v56, %v11695_v56  ;;  %v6949_v20 = vsel %vm3487_vm8, %v6921_v44, 0.0 }
 0x536   : > { %v6866_v55 = vsel %vm3487_vm8, %v11703_v39, 0.0  ;;  %v6920_v47 = vmul.f32 %v11703_v39, %v11703_v39  ;;  %v6943_v15 = vsel %vm3487_vm8, %v6919_v52, 0.0 }
 0x537   : > { %v6952_v18 = vsel %vm3487_vm8, %v6922_v57, 0.0 }
 0x538   : > { %v8854_v17 = vpop.f32.mrb[16].mxu1  ;;  %6935 = vadd.xlane.f32.xlu1 %v6934_v12  ;;  %v6946_v59 = vsel %vm3487_vm8, %v6920_v47, 0.0 }
 0x539   : > { %v6802_v49 = vpop.f32.mrb[17].mxu1  ;;  %6932 = vadd.xlane.f32.xlu0 %v6931_v3  ;;  %v11731_v60 = vadd.f32 %v8854_v17, %v11662_v14 }
 0x53a   : > { %v8855_v7 = vpop.f32.mrb[18].mxu1  ;;  %v11740_v54 = vadd.f32 %v11662_v14, %v6802_v49 }
 0x53b   : > { %v6805_v11 = vpop.f32.mrb[19].mxu1  ;;  %v11727_v36 = vadd.f32 %v8855_v7, %v11662_v14  ;;  %v6881_v16 = vsel %vm3487_vm8, %v11731_v60, 0.0  ;;  %v6925_v19 = vmul.f32 %v11731_v60, %v11731_v60 }
 0x53c   : > { %6873 = vadd.xlane.f32.xlu1 %v6872_v48  ;;  %v11735_v45 = vadd.f32 %v11662_v14, %v6805_v11  ;;  %v6875_v35 = vsel %vm3487_vm8, %v11740_v54, 0.0  ;;  %v6923_v2 = vmul.f32 %v11740_v54, %v11740_v54 }
 0x53d   : > { %6870 = vadd.xlane.f32.xlu0 %v6869_v30  ;;  %v6884_v13 = vsel %vm3487_vm8, %v11727_v36, 0.0  ;;  %v6926_v32 = vmul.f32 %v11727_v36, %v11727_v36  ;;  %v6961_v42 = vsel %vm3487_vm8, %v6925_v19, 0.0 }
 0x53e   : > { %v6878_v62 = vsel %vm3487_vm8, %v11735_v45, 0.0  ;;  %v6924_v0 = vmul.f32 %v11735_v45, %v11735_v45  ;;  %v6955_v10 = vsel %vm3487_vm8, %v6923_v2, 0.0 }
 0x53f   : > { %v6964_v41 = vsel %vm3487_vm8, %v6926_v32, 0.0 }
 0x540   : > { %v8858_v28 = vpop.f32.mrb[20].mxu1  ;;  %6867 = vadd.xlane.f32.xlu1 %v6866_v55  ;;  %v6958_v24 = vsel %vm3487_vm8, %v6924_v0, 0.0 }
 0x541   : > { %v6818_v63 = vpop.f32.mrb[21].mxu1  ;;  %6864 = vadd.xlane.f32.xlu0 %v6863_v23  ;;  %v11763_v26 = vadd.f32 %v8858_v28, %v11662_v14 }
 0x542   : > { %v8859_v40 = vpop.f32.mrb[22].mxu1  ;;  %v11776_v38 = vadd.f32 %v11662_v14, %v6818_v63 }
 0x543   : > { %v6821_v61 = vpop.f32.mrb[23].mxu1  ;;  %v11759_v31 = vadd.f32 %v8859_v40, %v11662_v14  ;;  %v6893_v6 = vsel %vm3487_vm8, %v11763_v26, 0.0  ;;  %v6929_v50 = vmul.f32 %v11763_v26, %v11763_v26 }
 0x544   : > { %6953 = vadd.xlane.f32.xlu1 %v6952_v18  ;;  %v11769_v4 = vadd.f32 %v11662_v14, %v6821_v61  ;;  %v6887_v43 = vsel %vm3487_vm8, %v11776_v38, 0.0  ;;  %v6927_v14 = vmul.f32 %v11776_v38, %v11776_v38 }
 0x545   : > { %6950 = vadd.xlane.f32.xlu0 %v6949_v20  ;;  %v6896_v27 = vsel %vm3487_vm8, %v11759_v31, 0.0  ;;  %v6930_v5 = vmul.f32 %v11759_v31, %v11759_v31  ;;  %v6973_v17 = vsel %vm3487_vm8, %v6929_v50, 0.0 }
 0x546   : > { %v6890_v29 = vsel %vm3487_vm8, %v11769_v4, 0.0  ;;  %v6928_v21 = vmul.f32 %v11769_v4, %v11769_v4  ;;  %v6967_v1 = vsel %vm3487_vm8, %v6927_v14, 0.0 }
 0x547   : > { %v6976_v12 = vsel %vm3487_vm8, %v6930_v5, 0.0 }
 0x548   : > { %6947 = vadd.xlane.f32.xlu1 %v6946_v59  ;;  %v11766_v53 = vpop.f32.mrb[24].mxu1  ;;  %v6970_v8 = vsel %vm3487_vm8, %v6928_v21, 0.0 }
 0x549   : > { %6944 = vadd.xlane.f32.xlu0 %v6943_v15  ;;  %v11773_v58 = vpop.f32.mrb[25].mxu1 }
 0x54a   : > { %v11780_v34 = vpop.f32.mrb[26].mxu1 }
 0x54b   : > { %v11796_v51 = vpop.f32.mrb[27].mxu1 }
 0x54c   : > { %6885 = vadd.xlane.f32.xlu1 %v6884_v13 }
 0x54d   : > { %6882 = vadd.xlane.f32.xlu0 %v6881_v16 }
 0x550   : > { %6879 = vadd.xlane.f32.xlu1 %v6878_v62  ;;  %v11800_v3 = vpop.f32.mrb[28].mxu1 }
 0x551   : > { %6876 = vadd.xlane.f32.xlu0 %v6875_v35  ;;  %v11802_v49 = vpop.f32.mrb[29].mxu1 }
 0x552   : > { %v11804_v7 = vpop.f32.mrb[30].mxu1 }
 0x553   : > { %v11806_v11 = vpop.f32.mrb[31].mxu1 }
 0x554   : > { %6965 = vadd.xlane.f32.xlu1 %v6964_v41 }
 0x555   : > { %6962 = vadd.xlane.f32.xlu0 %v6961_v42 }
 0x558   : > { %6959 = vadd.xlane.f32.xlu1 %v6958_v24  ;;  %v11808_v48 = vpop.f32.mrb[32].mxu1 }
 0x559   : > { %6956 = vadd.xlane.f32.xlu0 %v6955_v10  ;;  %v11810_v30 = vpop.f32.mrb[33].mxu1 }
 0x55a   : > { %v11812_v55 = vpop.f32.mrb[34].mxu1 }
 0x55b   : > { %v11814_v57 = vpop.f32.mrb[35].mxu1 }
 0x55c   : > { %6897 = vadd.xlane.f32.xlu1 %v6896_v27 }
 0x55d   : > { %6894 = vadd.xlane.f32.xlu0 %v6893_v6 }
 0x560   : > { %6891 = vadd.xlane.f32.xlu1 %v6890_v29  ;;  %v11816_v28 = vpop.f32.mrb[36].mxu1 }
 0x561   : > { %6888 = vadd.xlane.f32.xlu0 %v6887_v43  ;;  %v11818_v23 = vpop.f32.mrb[37].mxu1 }
 0x562   : > { %v11820_v44 = vpop.f32.mrb[38].mxu1 }
 0x563   : > { %v11822_v63 = vpop.f32.mrb[39].mxu1 }
 0x564   : > { %6971 = vadd.xlane.f32.xlu1 %v6970_v8 }
 0x565   : > { %6968 = vadd.xlane.f32.xlu0 %v6967_v1 }
 0x568   : > { %6977 = vadd.xlane.f32.xlu1 %v6976_v12 }
 0x569   : > { %6974 = vadd.xlane.f32.xlu0 %v6973_v17 }
 0x5b9   : > { %v6859_v40 = vpop.xlane.xlu1 %6858 }
 0x5ba   : > { %v6853_v61 = vpop.xlane.xlu0 %6852  ;;  %v6901_v18 = vmul.f32 0.125, %v6859_v40 }
 0x5bb   : > { %v11824_v19 = vmul.f32 0.125, %v6853_v61 }
 0x5bc   : > { %v6997_v59 = vmul.f32 %v6901_v18, %v6901_v18 }
 0x5bd   : > { %v6862_v47 = vpop.xlane.xlu1 %6861  ;;  %v6995_v21 = vmul.f32 %v11824_v19, %v11824_v19 }
 0x5be   : > { %v6902_v20 = vmul.f32 0.125, %v6862_v47  ;;  %v6939_v52 = vpop.xlane.xlu0 %6938 }
 0x5bf   : > { %v6981_v15 = vmul.f32 0.125, %v6939_v52 }
 0x5c0   : > { %v6998_v62 = vmul.f32 %v6902_v20, %v6902_v20 }
 0x5c1   : > { %v7013_v13 = vsub.f32 %v6981_v15, %v6997_v59  ;;  %v6942_v16 = vpop.xlane.xlu1 %6941 }
 0x5c2   : > { %v6982_v32 = vmul.f32 0.125, %v6942_v16  ;;  %v6856_v35 = vpop.xlane.xlu0 %6855 }
 0x5c3   : > { %v7029_v41 = vmax.f32 %v7013_v13, 0.0  ;;  %v11826_v0 = vmul.f32 0.125, %v6856_v35  ;;  %v7077_v13 = vsub.f32 %v11665_v46, %v6901_v18  ;;  %v7078_v46 = vsub.f32 %v11671_v37, %v6902_v20 }
 0x5c4   : > { %v7014_v42 = vsub.f32 %v6982_v32, %v6998_v62  ;;  %v11840_v32 = vld [vmem:[%s12055_s7] ss:$0 sm:$0xff] }
 0x5c5   : > { %v7045_v2 = vadd.f32 1e-05, %v7029_v41  ;;  %v6996_v24 = vmul.f32 %v11826_v0, %v11826_v0  ;;  %v6936_v10 = vpop.xlane.xlu1 %6935 }
 0x5c6   : > { %v7030_v27 = vmax.f32 %v7014_v42, 0.0  ;;  %v6980_v6 = vmul.f32 0.125, %v6936_v10  ;;  %v6933_v29 = vpop.xlane.xlu0 %6932  ;;  %v11849_v10 = vld [vmem:[%s12058_s10] ss:$0 sm:$0xff] }
 0x5c7   : > { %9363 = vrsqrt.f32 %v7045_v2  ;;  %v6979_v43 = vmul.f32 0.125, %v6933_v29  ;;  %v11859_v29 = vld [vmem:[%s12056_s8] ss:$0 sm:$0xff]  ;;  %v7517_v37 = vadd.f32 %v11766_v53, %v11849_v10 }
 0x5c8   : > { %v7046_v14 = vadd.f32 1e-05, %v7030_v27  ;;  %v7012_v8 = vsub.f32 %v6980_v6, %v6996_v24 }
 0x5c9   : > { %v7011_v5 = vsub.f32 %v6979_v43, %v6995_v21  ;;  %v6874_v1 = vpop.xlane.xlu1 %6873 }
 0x5ca   : > { %9365 = vrsqrt.f32 %v7046_v14  ;;  %v7028_v50 = vmax.f32 %v7012_v8, 0.0  ;;  %v6871_v12 = vpop.xlane.xlu0 %6870  ;;  %v11832_v52 = vmul.f32 0.125, %v6874_v1 }
 0x5cb   : > { %v7027_v17 = vmax.f32 %v7011_v5, 0.0  ;;  %v11834_v15 = vmul.f32 0.125, %v6871_v12 }
 0x5cc   : > { %v7044_v40 = vadd.f32 1e-05, %v7028_v50  ;;  %v7002_v35 = vmul.f32 %v11832_v52, %v11832_v52 }
 0x5cd   : > { %v7043_v61 = vadd.f32 1e-05, %v7027_v17  ;;  %v6868_v47 = vpop.xlane.xlu1 %6867  ;;  %v7001_v18 = vmul.f32 %v11834_v15, %v11834_v15 }
 0x5ce   : > { %9367 = vrsqrt.f32 %v7044_v40  ;;  %v6865_v59 = vpop.xlane.xlu0 %6864  ;;  %v11844_v41 = vmul.f32 0.125, %v6868_v47 }
 0x5cf   : > { %9369 = vrsqrt.f32 %v7043_v61  ;;  %v11854_v27 = vmul.f32 0.125, %v6865_v59 }
 0x5d0   : > { %v7000_v1 = vmul.f32 %v11844_v41, %v11844_v41 }
 0x5d1   : > { %v9364_v16 = vpop.eup %9363  ;;  %v6954_v62 = vpop.xlane.xlu1 %6953  ;;  %v6999_v61 = vmul.f32 %v11854_v27, %v11854_v27 }
 0x5d2   : > { %v6986_v42 = vmul.f32 0.125, %v6954_v62  ;;  %v6951_v2 = vpop.xlane.xlu0 %6950  ;;  %v7093_v24 = vmul.f32 %v9364_v16, %v7077_v13 }
 0x5d3   : > { %v6985_v6 = vmul.f32 0.125, %v6951_v2  ;;  %v7075_v2 = vsub.f32 %v11668_v9, %v11824_v19  ;;  %v7520_v9 = vadd.f32 %v11780_v34, %v11849_v10 }
 0x5d4   : > { %v9366_v21 = vpop.eup %9365  ;;  %v7018_v43 = vsub.f32 %v6986_v42, %v7002_v35  ;;  %v7115_v14 = vmul.f32 %v11840_v32, %v7093_v24 }
 0x5d5   : > { %v7017_v8 = vsub.f32 %v6985_v6, %v7001_v18  ;;  %v6948_v5 = vpop.xlane.xlu1 %6947  ;;  %v7094_v20 = vmul.f32 %v9366_v21, %v7078_v46  ;;  %v7076_v21 = vsub.f32 %v11680_v22, %v11826_v0 }
 0x5d6   : > { %v7034_v50 = vmax.f32 %v7018_v43, 0.0  ;;  %v6984_v12 = vmul.f32 0.125, %v6948_v5  ;;  %v6945_v17 = vpop.xlane.xlu0 %6944  ;;  %v7137_v40 = vadd.f32 %v11859_v29, %v7115_v14 }
 0x5d7   : > { %v7033_v47 = vmax.f32 %v7017_v8, 0.0  ;;  %v6983_v59 = vmul.f32 0.125, %v6945_v17  ;;  %v7116_v13 = vmul.f32 %v11840_v32, %v7094_v20 }
 0x5d8   : > { %v9368_v16 = vpop.eup %9367  ;;  %v7050_v62 = vadd.f32 1e-05, %v7034_v50  ;;  %v7016_v35 = vsub.f32 %v6984_v12, %v7000_v1  ;;  %vm7153_vm0 = vcmp.ge.f32.partialorder %v7137_v40, 0.0  ;;  %v7169_v53 = vmul.f32 0.01, %v7137_v40 }
 0x5d9   : > { %v9370_v42 = vpop.eup %9369  ;;  %v7049_v24 = vadd.f32 1e-05, %v7033_v47  ;;  %v7015_v46 = vsub.f32 %v6983_v59, %v6999_v61  ;;  %v6886_v18 = vpop.xlane.xlu1 %6885  ;;  %v7138_v6 = vadd.f32 %v11859_v29, %v7116_v13  ;;  %v7092_v19 = vmul.f32 %v9368_v16, %v7076_v21 }
 0x5da   : > { %9371 = vrsqrt.f32 %v7050_v62  ;;  %v7032_v43 = vmax.f32 %v7016_v35, 0.0  ;;  %v7185_v14 = vsel %vm7153_vm0, %v7137_v40, %v7169_v53  ;;  %v6883_v8 = vpop.xlane.xlu0 %6882  ;;  %v7091_v1 = vmul.f32 %v9370_v42, %v7075_v2 }
 0x5db   : > { %9373 = vrsqrt.f32 %v7049_v24  ;;  %v7031_v5 = vmax.f32 %v7015_v46, 0.0  ;;  %v7573_v20 = vadd.f32 %v7517_v37, %v7185_v14  ;;  %vm7154_vm1 = vcmp.ge.f32.partialorder %v7138_v6, 0.0 }
 0x5dc   : > { %v7048_v50 = vadd.f32 1e-05, %v7032_v43  ;;  %v7113_v17 = vmul.f32 %v11840_v32, %v7091_v1  ;;  %v7170_v22 = vmul.f32 0.01, %v7138_v6  ;;  %v11880_v40 = vmul.f32 0.125, %v6886_v18 }
 0x5dd   : > { %v7047_v12 = vadd.f32 1e-05, %v7031_v5  ;;  %7589 = vst.msk [vmem:[%s9549_s26 + $0x10] sm:$0xff] %vm3487_vm8, %v7573_v20  ;;  %v6880_v0 = vpop.xlane.xlu1 %6879  ;;  %v7509_v37 = vadd.f32 %v11849_v10, %v11773_v58  ;;  %v7512_v47 = vadd.f32 %v11849_v10, %v11796_v51  ;;  %v11887_v59 = vmul.f32 0.125, %v6883_v8 }
 0x5de   : > { %9375 = vrsqrt.f32 %v7048_v50  ;;  %v6877_v61 = vpop.xlane.xlu0 %6876  ;;  %v7135_v34 = vadd.f32 %v11859_v29, %v7113_v17  ;;  %v7186_v13 = vsel %vm7154_vm1, %v7138_v6, %v7170_v22  ;;  %v7114_v62 = vmul.f32 %v11840_v32, %v7092_v19 }
 0x5df   : > { %9377 = vrsqrt.f32 %v7047_v12  ;;  %v7574_v16 = vadd.f32 %v7520_v9, %v7186_v13  ;;  %v11892_v35 = vadd.f32 %v11800_v3, %v11849_v10  ;;  %v11896_v58 = vadd.f32 %v11804_v7, %v11849_v10 }
 0x5e0   : > { %vm7151_vm4 = vcmp.ge.f32.partialorder %v7135_v34, 0.0  ;;  %v7167_v51 = vmul.f32 0.01, %v7135_v34  ;;  %v11898_v53 = vmul.f32 0.125, %v6880_v0  ;;  %v11900_v42 = vmul.f32 0.125, %v6877_v61 }
 0x5e1   : > { %v6966_v2 = vpop.xlane.xlu1 %6965  ;;  %v7082_v24 = vsub.f32 %v11695_v56, %v11832_v52  ;;  %v7006_v46 = vmul.f32 %v11880_v40, %v11880_v40  ;;  %7590 = vst.msk [vmem:[%s9549_s26 + $0x18] sm:$0xff] %vm3487_vm8, %v7574_v16  ;;  %v7136_v3 = vadd.f32 %v11859_v29, %v7114_v62  ;;  %v7081_v6 = vsub.f32 %v11699_v25, %v11834_v15 }
 0x5e2   : > { %v6990_v18 = vmul.f32 0.125, %v6966_v2  ;;  %v6963_v7 = vpop.xlane.xlu0 %6962  ;;  %v7183_v21 = vsel %vm7151_vm4, %v7135_v34, %v7167_v51  ;;  %v7005_v43 = vmul.f32 %v11887_v59, %v11887_v59  ;;  %v7004_v1 = vmul.f32 %v11898_v53, %v11898_v53 }
 0x5e3   : > { %v6989_v14 = vmul.f32 0.125, %v6963_v7  ;;  %v7571_v56 = vadd.f32 %v7509_v37, %v7183_v21  ;;  %vm7152_vm7 = vcmp.ge.f32.partialorder %v7136_v3, 0.0  ;;  %v7168_v52 = vmul.f32 0.01, %v7136_v3 }
 0x5e4   : > { %v9372_v8 = vpop.eup %9371  ;;  %v7022_v5 = vsub.f32 %v6990_v18, %v7006_v46  ;;  %v7003_v50 = vmul.f32 %v11900_v42, %v11900_v42  ;;  %v7079_v18 = vsub.f32 %v11708_v33, %v11854_v27 }
 0x5e5   : > { %v9374_v20 = vpop.eup %9373  ;;  %v7021_v9 = vsub.f32 %v6989_v14, %v7005_v43  ;;  %v6960_v19 = vpop.xlane.xlu1 %6959  ;;  %v7098_v25 = vmul.f32 %v9372_v8, %v7082_v24  ;;  %7587 = vst.msk [vmem:[%s9549_s26] sm:$0xff] %vm3487_vm8, %v7571_v56  ;;  %v7184_v15 = vsel %vm7152_vm7, %v7136_v3, %v7168_v52  ;;  %v7525_v24 = vadd.f32 %v11849_v10, %v11802_v49 }
 0x5e6   : > { %v7038_v12 = vmax.f32 %v7022_v5, 0.0  ;;  %v6988_v17 = vmul.f32 0.125, %v6960_v19  ;;  %v6957_v22 = vpop.xlane.xlu0 %6956  ;;  %v7097_v0 = vmul.f32 %v9374_v20, %v7081_v6  ;;  %v7572_v37 = vadd.f32 %v7512_v47, %v7184_v15 }
 0x5e7   : > { %v7037_v61 = vmax.f32 %v7021_v9, 0.0  ;;  %v6987_v34 = vmul.f32 0.125, %v6957_v22  ;;  %v7120_v13 = vmul.f32 %v11840_v32, %v7098_v25  ;;  %v7080_v3 = vsub.f32 %v11703_v39, %v11844_v41 }
 0x5e8   : > { %v9376_v16 = vpop.eup %9375  ;;  %v7054_v62 = vadd.f32 1e-05, %v7038_v12  ;;  %v7020_v51 = vsub.f32 %v6988_v17, %v7004_v1  ;;  %v7119_v2 = vmul.f32 %v11840_v32, %v7097_v0  ;;  %7588 = vst.msk [vmem:[%s9549_s26 + $0x8] sm:$0xff] %vm3487_vm8, %v7572_v37  ;;  %v7528_v39 = vadd.f32 %v11849_v10, %v11806_v11 }
 0x5e9   : > { %v9378_v46 = vpop.eup %9377  ;;  %v7053_v47 = vadd.f32 1e-05, %v7037_v61  ;;  %v7019_v7 = vsub.f32 %v6987_v34, %v7003_v50  ;;  %v6898_v6 = vpop.xlane.xlu1 %6897  ;;  %v7142_v8 = vadd.f32 %v11859_v29, %v7120_v13  ;;  %v7096_v27 = vmul.f32 %v9376_v16, %v7080_v3 }
 0x5ea   : > { %9379 = vrsqrt.f32 %v7054_v62  ;;  %v7036_v21 = vmax.f32 %v7020_v51, 0.0  ;;  %v7141_v43 = vadd.f32 %v11859_v29, %v7119_v2  ;;  %v6895_v14 = vpop.xlane.xlu0 %6894  ;;  %v7095_v56 = vmul.f32 %v9378_v46, %v7079_v18 }
 0x5eb   : > { %9381 = vrsqrt.f32 %v7053_v47  ;;  %v7035_v49 = vmax.f32 %v7019_v7, 0.0  ;;  %v11936_v1 = vadd.f32 %v11808_v48, %v11849_v10  ;;  %v11940_v50 = vadd.f32 %v11812_v55, %v11849_v10 }
 0x5ec   : > { %v7052_v41 = vadd.f32 1e-05, %v7036_v21  ;;  %vm7157_vm9 = vcmp.ge.f32.partialorder %v7141_v43, 0.0  ;;  %v7173_v33 = vmul.f32 0.01, %v7141_v43  ;;  %v7117_v5 = vmul.f32 %v11840_v32, %v7095_v56 }
 0x5ed   : > { %v7051_v52 = vadd.f32 1e-05, %v7035_v49  ;;  %v6892_v20 = vpop.xlane.xlu1 %6891  ;;  %v7086_v11 = vsub.f32 %v11727_v36, %v11880_v40  ;;  %vm7158_vm12 = vcmp.ge.f32.partialorder %v7142_v8, 0.0  ;;  %v7174_v12 = vmul.f32 0.01, %v7142_v8 }
 0x5ee   : > { %9383 = vrsqrt.f32 %v7052_v41  ;;  %v7189_v9 = vsel %vm7157_vm9, %v7141_v43, %v7173_v33  ;;  %v6889_v19 = vpop.xlane.xlu0 %6888  ;;  %v7139_v15 = vadd.f32 %v11859_v29, %v7117_v5  ;;  %v11946_v48 = vmul.f32 0.125, %v6898_v6 }
 0x5ef   : > { %9385 = vrsqrt.f32 %v7051_v52  ;;  %v7577_v25 = vadd.f32 %v11892_v35, %v7189_v9  ;;  %v11948_v17 = vmul.f32 0.125, %v6892_v20  ;;  %v11950_v22 = vmul.f32 0.125, %v6889_v19 }
 0x5f0   : > { %v7118_v55 = vmul.f32 %v11840_v32, %v7096_v27  ;;  %v7085_v36 = vsub.f32 %v11731_v60, %v11887_v59  ;;  %vm7155_vm6 = vcmp.ge.f32.partialorder %v7139_v15, 0.0  ;;  %v7171_v40 = vmul.f32 0.01, %v7139_v15 }
 0x5f1   : > { %7593 = vst.msk [vmem:[%s9549_s26 + $0x30] sm:$0xff] %vm3487_vm8, %v7577_v25  ;;  %v7190_v35 = vsel %vm7158_vm12, %v7142_v8, %v7174_v12  ;;  %v6972_v0 = vpop.xlane.xlu1 %6971  ;;  %v7084_v37 = vsub.f32 %v11735_v45, %v11898_v53  ;;  %v7083_v61 = vsub.f32 %v11740_v54, %v11900_v42  ;;  %v11961_v34 = vmul.f32 0.125, %v6895_v14 }
 0x5f2   : > { %v7578_v13 = vadd.f32 %v11896_v58, %v7190_v35  ;;  %v6969_v16 = vpop.xlane.xlu0 %6968  ;;  %v7187_v62 = vsel %vm7155_vm6, %v7139_v15, %v7171_v40  ;;  %v7008_v60 = vmul.f32 %v11948_v17, %v11948_v17  ;;  %v7140_v59 = vadd.f32 %v11859_v29, %v7118_v55 }
 0x5f3   : > { %v6992_v51 = vmul.f32 0.125, %v6972_v0  ;;  %v7010_v45 = vmul.f32 %v11946_v48, %v11946_v48  ;;  %v7575_v53 = vadd.f32 %v7525_v24, %v7187_v62  ;;  %v7007_v54 = vmul.f32 %v11950_v22, %v11950_v22 }
 0x5f4   : > { %v9380_v2 = vpop.eup %9379  ;;  %7594 = vst.msk [vmem:[%s9549_s26 + $0x38] sm:$0xff] %vm3487_vm8, %v7578_v13  ;;  %v6991_v58 = vmul.f32 0.125, %v6969_v16  ;;  %vm7156_vm13 = vcmp.ge.f32.partialorder %v7140_v59, 0.0  ;;  %v7172_v46 = vmul.f32 0.01, %v7140_v59  ;;  %v7009_v7 = vmul.f32 %v11961_v34, %v11961_v34 }
 0x5f5   : > { %v9382_v42 = vpop.eup %9381  ;;  %v7024_v3 = vsub.f32 %v6992_v51, %v7008_v60  ;;  %v6978_v18 = vpop.xlane.xlu1 %6977  ;;  %v7102_v47 = vmul.f32 %v9380_v2, %v7086_v11  ;;  %7591 = vst.msk [vmem:[%s9549_s26 + $0x20] sm:$0xff] %vm3487_vm8, %v7575_v53  ;;  %v7544_v53 = vadd.f32 %v11849_v10, %v11814_v57 }
 0x5f6   : > { %v7023_v6 = vsub.f32 %v6991_v58, %v7007_v54  ;;  %v6994_v21 = vmul.f32 0.125, %v6978_v18  ;;  %v6975_v24 = vpop.xlane.xlu0 %6974  ;;  %v7101_v43 = vmul.f32 %v9382_v42, %v7085_v36  ;;  %v7188_v14 = vsel %vm7156_vm13, %v7140_v59, %v7172_v46 }
 0x5f7   : > { %v7040_v8 = vmax.f32 %v7024_v3, 0.0  ;;  %v6993_v49 = vmul.f32 0.125, %v6975_v24  ;;  %v7124_v56 = vmul.f32 %v11840_v32, %v7102_v47  ;;  %v7576_v33 = vadd.f32 %v7528_v39, %v7188_v14 }
 0x5f8   : > { %v9384_v41 = vpop.eup %9383  ;;  %v7039_v27 = vmax.f32 %v7023_v6, 0.0  ;;  %v7026_v52 = vsub.f32 %v6994_v21, %v7010_v45  ;;  %v7123_v5 = vmul.f32 %v11840_v32, %v7101_v43  ;;  %v7541_v45 = vadd.f32 %v11849_v10, %v11810_v30 }
 0x5f9   : > { %v9386_v20 = vpop.eup %9385  ;;  %v7056_v11 = vadd.f32 1e-05, %v7040_v8  ;;  %v7025_v9 = vsub.f32 %v6993_v49, %v7009_v7  ;;  %v7146_v19 = vadd.f32 %v11859_v29, %v7124_v56  ;;  %v7100_v25 = vmul.f32 %v9384_v41, %v7084_v37  ;;  %7592 = vst.msk [vmem:[%s9549_s26 + $0x28] sm:$0xff] %vm3487_vm8, %v7576_v33 }
 0x5fa   : > { %v7055_v15 = vadd.f32 1e-05, %v7039_v27  ;;  %v7042_v12 = vmax.f32 %v7026_v52, 0.0  ;;  %v7145_v55 = vadd.f32 %v11859_v29, %v7123_v5  ;;  %v7099_v36 = vmul.f32 %v9386_v20, %v7083_v61 }
 0x5fb   : > { %9387 = vrsqrt.f32 %v7056_v11  ;;  %v7041_v40 = vmax.f32 %v7025_v9, 0.0  ;;  %vm7162_vm14 = vcmp.ge.f32.partialorder %v7146_v19, 0.0  ;;  %v7178_v39 = vmul.f32 0.01, %v7146_v19 }
 0x5fc   : > { %9389 = vrsqrt.f32 %v7055_v15  ;;  %v7058_v35 = vadd.f32 1e-05, %v7042_v12  ;;  %vm7161_vm10 = vcmp.ge.f32.partialorder %v7145_v55, 0.0  ;;  %v7177_v0 = vmul.f32 0.01, %v7145_v55 }
 0x5fd   : > { %v7057_v13 = vadd.f32 1e-05, %v7041_v40  ;;  %v7121_v37 = vmul.f32 %v11840_v32, %v7099_v36  ;;  %v7194_v16 = vsel %vm7162_vm14, %v7146_v19, %v7178_v39  ;;  %v7122_v62 = vmul.f32 %v11840_v32, %v7100_v25 }
 0x5fe   : > { %9391 = vrsqrt.f32 %v7058_v35  ;;  %v7193_v60 = vsel %vm7161_vm10, %v7145_v55, %v7177_v0  ;;  %v7582_v61 = vadd.f32 %v11940_v50, %v7194_v16  ;;  %v7088_v42 = vsub.f32 %v11769_v4, %v11948_v17 }
 0x5ff   : > { %9393 = vrsqrt.f32 %v7057_v13  ;;  %v7581_v59 = vadd.f32 %v11936_v1, %v7193_v60  ;;  %v7143_v51 = vadd.f32 %v11859_v29, %v7121_v37  ;;  %v7144_v2 = vadd.f32 %v11859_v29, %v7122_v62 }
 0x600   : > { %7598 = vst.msk [vmem:[%s9549_s26 + $0x58] sm:$0xff] %vm3487_vm8, %v7582_v61  ;;  %v7087_v18 = vsub.f32 %v11776_v38, %v11950_v22  ;;  %v7090_v7 = vsub.f32 %v11759_v31, %v11946_v48  ;;  %v7089_v4 = vsub.f32 %v11763_v26, %v11961_v34  ;;  %v7560_v31 = vadd.f32 %v11849_v10, %v11822_v63 }
 0x601   : > { %7597 = vst.msk [vmem:[%s9549_s26 + $0x50] sm:$0xff] %vm3487_vm8, %v7581_v59  ;;  %vm7159_vm15 = vcmp.ge.f32.partialorder %v7143_v51, 0.0  ;;  %v7175_v50 = vmul.f32 0.01, %v7143_v51  ;;  %vm7160_vm2 = vcmp.ge.f32.partialorder %v7144_v2, 0.0  ;;  %v7557_v26 = vadd.f32 %v11849_v10, %v11818_v23 }
 0x602   : > { %v7176_v1 = vmul.f32 0.01, %v7144_v2  ;;  %v7568_v20 = vadd.f32 %v11820_v44, %v11849_v10  ;;  %v7565_v11 = vadd.f32 %v11816_v28, %v11849_v10 }
 0x603   : > { %v7191_v54 = vsel %vm7159_vm15, %v7143_v51, %v7175_v50 }
 0x604   : > { %v7192_v58 = vsel %vm7160_vm2, %v7144_v2, %v7176_v1  ;;  %v7579_v46 = vadd.f32 %v7541_v45, %v7191_v54 }
 0x605   : > { %v7580_v30 = vadd.f32 %v7544_v53, %v7192_v58  ;;  %v9388_v3 = vpop.eup %9387 }
 0x606   : > { %v9390_v47 = vpop.eup %9389  ;;  %7595 = vst.msk [vmem:[%s9549_s26 + $0x40] sm:$0xff] %vm3487_vm8, %v7579_v46  ;;  %v7104_v57 = vmul.f32 %v9388_v3, %v7088_v42 }
 0x607   : > { %7596 = vst.msk [vmem:[%s9549_s26 + $0x48] sm:$0xff] %vm3487_vm8, %v7580_v30  ;;  %v7103_v6 = vmul.f32 %v9390_v47, %v7087_v18 }
 0x608   : > { %v9392_v21 = vpop.eup %9391  ;;  %v7126_v17 = vmul.f32 %v11840_v32, %v7104_v57 }
 0x609   : > { %v9394_v24 = vpop.eup %9393  ;;  %v7125_v43 = vmul.f32 %v11840_v32, %v7103_v6  ;;  %v7106_v38 = vmul.f32 %v9392_v21, %v7090_v7 }
 0x60a   : > { %v7105_v22 = vmul.f32 %v9394_v24, %v7089_v4  ;;  %v7148_v14 = vadd.f32 %v11859_v29, %v7126_v17 }
 0x60b   : > { %v7147_v8 = vadd.f32 %v11859_v29, %v7125_v43  ;;  %v7128_v49 = vmul.f32 %v11840_v32, %v7106_v38 }
 0x60c   : > { %v7127_v48 = vmul.f32 %v11840_v32, %v7105_v22  ;;  %vm7164_vm5 = vcmp.ge.f32.partialorder %v7148_v14, 0.0  ;;  %v7180_v34 = vmul.f32 0.01, %v7148_v14 }
 0x60d   : > { %vm7163_vm11 = vcmp.ge.f32.partialorder %v7147_v8, 0.0  ;;  %v7179_v56 = vmul.f32 0.01, %v7147_v8  ;;  %v7150_v41 = vadd.f32 %v11859_v29, %v7128_v49 }
 0x60e   : > { %v7149_v33 = vadd.f32 %v11859_v29, %v7127_v48  ;;  %v7196_v27 = vsel %vm7164_vm5, %v7148_v14, %v7180_v34 }
 0x60f   : > { %v7195_v52 = vsel %vm7163_vm11, %v7147_v8, %v7179_v56  ;;  %vm7166_vm3 = vcmp.ge.f32.partialorder %v7150_v41, 0.0  ;;  %v7182_v63 = vmul.f32 0.01, %v7150_v41  ;;  %v7584_v32 = vadd.f32 %v7560_v31, %v7196_v27 }
 0x610   : > { %vm7165_vm0 = vcmp.ge.f32.partialorder %v7149_v33, 0.0  ;;  %v7181_v5 = vmul.f32 0.01, %v7149_v33  ;;  %v7583_v23 = vadd.f32 %v7557_v26, %v7195_v52 }
 0x611   : > { %v7198_v9 = vsel %vm7166_vm3, %v7150_v41, %v7182_v63  ;;  %7600 = vst.msk [vmem:[%s9549_s26 + $0x68] sm:$0xff] %vm3487_vm8, %v7584_v32 }
 0x612   : > { %v7197_v29 = vsel %vm7165_vm0, %v7149_v33, %v7181_v5  ;;  %7599 = vst.msk [vmem:[%s9549_s26 + $0x60] sm:$0xff] %vm3487_vm8, %v7583_v23  ;;  %v7586_v19 = vadd.f32 %v7568_v20, %v7198_v9 }
 0x613   : > { %v7585_v25 = vadd.f32 %v7565_v11, %v7197_v29 }
 0x614   : > { %7602 = vst.msk [vmem:[%s9549_s26 + $0x78] sm:$0xff] %vm3487_vm8, %v7586_v19 }
 0x615   : > { %7601 = vst.msk [vmem:[%s9549_s26 + $0x70] sm:$0xff] %vm3487_vm8, %v7585_v25 }
 0x616 PF: > { %s21_s21 = sadd.s32 1, %s9433_s21   ;;  %s12074_s25 = sld [smem:[#allocation3_spill]] }
 0x617   : > { %p18_p10 = scmp.ge.s32.totalorder %s21_s21, 6   ;;  %s12075_s28 = sld [smem:[#allocation4_spill]] }
 0x618   : > { %s12076_s17 = smov %s9425_s19  ;;  %s12077_s18 = smov %s9429_s20 }
 0x619   :  { %20 = sbr.rel (!%p18_p10) target bundleno = 3 (0x3), region = 123 }
 0x61c   : > { %s12078_s19 = smov %s12074_s25 }
 0x61d   : > { %s12079_s20 = smov %s12075_s28 }

</bundles_post_ra>
